<compile_context>
chip_gen: v7x
topology: tpu7x:2x2x1
jax: 0.10.0
libtpu: 0.0.40
codegen_flags: <defaults>
</compile_context>

<pallas_src>
import functools

import jax
import jax.numpy as jnp
import numpy as np
from jax import lax
from jax.experimental import pallas as pl
from jax.experimental.pallas import tpu as pltpu


def _siren_residual_kernel(x_ref, w1_ref, b1_ref, w2_ref, b2_ref, o_ref,
                           *, weight_2):
    """One row-tile of the residual SIREN block.

    x_ref  : (TM, Fp)  input tile
    w1_ref : (Fp, Fp)  W1' = (omega_0 * weight_1) * W1   (contracted on axis 1 == W.T matmul)
    b1_ref : (1,  Fp)  b1' = omega_0 * b1
    w2_ref : (Fp, Fp)  W2' = omega_0 * W2
    b2_ref : (1,  Fp)  b2' = omega_0 * b2
    o_ref  : (TM, Fp)  output tile
    """
    x = x_ref[...].astype(jnp.float32)

    # sine_1 = sin(x @ W1'.T + b1')   (omega_0 & weight_1 pre-folded)
    h1 = lax.dot_general(x, w1_ref[...], (((1,), (1,)), ((), ())),
                         preferred_element_type=jnp.float32) + b1_ref[...]
    s1 = jnp.sin(h1)

    # sine_2 = sin(sine_1 @ W2'.T + b2')
    h2 = lax.dot_general(s1, w2_ref[...], (((1,), (1,)), ((), ())),
                         preferred_element_type=jnp.float32) + b2_ref[...]
    s2 = jnp.sin(h2)

    res = x + s2
    if weight_2 != 1.0:          # Python float -> resolved at trace time.
        res = weight_2 * res
    o_ref[...] = res.astype(o_ref.dtype)


def _pick_tile_rows(n_rows, max_tile=1024):
    """Largest multiple-of-8 divisor of n_rows, <= max_tile, preferring a grid
    length of at least 2 (so both v7x TensorCores are used)."""
    cands = [d for d in range(8, min(n_rows, max_tile) + 1, 8) if n_rows % d == 0]
    if not cands:
        return n_rows
    two_plus = [d for d in cands if n_rows // d >= 2]
    pool = two_plus if two_plus else cands
    return max(pool)


def smallify_residual_siren_forward(x, w1, b1, w2, b2, *,
                                    omega_0=30.0, weight_1=1.0, weight_2=1.0,
                                    max_tile_rows=1024):
    """x: (N, F); w1: (F, F) stored as (in, intermed) like the PyTorch module;
    b1: (F,); w2: (F, F); b2: (F,)."""
    N, F = x.shape
    assert w1.shape == (F, F) and w2.shape == (F, F)
    f32 = jnp.float32

    # --- constant folding (one-time wrapper cost, hoisted under jit) ---------
    w1f = (float(omega_0) * float(weight_1)) * w1.astype(f32)
    b1f = float(omega_0) * b1.astype(f32)
    w2f = float(omega_0) * w2.astype(f32)
    b2f = float(omega_0) * b2.astype(f32)

    # --- lane-dense padding of the feature axis to a multiple of 128 --------
    Fp = ((F + 127) // 128) * 128
    x_p = x
    if Fp != F:
        pf = Fp - F
        x_p = jnp.pad(x_p, ((0, 0), (0, pf)))
        w1f = jnp.pad(w1f, ((0, pf), (0, pf)))
        w2f = jnp.pad(w2f, ((0, pf), (0, pf)))
        b1f = jnp.pad(b1f, (0, pf))
        b2f = jnp.pad(b2f, (0, pf))

    # --- pad rows to a multiple of 8 (sublane) -------------------------------
    Np = ((N + 7) // 8) * 8
    if Np != N:
        x_p = jnp.pad(x_p, ((0, Np - N), (0, 0)))

    tile_rows = _pick_tile_rows(Np, max_tile_rows)
    grid = (Np // tile_rows,)

    b1_2d = b1f.reshape(1, Fp)
    b2_2d = b2f.reshape(1, Fp)

    kernel = functools.partial(_siren_residual_kernel, weight_2=float(weight_2))

    # TODO(synk): if F grows large (>=512) budget VMEM explicitly for the two
    # resident (Fp, Fp) weights (vmem_limit_bytes / bf16 weights), esp. on v7x.
    out_p = pl.pallas_call(
        kernel,
        out_shape=jax.ShapeDtypeStruct((Np, Fp), x.dtype),
        grid_spec=pltpu.PrefetchScalarGridSpec(
            num_scalar_prefetch=0,
            grid=grid,
            in_specs=[
                pl.BlockSpec((tile_rows, Fp), lambda i: (i, 0)),  # x tile
                pl.BlockSpec((Fp, Fp), lambda i: (0, 0)),         # W1' (resident)
                pl.BlockSpec((1, Fp), lambda i: (0, 0)),          # b1'
                pl.BlockSpec((Fp, Fp), lambda i: (0, 0)),         # W2' (resident)
                pl.BlockSpec((1, Fp), lambda i: (0, 0)),          # b2'
            ],
            out_specs=pl.BlockSpec((tile_rows, Fp), lambda i: (i, 0)),
        ),
        compiler_params=pltpu.CompilerParams(
            dimension_semantics=("parallel",),
        ),
    )(x_p, w1f, b1_2d, w2f, b2_2d)

    return out_p[:N, :F]


def _reference_forward(x, w1, b1, w2, b2, omega_0, weight_1, weight_2):
    # Pure-JAX replication of the PyTorch forward (F.linear = x @ W.T + b).
    s1 = jnp.sin(omega_0 * ((weight_1 * x) @ w1.T + b1))
    s2 = jnp.sin(omega_0 * (s1 @ w2.T + b2))
    return weight_2 * (x + s2)


if __name__ == "__main__":
    # Module hyper-params (in_features == intermed_features required by the
    # original forward's shapes -- see note above).
    in_features = 64
    intermed_features = 64
    omega_0 = 30.0
    weight_1 = 1.0   # ave_first=False
    weight_2 = 1.0   # ave_second=False
    N = 256          # number of input points (batch of coordinates)

    key = jax.random.PRNGKey(0)
    kx, k1, k2, kb1, kb2 = jax.random.split(key, 5)

    # Deterministic parameter init mirroring the module's __init__ ranges.
    w_bound = np.sqrt(6.0 / in_features) / omega_0
    w1 = jax.random.uniform(k1, (in_features, intermed_features),
                            minval=-w_bound, maxval=w_bound, dtype=jnp.float32)
    w2 = jax.random.uniform(k2, (intermed_features, in_features),
                            minval=-w_bound, maxval=w_bound, dtype=jnp.float32)
    b1 = jax.random.uniform(kb1, (intermed_features,),
                            minval=-np.sqrt(1.0 / in_features),
                            maxval=np.sqrt(1.0 / in_features), dtype=jnp.float32)
    b2 = jax.random.uniform(kb2, (in_features,),
                            minval=-np.sqrt(1.0 / intermed_features),
                            maxval=np.sqrt(1.0 / intermed_features), dtype=jnp.float32)

    x = jax.random.uniform(kx, (N, in_features), minval=-1.0, maxval=1.0,
                           dtype=jnp.float32)

    fwd = jax.jit(functools.partial(
        smallify_residual_siren_forward,
        omega_0=omega_0, weight_1=weight_1, weight_2=weight_2))
    out = fwd(x, w1, b1, w2, b2)
    out = jax.block_until_ready(out)

    ref = _reference_forward(x, w1, b1, w2, b2, omega_0, weight_1, weight_2)
    np.testing.assert_allclose(np.asarray(out), np.asarray(ref),
                               rtol=1e-5, atol=1e-5)

    # TODO(synk): training-time betas multiply + SmallifySignVarianceTracker EMA
    # updates are stateful training-only logic, not part of the eval forward.
    print("KERNEL_OK")
</pallas_src>

<mosaic_0001>
module attributes {stable_mosaic.version = 11 : i64} {
  func.func @_siren_residual_kernel(%arg0: i32, %arg1: memref<128x128xf32, #tpu.memory_space<vmem>>, %arg2: memref<128x128xf32, #tpu.memory_space<vmem>>, %arg3: memref<1x128xf32, #tpu.memory_space<vmem>>, %arg4: memref<128x128xf32, #tpu.memory_space<vmem>>, %arg5: memref<1x128xf32, #tpu.memory_space<vmem>>, %arg6: memref<128x128xf32, #tpu.memory_space<vmem>>) attributes {dimension_semantics = [#tpu.dimension_semantics<parallel>], iteration_bounds = array<i64: 2>, scalar_prefetch = 0 : i64, scratch_operands = 0 : i64, tpu.core_type = #tpu.core_type<tc>, window_params = [{transform_indices = @transform_0, window_bounds = array<i64: 128, 128>}, {pipeline_mode = #tpu.pipeline_mode<synchronous>, transform_indices = @transform_1, window_bounds = array<i64: 128, 128>}, {pipeline_mode = #tpu.pipeline_mode<synchronous>, transform_indices = @transform_2, window_bounds = array<i64: 1, 128>}, {pipeline_mode = #tpu.pipeline_mode<synchronous>, transform_indices = @transform_3, window_bounds = array<i64: 128, 128>}, {pipeline_mode = #tpu.pipeline_mode<synchronous>, transform_indices = @transform_4, window_bounds = array<i64: 1, 128>}, {transform_indices = @transform_5, window_bounds = array<i64: 128, 128>}]} {
    %c0 = arith.constant 0 : index
    %c0_0 = arith.constant 0 : index
    %0 = vector.load %arg1[%c0, %c0_0] : memref<128x128xf32, #tpu.memory_space<vmem>>, vector<128x128xf32>
    %c0_1 = arith.constant 0 : index
    %c0_2 = arith.constant 0 : index
    %1 = vector.load %arg2[%c0_1, %c0_2] : memref<128x128xf32, #tpu.memory_space<vmem>>, vector<128x128xf32>
    %cst = arith.constant dense<0.000000e+00> : vector<128x128xf32>
    %2 = tpu.matmul %0, %1, %cst {dimension_numbers = #tpu.dot_dimension_numbers<[1], [1], [0], [0], [0, 0, 1, 0], [], []>} : vector<128x128xf32>, vector<128x128xf32>, vector<128x128xf32> -> vector<128x128xf32>
    %c0_3 = arith.constant 0 : index
    %c0_4 = arith.constant 0 : index
    %3 = vector.load %arg3[%c0_3, %c0_4] : memref<1x128xf32, #tpu.memory_space<vmem>>, vector<1x128xf32>
    %4 = vector.broadcast %3 : vector<1x128xf32> to vector<128x128xf32>
    %5 = arith.addf %2, %4 : vector<128x128xf32>
    %6 = math.sin %5 : vector<128x128xf32>
    %c0_5 = arith.constant 0 : index
    %c0_6 = arith.constant 0 : index
    %7 = vector.load %arg4[%c0_5, %c0_6] : memref<128x128xf32, #tpu.memory_space<vmem>>, vector<128x128xf32>
    %cst_7 = arith.constant dense<0.000000e+00> : vector<128x128xf32>
    %8 = tpu.matmul %6, %7, %cst_7 {dimension_numbers = #tpu.dot_dimension_numbers<[1], [1], [0], [0], [0, 0, 1, 0], [], []>} : vector<128x128xf32>, vector<128x128xf32>, vector<128x128xf32> -> vector<128x128xf32>
    %c0_8 = arith.constant 0 : index
    %c0_9 = arith.constant 0 : index
    %9 = vector.load %arg5[%c0_8, %c0_9] : memref<1x128xf32, #tpu.memory_space<vmem>>, vector<1x128xf32>
    %10 = vector.broadcast %9 : vector<1x128xf32> to vector<128x128xf32>
    %11 = arith.addf %8, %10 : vector<128x128xf32>
    %12 = math.sin %11 : vector<128x128xf32>
    %13 = arith.addf %0, %12 : vector<128x128xf32>
    %c0_10 = arith.constant 0 : index
    %c0_11 = arith.constant 0 : index
    %14 = vector.load %arg6[%c0_10, %c0_11] : memref<128x128xf32, #tpu.memory_space<vmem>>, vector<128x128xf32>
    tpu.vector_store %arg6[%c0_10, %c0_11], %13 {strides = array<i32>} : memref<128x128xf32, #tpu.memory_space<vmem>>, vector<128x128xf32>,
    return
  }
  func.func @transform_0(%arg0: i32) -> (i32, i32) {
    %c0_i32 = arith.constant 0 : i32
    %c0_i32_0 = arith.constant 0 : i32
    return %arg0, %c0_i32 : i32, i32
  }
  func.func @transform_1(%arg0: i32) -> (i32, i32) {
    %c0_i32 = arith.constant 0 : i32
    %c0_i32_0 = arith.constant 0 : i32
    %c0_i32_1 = arith.constant 0 : i32
    return %c0_i32, %c0_i32_0 : i32, i32
  }
  func.func @transform_2(%arg0: i32) -> (i32, i32) {
    %c0_i32 = arith.constant 0 : i32
    %c0_i32_0 = arith.constant 0 : i32
    %c0_i32_1 = arith.constant 0 : i32
    return %c0_i32, %c0_i32_0 : i32, i32
  }
  func.func @transform_3(%arg0: i32) -> (i32, i32) {
    %c0_i32 = arith.constant 0 : i32
    %c0_i32_0 = arith.constant 0 : i32
    %c0_i32_1 = arith.constant 0 : i32
    return %c0_i32, %c0_i32_0 : i32, i32
  }
  func.func @transform_4(%arg0: i32) -> (i32, i32) {
    %c0_i32 = arith.constant 0 : i32
    %c0_i32_0 = arith.constant 0 : i32
    %c0_i32_1 = arith.constant 0 : i32
    return %c0_i32, %c0_i32_0 : i32, i32
  }
  func.func @transform_5(%arg0: i32) -> (i32, i32) {
    %c0_i32 = arith.constant 0 : i32
    %c0_i32_0 = arith.constant 0 : i32
    return %arg0, %c0_i32 : i32, i32
  }
}

</mosaic_0001>

<bundles_post_ra>
// kernel: smallify_residual_siren_forward.1
= control target key start
LH: loop header
LB: loop body
LE: loop exit
PB: predicated region body
PF: predicated region fallthrough
CT: control target
= control target key end

     0   :  { %s4710_s18 = smov 0   ;;  %s7668_s0 = inlined_call_operand.vmem [shape: f32[256,128], index: 0, kind: input, shape index: {}]   ;;  %s7669_s1 = inlined_call_operand.vmem [shape: f32[128,128], index: 1, kind: input, shape index: {}]   ;;  %s7670_s2 = inlined_call_operand.vmem [shape: f32[1,128], index: 2, kind: input, shape index: {}]   ;;  %s7671_s3 = inlined_call_operand.vmem [shape: f32[128,128], index: 3, kind: input, shape index: {}]   ;;  %s7672_s4 = inlined_call_operand.vmem [shape: f32[1,128], index: 4, kind: input, shape index: {}]   ;;  %s7673_s5 = inlined_call_operand.vmem [shape: f32[256,128], index: 5, kind: output, shape index: {}]  }
   0x1 LB: > { %s3996_s19 = sadd.s32 4294967295, %s4672_s18   ;;  %p4000_p0 = scmp.ge.s32.totalorder %s4672_s18, 1  ;;  %s4672_s18 = sphi %s4710_s18, %s15_s18  }
   0x2   : > { %p188_p1 = scmp.lt.s32.totalorder %s4672_s18, 3 }
   0x4   : > { %p189_p2 = pnand %p4000_p0, %p188_p1 }
   0x6   : > { %192 = sbr.rel (%p189_p2) target bundleno = 1322 (0x52a), region = 40 }
   0xd   : > { %v244_v0 = vld [vmem:[%s7669_s1] sm:$0xff]  ;;  %v245_v1 = vld [vmem:[%s7669_s1 + $0x8] sm:$0xff]  ;;  %v246_v2 = vld [vmem:[%s7669_s1 + $0x10] sm:$0xff]  ;;  %s4001_s26 = sshll.u32 %s3996_s19, 4 }
   0xe   : > { %v4313_v3 = vpack.c.bf16 %v245_v1, %v244_v0  ;;  %v247_v4 = vld [vmem:[%s7669_s1 + $0x18] sm:$0xff]  ;;  %p217_p3 = scmp.lt.s32.totalorder %s4001_s26, 31  ;;  %v248_v6 = vld [vmem:[%s7669_s1 + $0x20] sm:$0xff]  ;;  %v249_v7 = vld [vmem:[%s7669_s1 + $0x28] sm:$0xff] }
   0xf   : > { %v4317_v5 = vpack.c.bf16 %v247_v4, %v246_v2  ;;  %v4321_v9 = vpack.c.bf16 %v249_v7, %v248_v6  ;;  %v250_v10 = vld [vmem:[%s7669_s1 + $0x30] sm:$0xff]  ;;  %v251_v11 = vld [vmem:[%s7669_s1 + $0x38] sm:$0xff]  ;;  %v252_v13 = vld [vmem:[%s7669_s1 + $0x40] sm:$0xff] }
  0x10   : > { %4314 = vmatprep.subr.bf16.mxu0 %v4313_v3  ;;  %s7901_s26 = smov (!%p217_p3, %s4001_s26), 31  ;;  %v4325_v12 = vpack.c.bf16 %v251_v11, %v250_v10  ;;  %v253_v14 = vld [vmem:[%s7669_s1 + $0x48] sm:$0xff]  ;;  %v254_v16 = vld [vmem:[%s7669_s1 + $0x50] sm:$0xff]  ;;  %v255_v17 = vld [vmem:[%s7669_s1 + $0x58] sm:$0xff]  ;;  %v7693_v10 = vmov 683565275  }
  0x11   : > { %4316 = vmatpush3.bf16.xpose.msra.mxu0 %v4313_v3  ;;  %s4002_s29 = sshll.u32 %s7901_s26, 3  ;;  %v4329_v15 = vpack.c.bf16 %v253_v14, %v252_v13  ;;  %v4333_v18 = vpack.c.bf16 %v255_v17, %v254_v16  ;;  %v256_v19 = vld [vmem:[%s7669_s1 + $0x60] sm:$0xff]  ;;  %v257_v20 = vld [vmem:[%s7669_s1 + $0x68] sm:$0xff]  ;;  %v258_v22 = vld [vmem:[%s7669_s1 + $0x70] sm:$0xff]  ;;  %v7685_v17 = vmov 2131351028  }
  0x12   : > { %4318 = vmatprep.subr.bf16.mxu0 %v4317_v5  ;;  %s4744_s11 = scalar_lea.vmem %s7668_s0, %s4002_s29  ;;  %v4337_v21 = vpack.c.bf16 %v257_v20, %v256_v19  ;;  %v259_v23 = vld [vmem:[%s7669_s1 + $0x78] sm:$0xff]  ;;  %v4795_v40 = vld [vmem:[%s7670_s2] ss:$0 sm:$0xff]  ;;  %v7687_v20 = vmov 2102212464   ;;  %s6638_s8 = scalar_lea.vmem %s7673_s5, %s4002_s29 }
  0x13   : > { %v228_v8 = vld [vmem:[%s4744_s11] sm:$0xff]  ;;  %v4341_v24 = vpack.c.bf16 %v259_v23, %v258_v22  ;;  %v229_v25 = vld [vmem:[%s4744_s11 + $0x8] sm:$0xff]  ;;  %v230_v26 = vld [vmem:[%s4744_s11 + $0x10] sm:$0xff] }
  0x14   : > { %4233 = vmatprep.mubr.f32.mxu0 %v228_v8  ;;  %v231_v27 = vld [vmem:[%s4744_s11 + $0x18] sm:$0xff]  ;;  %v232_v28 = vld [vmem:[%s4744_s11 + $0x20] sm:$0xff]  ;;  %v233_v29 = vld [vmem:[%s4744_s11 + $0x28] sm:$0xff] }
  0x15   : > { %v234_v30 = vld [vmem:[%s4744_s11 + $0x30] sm:$0xff]  ;;  %v235_v31 = vld [vmem:[%s4744_s11 + $0x38] sm:$0xff]  ;;  %v236_v32 = vld [vmem:[%s4744_s11 + $0x40] sm:$0xff] }
  0x16   : > { %v237_v33 = vld [vmem:[%s4744_s11 + $0x48] sm:$0xff]  ;;  %v238_v34 = vld [vmem:[%s4744_s11 + $0x50] sm:$0xff]  ;;  %v239_v35 = vld [vmem:[%s4744_s11 + $0x58] sm:$0xff] }
  0x17   : > { %v240_v36 = vld [vmem:[%s4744_s11 + $0x60] sm:$0xff]  ;;  %v241_v37 = vld [vmem:[%s4744_s11 + $0x68] sm:$0xff]  ;;  %v242_v38 = vld [vmem:[%s4744_s11 + $0x70] sm:$0xff] }
  0x18   : > { %v243_v39 = vld [vmem:[%s4744_s11 + $0x78] sm:$0xff] }
  0x19   : > { %4320 = vmatpush3.bf16.xpose.msra.mxu0 %v4317_v5 }
  0x1a   : > { %4322 = vmatprep.subr.bf16.mxu0 %v4321_v9 }
  0x21   : > { %4324 = vmatpush3.bf16.xpose.msra.mxu0 %v4321_v9 }
  0x22   : > { %4326 = vmatprep.subr.bf16.mxu0 %v4325_v12 }
  0x29   : > { %4328 = vmatpush3.bf16.xpose.msra.mxu0 %v4325_v12  ;;  %v7683_v12 = vmov 2475754826  }
  0x2a   : > { %4330 = vmatprep.subr.bf16.mxu0 %v4329_v15 }
  0x31   : > { %4332 = vmatpush3.bf16.xpose.msra.mxu0 %v4329_v15 }
  0x32   : > { %4334 = vmatprep.subr.bf16.mxu0 %v4333_v18 }
  0x39   : > { %4336 = vmatpush3.bf16.xpose.msra.mxu0 %v4333_v18 }
  0x3a   : > { %4338 = vmatprep.subr.bf16.mxu0 %v4337_v21 }
  0x41   : > { %4340 = vmatpush3.bf16.xpose.msra.mxu0 %v4337_v21 }
  0x42   : > { %4342 = vmatprep.subr.bf16.mxu0 %v4341_v24 }
  0x49   : > { %4344 = vmatpush3.bf16.xpose.msra.mxu0 %v4341_v24  ;;  %v7681_v24 = vmov 920167782  }
  0x50   : > { %4234 = vmatmul.mubr.f32.vlgmr.msra.gmra.mrb[0].mxu0 %v229_v25 }
  0x51   : > { %4236 = vmatprep.mubr.f32.mxu0 %v230_v26 }
  0x54   : > { %4237 = vmatmul.mubr.f32.gmra.mrb[2].mxu0 %v231_v27  ;;  %v7679_v27 = vmov 1326507024  }
  0x55   : > { %4239 = vmatprep.mubr.f32.mxu0 %v232_v28 }
  0x58   : > { %4240 = vmatmul.mubr.f32.gmra.mrb[4].mxu0 %v233_v29 }
  0x59   : > { %4242 = vmatprep.mubr.f32.mxu0 %v234_v30 }
  0x5c   : > { %4243 = vmatmul.mubr.f32.gmra.mrb[6].mxu0 %v235_v31 }
  0x5d   : > { %4245 = vmatprep.mubr.f32.mxu0 %v236_v32 }
  0x60   : > { %4246 = vmatmul.mubr.f32.gmra.mrb[8].mxu0 %v237_v33 }
  0x61   : > { %4248 = vmatprep.mubr.f32.mxu0 %v238_v34 }
  0x64   : > { %4249 = vmatmul.mubr.f32.gmra.mrb[10].mxu0 %v239_v35 }
  0x65   : > { %4251 = vmatprep.mubr.f32.mxu0 %v240_v36 }
  0x68   : > { %4252 = vmatmul.mubr.f32.gmra.mrb[12].mxu0 %v241_v37 }
  0x69   : > { %4254 = vmatprep.mubr.f32.mxu0 %v242_v38 }
  0x6c   : > { %4255 = vmatmul.mubr.f32.gmra.mrb[14].mxu0 %v243_v39 }
 0x123   : > { %v4235_v41 = vpop.f32.mrb[0].mxu0 }
 0x124   : > { %v4798_v42 = vadd.f32 %v4235_v41, %v4795_v40  ;;  %v333_v43 = vpop.f32.mrb[1].mxu0 }
 0x125   : > { %v4801_v44 = vadd.f32 %v4795_v40, %v333_v43 }
 0x126   : > { %v7678_v45 = vand.u32 2147483647, %v4798_v42  ;;  %v519_v46 = vand.u32 2139095040, %v4798_v42 }
 0x127   : > { %v4238_v47 = vpop.f32.mrb[2].mxu0  ;;  %v415_v51 = vand.u32 2139095040, %v4801_v44 }
 0x128   : > { %v520_v48 = vshrl.u32 %v519_v46, 23  ;;  %v4806_v49 = vadd.f32 %v4238_v47, %v4795_v40  ;;  %v343_v50 = vpop.f32.mrb[3].mxu0  ;;  %v523_v53 = vand.u32 8388607, %v7678_v45 }
 0x129   : > { %v4813_v55 = vadd.f32 %v4795_v40, %v343_v50  ;;  %v416_v59 = vshrl.u32 %v415_v51, 23 }
 0x12a   : > { %v4010_v52 = vadd.s32 4294967169, %v520_v48  ;;  %v727_v54 = vand.u32 2139095040, %v4806_v49  ;;  %v524_v60 = vor.u32 8388608, %v523_v53  ;;  %v7675_v61 = vand.u32 2147483647, %v4806_v49 }
 0x12b   : > { %v4815_v56 = vpop.f32.mrb[4].mxu0  ;;  %v623_v0 = vand.u32 2139095040, %v4813_v55  ;;  %v4006_v4 = vadd.s32 4294967169, %v416_v59 }
 0x12c   : > { %v526_v57 = vadd.s32 1, %v4010_v52  ;;  %v4817_v58 = vpop.f32.mrb[5].mxu0  ;;  %v728_v62 = vshrl.u32 %v727_v54, 23  ;;  %v4825_v6 = vshll.u32 %v524_v60, 8  ;;  %v731_v8 = vand.u32 8388607, %v7675_v61 }
 0x12d   : > { %v624_v14 = vshrl.u32 %v623_v0, 23 }
 0x12e   : > { %vm527_vm0 = vcmp.gt.s32.totalorder %v526_v57, 0  ;;  %v4018_v7 = vadd.s32 4294967169, %v728_v62  ;;  %v732_v48 = vor.u32 8388608, %v731_v8 }
 0x12f   : > { %v528_v63 = vsel %vm527_vm0, %v526_v57, 0  ;;  %v4821_v1 = vpop.f32.mrb[6].mxu0  ;;  %v4014_v38 = vadd.s32 4294967169, %v624_v14 }
 0x130   : > { %v530_v2 = vand.u32 31, %v528_v63  ;;  %v4823_v3 = vpop.f32.mrb[7].mxu0  ;;  %v529_v9 = vshrl.u32 %v528_v63, 5  ;;  %v734_v32 = vadd.s32 1, %v4018_v7  ;;  %v7676_v7 = vand.u32 2147483647, %v4813_v55 }
 0x131   : > { %v630_v62 = vadd.s32 1, %v4014_v38 }
 0x132   : > { %v531_v5 = vsub.s32 32, %v530_v2  ;;  %v533_v11 = vshll.u32 %v7693_v10, %v530_v2  ;;  %v536_v13 = vshll.u32 %v7683_v12, %v530_v2  ;;  %v539_v19 = vshll.u32 %v7685_v17, %v530_v2 }
 0x133   : > { %v4831_v15 = vpop.f32.mrb[8].mxu0  ;;  %v542_v23 = vshll.u32 %v7687_v20, %v530_v2  ;;  %v545_v26 = vshll.u32 %v7681_v24, %v530_v2  ;;  %vm548_vm1 = vcmp.lt.s32.totalorder %v529_v9, 1  ;;  %vm551_vm2 = vcmp.lt.s32.totalorder %v529_v9, 4 }
 0x134   : > { %v534_v16 = vshrl.u32 %v7683_v12, %v531_v5  ;;  %v537_v18 = vshrl.u32 %v7685_v17, %v531_v5  ;;  %v540_v21 = vshrl.u32 %v7687_v20, %v531_v5  ;;  %v4837_v22 = vpop.f32.mrb[9].mxu0  ;;  %v543_v25 = vshrl.u32 %v7681_v24, %v531_v5 }
 0x135   : > { %v546_v28 = vshrl.u32 %v7679_v27, %v531_v5  ;;  %v532_v39 = vshrl.u32 %v7693_v10, %v531_v5  ;;  %vm550_vm3 = vcmp.lt.s32.totalorder %v529_v9, 3  ;;  %vm549_vm4 = vcmp.lt.s32.totalorder %v529_v9, 2 }
 0x136   : > { %v535_v29 = vor.u32 %v534_v16, %v533_v11  ;;  %v538_v30 = vor.u32 %v537_v18, %v536_v13  ;;  %v541_v31 = vor.u32 %v540_v21, %v539_v19  ;;  %v544_v33 = vor.u32 %v543_v25, %v542_v23 }
 0x137   : > { %v547_v34 = vor.u32 %v546_v28, %v545_v26  ;;  %vm735_vm5 = vcmp.gt.s32.totalorder %v734_v32, 0  ;;  %v4853_v2 = vadd.s32 1, %v4006_v4  ;;  %vm631_vm6 = vcmp.gt.s32.totalorder %v630_v62, 0 }
 0x138   : > { %v553_v35 = vsel %vm551_vm2, %v541_v31, 2102212464  ;;  %v556_v36 = vsel %vm548_vm1, %v535_v29, %v538_v30  ;;  %v560_v37 = vsel %vm548_vm1, %v538_v30, %v541_v31  ;;  %v557_v41 = vsel %vm551_vm2, %v544_v33, 920167782 }
 0x139   : > { %v561_v43 = vsel %vm551_vm2, %v547_v34, 1326507024  ;;  %v558_v46 = vsel %vm550_vm3, %v541_v31, %v557_v41  ;;  %v552_v50 = vsel %vm548_vm1, %v532_v39, %v535_v29  ;;  %v554_v51 = vsel %vm550_vm3, %v538_v30, %v553_v35 }
 0x13a   : > { %v562_v47 = vsel %vm550_vm3, %v544_v33, %v561_v43  ;;  %v559_v52 = vsel %vm549_vm4, %v556_v36, %v558_v46  ;;  %v555_v63 = vsel %vm549_vm4, %v552_v50, %v554_v51  ;;  %v736_v0 = vsel %vm735_vm5, %v734_v32, 0  ;;  %v4873_v32 = vpop.f32.mrb[10].mxu0 }
 0x13b   : > { %v563_v53 = vsel %vm549_vm4, %v560_v37, %v562_v47  ;;  %v4849_v59 = vmul.u32.u64.low %v4825_v6, %v559_v52  ;;  %v4850_v60 = vmul.u32.u64.high %v4825_v6, %v559_v52, %v4849_v59  ;;  %v738_v5 = vand.u32 31, %v736_v0 }
 0x13c   : > { %v4845_v54 = vmul.u32.u64.low %v4825_v6, %v563_v53  ;;  %v4846_v57 = vmul.u32.u64.high %v4825_v6, %v563_v53, %v4845_v54  ;;  %v737_v9 = vshrl.u32 %v736_v0, 5  ;;  %v4859_v11 = vshll.u32 %v732_v48, 8 }
 0x13d   : > { %v574_v8 = vadd.s32 1, %v4850_v60  ;;  %v571_v13 = vmul.u32 %v4825_v6, %v555_v63  ;;  %v739_v14 = vsub.s32 32, %v738_v5  ;;  %v741_v16 = vshll.u32 %v7693_v10, %v738_v5 }
 0x13e   : > { %vm573_vm7 = vc.u32 %v4846_v57, %v4849_v59  ;;  %v632_v18 = vsel %vm631_vm6, %v630_v62, 0  ;;  %v744_v19 = vshll.u32 %v7683_v12, %v738_v5  ;;  %v747_v21 = vshll.u32 %v7685_v17, %v738_v5 }
 0x13f   : > { %v575_v4 = vsel %vm573_vm7, %v574_v8, %v4850_v60  ;;  %v750_v23 = vshll.u32 %v7687_v20, %v738_v5  ;;  %v742_v26 = vshrl.u32 %v7683_v12, %v739_v14  ;;  %v745_v28 = vshrl.u32 %v7685_v17, %v739_v14 }
 0x140   : > { %v576_v25 = vadd.s32 %v575_v4, %v571_v13  ;;  %v753_v29 = vshll.u32 %v7681_v24, %v738_v5  ;;  %v748_v6 = vshrl.u32 %v7687_v20, %v739_v14  ;;  %v751_v30 = vshrl.u32 %v7681_v24, %v739_v14 }
 0x141   : > { %v754_v31 = vshrl.u32 %v7679_v27, %v739_v14  ;;  %vm756_vm8 = vcmp.lt.s32.totalorder %v737_v9, 1  ;;  %v740_v34 = vshrl.u32 %v7693_v10, %v739_v14  ;;  %v743_v35 = vor.u32 %v742_v26, %v741_v16 }
 0x142   : > { %v577_v33 = vadd.s32 536870912, %v576_v25  ;;  %v746_v36 = vor.u32 %v745_v28, %v744_v19  ;;  %v749_v37 = vor.u32 %v748_v6, %v747_v21  ;;  %v752_v38 = vor.u32 %v751_v30, %v750_v23 }
 0x143   : > { %v755_v39 = vor.u32 %v754_v31, %v753_v29  ;;  %vm757_vm9 = vcmp.lt.s32.totalorder %v737_v9, 2  ;;  %vm758_vm10 = vcmp.lt.s32.totalorder %v737_v9, 3  ;;  %vm759_vm11 = vcmp.lt.s32.totalorder %v737_v9, 4 }
 0x144   : > { %v4876_v41 = vshrl.u32 %v577_v33, 30  ;;  %v764_v43 = vsel %vm756_vm8, %v743_v35, %v746_v36  ;;  %v761_v46 = vsel %vm759_vm11, %v749_v37, 2102212464  ;;  %v765_v47 = vsel %vm759_vm11, %v752_v38, 920167782 }
 0x145   : > { %v768_v48 = vsel %vm756_vm8, %v746_v36, %v749_v37  ;;  %v769_v50 = vsel %vm759_vm11, %v755_v39, 1326507024  ;;  %v760_v52 = vsel %vm756_vm8, %v740_v34, %v743_v35  ;;  %v766_v53 = vsel %vm758_vm10, %v749_v37, %v765_v47 }
 0x146   : > { %7736 = vst [vmem:[#allocation2_spill] sm:$0xff] %v4876_v41  ;;  %v579_v51 = vshll.u32 %v4876_v41, 30  ;;  %v770_v54 = vsel %vm758_vm10, %v752_v38, %v769_v50  ;;  %v762_v60 = vsel %vm758_vm10, %v746_v36, %v761_v46  ;;  %v767_v62 = vsel %vm757_vm9, %v764_v43, %v766_v53 }
 0x147   : > { %v771_v63 = vsel %vm757_vm9, %v768_v48, %v770_v54  ;;  %v634_v0 = vand.u32 31, %v632_v18  ;;  %v627_v14 = vand.u32 8388607, %v7676_v7  ;;  %v4897_v19 = vshrl.u32 %v632_v18, 5 }
 0x148   : > { %v4884_v5 = vsub.s32 %v576_v25, %v579_v51  ;;  %v4887_v8 = vmul.u32.u64.low %v4859_v11, %v771_v63  ;;  %v4888_v13 = vmul.u32.u64.high %v4859_v11, %v771_v63, %v4887_v8  ;;  %v763_v25 = vsel %vm757_vm9, %v760_v52, %v762_v60 }
 0x149   : > { %v4893_v16 = vmul.u32.u64.low %v4859_v11, %v767_v62  ;;  %v4894_v4 = vmul.u32.u64.high %v4859_v11, %v767_v62, %v4893_v16  ;;  %v635_v21 = vsub.s32 32, %v634_v0  ;;  %v637_v26 = vshll.u32 %v7693_v10, %v634_v0 }
 0x14a   : > { %v582_v23 = vsub.s32 0, %v4884_v5  ;;  %v640_v28 = vshll.u32 %v7683_v12, %v634_v0  ;;  %v643_v30 = vshll.u32 %v7685_v17, %v634_v0  ;;  %v646_v9 = vshll.u32 %v7687_v20, %v634_v0 }
 0x14b   : > { %v638_v29 = vshrl.u32 %v7683_v12, %v635_v21  ;;  %v641_v6 = vshrl.u32 %v7685_v17, %v635_v21  ;;  %v644_v31 = vshrl.u32 %v7687_v20, %v635_v21  ;;  %vm781_vm12 = vc.u32 %v4888_v13, %v4893_v16 }
 0x14c   : > { %v4011_v18 = vmin.u32 %v582_v23, %v4884_v5  ;;  %v647_v33 = vshrl.u32 %v7681_v24, %v635_v21  ;;  %v779_v34 = vmul.u32 %v4859_v11, %v763_v25  ;;  %v782_v35 = vadd.s32 1, %v4894_v4 }
 0x14d   : > { %v639_v36 = vor.u32 %v638_v29, %v637_v26  ;;  %v642_v37 = vor.u32 %v641_v6, %v640_v28  ;;  %v645_v39 = vor.u32 %v644_v31, %v643_v30  ;;  %v650_v46 = vshrl.u32 %v7679_v27, %v635_v21  ;;  %v4941_v26 = vpop.f32.mrb[11].mxu0 }
 0x14e   : > { %v584_v38 = vclz %v4011_v18  ;;  %v648_v43 = vor.u32 %v647_v33, %v646_v9  ;;  %v783_v47 = vsel %vm781_vm12, %v782_v35, %v4894_v4  ;;  %v628_v48 = vor.u32 8388608, %v627_v14  ;;  %v5026_v7 = vpop.f32.mrb[12].mxu0 }
 0x14f   : > { %v649_v50 = vshll.u32 %v7681_v24, %v634_v0  ;;  %vm423_vm13 = vcmp.gt.s32.totalorder %v4853_v2, 0  ;;  %v784_v51 = vadd.s32 %v783_v47, %v779_v34  ;;  %vm652_vm14 = vcmp.lt.s32.totalorder %v4897_v19, 1 }
 0x150   : > { %vm655_vm15 = vcmp.lt.s32.totalorder %v4897_v19, 4  ;;  %vm654_vm0 = vcmp.lt.s32.totalorder %v4897_v19, 3  ;;  %v660_v52 = vsel %vm652_vm14, %v639_v36, %v642_v37  ;;  %v4012_v54 = vadd.s32 4294967294, %v584_v38 }
 0x151   : > { %v651_v11 = vor.u32 %v650_v46, %v649_v50  ;;  %v661_v53 = vsel %vm655_vm15, %v648_v43, 920167782  ;;  %v785_v60 = vadd.s32 536870912, %v784_v51  ;;  %vm653_vm1 = vcmp.lt.s32.totalorder %v4897_v19, 2 }
 0x152   : > { %v662_v62 = vsel %vm654_vm0, %v645_v39, %v661_v53  ;;  %v424_v63 = vsel %vm423_vm13, %v4853_v2, 0  ;;  %v668_v8 = vshll.u32 %v628_v48, 8  ;;  %v4933_v14 = vadd.f32 %v4815_v56, %v4795_v40 }
 0x153   : > { %v663_v0 = vsel %vm653_vm1, %v660_v52, %v662_v62  ;;  %v4935_v4 = vshrl.u32 %v785_v60, 30  ;;  %v657_v23 = vsel %vm655_vm15, %v645_v39, 2102212464  ;;  %v664_v25 = vsel %vm652_vm14, %v642_v37, %v645_v39 }
 0x154   : > { %7737 = vst [vmem:[#allocation3_spill] sm:$0xff] %v4933_v14  ;;  %v636_v2 = vshrl.u32 %v7693_v10, %v635_v21  ;;  %v665_v28 = vsel %vm655_vm15, %v651_v11, 1326507024  ;;  %v4946_v29 = vmul.u32.u64.low %v668_v8, %v663_v0  ;;  %v4947_v6 = vmul.u32.u64.high %v668_v8, %v663_v0, %v4946_v29 }
 0x155   : > { %7738 = vst [vmem:[#allocation4_spill] sm:$0xff] %v4935_v4  ;;  %vm4013_vm2 = vcmp.lt.s32.totalorder %v4012_v54, 0  ;;  %v4950_v56 = vand.u32 31, %v424_v63  ;;  %v787_v30 = vshll.u32 %v4935_v4, 30  ;;  %v666_v31 = vsel %vm654_vm0, %v648_v43, %v665_v28 }
 0x156   : > { %v656_v18 = vsel %vm652_vm14, %v636_v2, %v639_v36  ;;  %v658_v21 = vsel %vm654_vm0, %v642_v37, %v657_v23  ;;  %v667_v9 = vsel %vm653_vm1, %v664_v25, %v666_v31  ;;  %v935_v33 = vand.u32 2139095040, %v4933_v14 }
 0x157   : > { %v587_v34 = vsel %vm4013_vm2, 0, %v4012_v54  ;;  %v4962_v35 = vmul.u32.u64.low %v668_v8, %v667_v9  ;;  %v4963_v38 = vmul.u32.u64.high %v668_v8, %v667_v9, %v4962_v35  ;;  %v4965_v46 = vsub.s32 %v784_v51, %v787_v30 }
 0x158   : > { %v936_v39 = vshrl.u32 %v935_v33, 23  ;;  %v659_v43 = vsel %vm653_vm1, %v656_v18, %v658_v21  ;;  %v678_v36 = vadd.s32 1, %v4947_v6  ;;  %v4971_v47 = vsub.s32 32, %v4950_v56 }
 0x159   : > { %v4975_v48 = vadd.f32 %v4795_v40, %v4817_v58  ;;  %v588_v50 = vsub.s32 32, %v587_v34  ;;  %v592_v11 = vsub.s32 4294967266, %v587_v34  ;;  %v7674_v52 = vand.u32 2147483647, %v4933_v14 }
 0x15a   : > { %v4026_v37 = vadd.s32 4294967169, %v936_v39  ;;  %v675_v53 = vmul.u32 %v668_v8, %v659_v43  ;;  %vm677_vm3 = vc.u32 %v4963_v38, %v4946_v29  ;;  %v572_v51 = vadd.s32 %v4849_v59, %v4846_v57 }
 0x15b   : > { %v790_v54 = vsub.s32 0, %v4965_v46  ;;  %v679_v60 = vsel %vm677_vm3, %v678_v36, %v4947_v6  ;;  %v439_v58 = vshrl.u32 %v7681_v24, %v4971_v47  ;;  %v831_v0 = vand.u32 2139095040, %v4975_v48 }
 0x15c   : > { %v942_v19 = vadd.s32 1, %v4026_v37  ;;  %v680_v62 = vadd.s32 %v679_v60, %v675_v53  ;;  %v590_v23 = vshrl.u32 %v572_v51, %v588_v50  ;;  %v593_v8 = vadd.s32 127, %v592_v11 }
 0x15d   : > { %v939_v25 = vand.u32 8388607, %v7674_v52  ;;  %v4989_v28 = vshrl.u32 %v424_v63, 5  ;;  %v438_v57 = vshll.u32 %v7687_v20, %v4950_v56  ;;  %v589_v30 = vshll.u32 %v4884_v5, %v587_v34 }
 0x15e   : > { %vm943_vm4 = vcmp.gt.s32.totalorder %v942_v19, 0  ;;  %v681_v59 = vadd.s32 536870912, %v680_v62  ;;  %v4996_v31 = vshll.u32 %v7681_v24, %v4950_v56  ;;  %v5000_v18 = vshrl.u32 %v7679_v27, %v4971_v47 }
 0x15f   : > { %v944_v2 = vsel %vm943_vm4, %v942_v19, 0  ;;  %7739 = vst [vmem:[#allocation5_spill] sm:$0xff] %v4989_v28  ;;  %v4019_v21 = vmin.u32 %v790_v54, %v4965_v46  ;;  %v5003_v9 = vor.u32 %v439_v58, %v438_v57  ;;  %v832_v35 = vshrl.u32 %v831_v0, 23 }
 0x160   : > { %v946_v6 = vand.u32 31, %v944_v2  ;;  %v5005_v63 = vshrl.u32 %v681_v59, 30  ;;  %v5007_v39 = vor.u32 %v590_v23, %v589_v30  ;;  %v594_v43 = vshll.u32 %v593_v8, 23 }
 0x161   : > { %7740 = vst [vmem:[#allocation6_spill] sm:$0xff] %v5003_v9  ;;  %v940_v5 = vor.u32 8388608, %v939_v25  ;;  %v7677_v34 = vand.u32 2147483647, %v4975_v48  ;;  %v792_v53 = vclz %v4019_v21  ;;  %v945_v58 = vshrl.u32 %v944_v2, 5 }
 0x162   : > { %7741 = vst [vmem:[#allocation7_spill] sm:$0xff] %v5005_v63  ;;  %v947_v33 = vsub.s32 32, %v946_v6  ;;  %v683_v36 = vshll.u32 %v5005_v63, 30  ;;  %v949_v37 = vshll.u32 %v7693_v10, %v946_v6  ;;  %v952_v19 = vshll.u32 %v7683_v12, %v946_v6 }
 0x163   : > { %v955_v51 = vshll.u32 %v7685_v17, %v946_v6  ;;  %v4022_v23 = vadd.s32 4294967169, %v832_v35  ;;  %v958_v57 = vshll.u32 %v7687_v20, %v946_v6  ;;  %v5021_v30 = vor.u32 4788187, %v594_v43 }
 0x164   : > { %v950_v50 = vshrl.u32 %v7683_v12, %v947_v33  ;;  %v953_v11 = vshrl.u32 %v7685_v17, %v947_v33  ;;  %v956_v54 = vshrl.u32 %v7687_v20, %v947_v33  ;;  %v5017_v60 = vsub.s32 %v680_v62, %v683_v36 }
 0x165   : > { %v959_v59 = vshrl.u32 %v7681_v24, %v947_v33  ;;  %v961_v52 = vshll.u32 %v7681_v24, %v946_v6  ;;  %v962_v61 = vshrl.u32 %v7679_v27, %v947_v33  ;;  %v4020_v62 = vadd.s32 4294967294, %v792_v53 }
 0x166   : > { %v951_v0 = vor.u32 %v950_v50, %v949_v37  ;;  %v954_v8 = vor.u32 %v953_v11, %v952_v19  ;;  %v957_v25 = vor.u32 %v956_v54, %v955_v51  ;;  %v686_v21 = vsub.s32 0, %v5017_v60 }
 0x167   : > { %v960_v2 = vor.u32 %v959_v59, %v958_v57  ;;  %v980_v36 = vshll.u32 %v940_v5, 8  ;;  %v835_v35 = vand.u32 8388607, %v7677_v34  ;;  %v963_v37 = vor.u32 %v962_v61, %v961_v52 }
 0x168   : > { %vm964_vm5 = vcmp.lt.s32.totalorder %v945_v58, 1  ;;  %vm967_vm6 = vcmp.lt.s32.totalorder %v945_v58, 4  ;;  %v5032_v43 = vadd.f32 %v4821_v1, %v4795_v40  ;;  %v948_v50 = vshrl.u32 %v7693_v10, %v947_v33 }
 0x169   : > { %v969_v6 = vsel %vm967_vm6, %v957_v25, 2102212464  ;;  %v972_v11 = vsel %vm964_vm5, %v951_v0, %v954_v8  ;;  %v838_v19 = vadd.s32 1, %v4022_v23  ;;  %v4015_v51 = vmin.u32 %v686_v21, %v5017_v60 }
 0x16a   : > { %7742 = vst [vmem:[#allocation8_spill] sm:$0xff] %v5032_v43  ;;  %vm966_vm7 = vcmp.lt.s32.totalorder %v945_v58, 3  ;;  %v973_v53 = vsel %vm967_vm6, %v960_v2, 920167782  ;;  %v976_v5 = vsel %vm964_vm5, %v954_v8, %v957_v25  ;;  %vm4021_vm8 = vcmp.lt.s32.totalorder %v4020_v62, 0 }
 0x16b   : > { %vm965_vm9 = vcmp.lt.s32.totalorder %v945_v58, 2  ;;  %v974_v54 = vsel %vm966_vm7, %v957_v25, %v973_v53  ;;  %v977_v61 = vsel %vm967_vm6, %v963_v37, 1326507024  ;;  %v968_v52 = vsel %vm964_vm5, %v948_v50, %v951_v0 }
 0x16c   : > { %v970_v57 = vsel %vm966_vm7, %v954_v8, %v969_v6  ;;  %v975_v59 = vsel %vm965_vm9, %v972_v11, %v974_v54  ;;  %v978_v34 = vsel %vm966_vm7, %v960_v2, %v977_v61  ;;  %v836_v33 = vor.u32 8388608, %v835_v35 }
 0x16d   : > { %v979_v1 = vsel %vm965_vm9, %v976_v5, %v978_v34  ;;  %v5036_v45 = vmul.u32.u64.low %v980_v36, %v975_v59  ;;  %v5037_v27 = vmul.u32.u64.high %v980_v36, %v975_v59, %v5036_v45  ;;  %v688_v23 = vclz %v4015_v51  ;;  %v5076_v34 = vpop.f32.mrb[13].mxu0 }
 0x16e   : > { %v5040_v24 = vmul.u32.u64.low %v980_v36, %v979_v1  ;;  %v5041_v21 = vmul.u32.u64.high %v980_v36, %v979_v1, %v5040_v24  ;;  %vm839_vm10 = vcmp.gt.s32.totalorder %v838_v19, 0  ;;  %v5045_v25 = vsel %vm4021_vm8, 0, %v4020_v62 }
 0x16f   : > { %v971_v0 = vsel %vm965_vm9, %v968_v52, %v970_v57  ;;  %v840_v8 = vsel %vm839_vm10, %v838_v19, 0  ;;  %v780_v37 = vadd.s32 %v4893_v16, %v4888_v13  ;;  %v1143_v35 = vand.u32 2139095040, %v5032_v43 }
 0x170   : > { %v990_v50 = vadd.s32 1, %v5037_v27  ;;  %v842_v24 = vand.u32 31, %v840_v8  ;;  %v5053_v6 = vshll.u32 %v836_v33, 8  ;;  %v796_v62 = vsub.s32 32, %v5045_v25 }
 0x171   : > { %v4016_v51 = vadd.s32 4294967294, %v688_v23  ;;  %v987_v19 = vmul.u32 %v980_v36, %v971_v0  ;;  %vm989_vm11 = vc.u32 %v5041_v21, %v5036_v45  ;;  %v797_v53 = vshll.u32 %v4965_v46, %v5045_v25 }
 0x172   : > { %v800_v13 = vsub.s32 4294967266, %v5045_v25  ;;  %v991_v16 = vsel %vm989_vm11, %v990_v50, %v5037_v27  ;;  %v843_v5 = vsub.s32 32, %v842_v24  ;;  %v845_v61 = vshll.u32 %v7693_v10, %v842_v24 }
 0x173   : > { %v992_v54 = vadd.s32 %v991_v16, %v987_v19  ;;  %v848_v52 = vshll.u32 %v7683_v12, %v842_v24  ;;  %v1144_v57 = vshrl.u32 %v1143_v35, 23  ;;  %v851_v1 = vshll.u32 %v7685_v17, %v842_v24 }
 0x174   : > { %v846_v59 = vshrl.u32 %v7683_v12, %v843_v5  ;;  %v849_v36 = vshrl.u32 %v7685_v17, %v843_v5  ;;  %v852_v33 = vshrl.u32 %v7687_v20, %v843_v5  ;;  %vm4017_vm12 = vcmp.lt.s32.totalorder %v4016_v51, 0 }
 0x175   : > { %v993_v46 = vadd.s32 536870912, %v992_v54  ;;  %v841_v23 = vshrl.u32 %v840_v8, 5  ;;  %v854_v27 = vshll.u32 %v7687_v20, %v842_v24  ;;  %v7743_v19 = vmov 920167782  }
 0x176   : > { %v847_v25 = vor.u32 %v846_v59, %v845_v61  ;;  %v850_v0 = vor.u32 %v849_v36, %v848_v52  ;;  %v853_v50 = vor.u32 %v852_v33, %v851_v1  ;;  %v855_v16 = vshrl.u32 %v7743_v19, %v843_v5 }
 0x177   : > { %vm447_vm13 = vcmp.lt.s32.totalorder %v4989_v28, 4  ;;  %v798_v35 = vshrl.u32 %v780_v37, %v796_v62  ;;  %v5072_v12 = vshrl.u32 %v993_v46, 30  ;;  %v857_v58 = vshll.u32 %v7743_v19, %v842_v24 }
 0x178   : > { %v7745_v17 = vmov 1326507024   ;;  %v801_v2 = vadd.s32 127, %v800_v13  ;;  %v5078_v8 = vsel %vm4017_vm12, 0, %v4016_v51  ;;  %v856_v20 = vor.u32 %v855_v16, %v854_v27 }
 0x179   : > { %7744 = vst [vmem:[#allocation9_spill] sm:$0xff] %v5072_v12  ;;  %v858_v11 = vshrl.u32 %v7745_v17, %v843_v5  ;;  %v4034_v61 = vadd.s32 4294967169, %v1144_v57  ;;  %v995_v52 = vshll.u32 %v5072_v12, 30  ;;  %vm860_vm14 = vcmp.lt.s32.totalorder %v841_v23, 1 }
 0x17a   : > { %vm863_vm15 = vcmp.lt.s32.totalorder %v841_v23, 4  ;;  %vm862_vm0 = vcmp.lt.s32.totalorder %v841_v23, 3  ;;  %v868_v62 = vsel %vm860_vm14, %v847_v25, %v850_v0  ;;  %v844_v24 = vshrl.u32 %v7693_v10, %v843_v5 }
 0x17b   : > { %v859_v59 = vor.u32 %v858_v11, %v857_v58  ;;  %v865_v37 = vsel %vm863_vm15, %v853_v50, 2102212464  ;;  %v869_v36 = vsel %vm863_vm15, %v856_v20, 920167782  ;;  %v5081_v1 = vsub.s32 %v992_v54, %v995_v52 }
 0x17c   : > { %vm861_vm1 = vcmp.lt.s32.totalorder %v841_v23, 2  ;;  %v870_v33 = vsel %vm862_vm0, %v853_v50, %v869_v36  ;;  %v802_v13 = vshll.u32 %v801_v2, 23  ;;  %v872_v46 = vsel %vm860_vm14, %v850_v0, %v853_v50 }
 0x17d   : > { %v871_v51 = vsel %vm861_vm1, %v868_v62, %v870_v33  ;;  %v873_v57 = vsel %vm863_vm15, %v859_v59, 1326507024  ;;  %v998_v27 = vsub.s32 0, %v5081_v1  ;;  %v864_v58 = vsel %vm860_vm14, %v844_v24, %v847_v25 }
 0x17e   : > { %v866_v11 = vsel %vm862_vm0, %v850_v0, %v865_v37  ;;  %v874_v16 = vsel %vm862_vm0, %v856_v20, %v873_v57  ;;  %v696_v12 = vsub.s32 4294967266, %v5078_v8  ;;  %v1150_v59 = vadd.s32 1, %v4034_v61 }
 0x17f   : > { %v875_v4 = vsel %vm861_vm1, %v872_v46, %v874_v16  ;;  %v5089_v54 = vmul.u32.u64.low %v5053_v6, %v871_v51  ;;  %v5090_v52 = vmul.u32.u64.high %v5053_v6, %v871_v51, %v5089_v54  ;;  %v4027_v2 = vmin.u32 %v998_v27, %v5081_v1 }
 0x180   : > { %v5095_v5 = vmul.u32.u64.low %v5053_v6, %v875_v4  ;;  %v5096_v50 = vmul.u32.u64.high %v5053_v6, %v875_v4, %v5095_v5  ;;  %v7746_v25 = vand.u32 2147483647, %v5021_v30  ;;  %v7747_v20 = vcvt.s32.f32 %v5007_v39 }
 0x181   : > { %v5107_v37 = vsel %vm447_vm13, %v5003_v9, 920167782  ;;  %v5109_v62 = vor.u32 %v798_v35, %v797_v53  ;;  %v867_v36 = vsel %vm861_vm1, %v864_v58, %v866_v11  ;;  %v5112_v24 = vor.u32 4788187, %v802_v13 }
 0x182   : > { %v5102_v0 = vmul.f32 %v7747_v20, %v7746_v25  ;;  %7748 = vst [vmem:[#allocation10_spill] sm:$0xff] %v5107_v37  ;;  %v1000_v4 = vclz %v4027_v2  ;;  %v7749_v61 = vand.u32 2147483647, %v5032_v43  ;;  %vm1151_vm2 = vcmp.gt.s32.totalorder %v1150_v59, 0 }
 0x183   : > { %v692_v39 = vsub.s32 32, %v5078_v8  ;;  %v5117_v30 = vadd.s32 127, %v696_v12  ;;  %v886_v51 = vadd.s32 1, %v5090_v52  ;;  %v1152_v46 = vsel %vm1151_vm2, %v1150_v59, 0 }
 0x184   : > { %v1147_v33 = vand.u32 8388607, %v7749_v61  ;;  %v7750_v53 = vor.u32 %v5000_v18, %v4996_v31  ;;  %v4028_v35 = vadd.s32 4294967294, %v1000_v4  ;;  %v883_v13 = vmul.u32 %v5053_v6, %v867_v36 }
 0x185   : > { %vm885_vm3 = vc.u32 %v5096_v50, %v5089_v54  ;;  %v676_v12 = vadd.s32 %v4946_v29, %v4963_v38  ;;  %v1154_v58 = vand.u32 31, %v1152_v46  ;;  %v804_v16 = vand.u32 2147483647, %v5112_v24 }
 0x186   : > { %v5125_v23 = vsel %vm447_vm13, %v7750_v53, 1326507024  ;;  %v887_v27 = vsel %vm885_vm3, %v886_v51, %v5090_v52  ;;  %vm4029_vm4 = vcmp.lt.s32.totalorder %v4028_v35, 0  ;;  %v1148_v11 = vor.u32 8388608, %v1147_v33 }
 0x187   : > { %7751 = vst [vmem:[#allocation11_spill] sm:$0xff] %v5125_v23  ;;  %v888_v18 = vadd.s32 %v887_v27, %v883_v13  ;;  %v5136_v2 = vshrl.u32 %v676_v12, %v692_v39  ;;  %v698_v6 = vshll.u32 %v5117_v30, 23  ;;  %v1155_v5 = vsub.s32 32, %v1154_v58 }
 0x188   : > { %v5139_v59 = vsel %vm4029_vm4, 0, %v4028_v35  ;;  %v1153_v20 = vshrl.u32 %v1152_v46, 5  ;;  %v5143_v29 = vadd.f32 %v4795_v40, %v4823_v3  ;;  %v1157_v38 = vshll.u32 %v7693_v10, %v1154_v58 }
 0x189   : > { %v889_v25 = vadd.s32 536870912, %v888_v18  ;;  %v7752_v52 = vmov 2475754826   ;;  %v7753_v24 = vmov 2131351028   ;;  %v5153_v53 = vshll.u32 %v1148_v11, 8 }
 0x18a   : > { %v1158_v36 = vshrl.u32 %v7752_v52, %v1155_v5  ;;  %v1160_v4 = vshll.u32 %v7752_v52, %v1154_v58  ;;  %v1161_v61 = vshrl.u32 %v7753_v24, %v1155_v5  ;;  %v1163_v39 = vshll.u32 %v7753_v24, %v1154_v58 }
 0x18b   : > { %v5149_v33 = vshrl.u32 %v889_v25, 30  ;;  %v7755_v30 = vmov 2102212464   ;;  %v1167_v13 = vshrl.u32 %v7743_v19, %v1155_v5  ;;  %v1008_v12 = vsub.s32 4294967266, %v5139_v59 }
 0x18c   : > { %v1164_v51 = vshrl.u32 %v7755_v30, %v1155_v5  ;;  %v1159_v46 = vor.u32 %v1158_v36, %v1157_v38  ;;  %v1162_v35 = vor.u32 %v1161_v61, %v1160_v4  ;;  %v1166_v3 = vshll.u32 %v7755_v30, %v1154_v58  ;;  %v5165_v36 = vpop.f32.mrb[14].mxu0 }
 0x18d   : > { %7754 = vst [vmem:[#allocation12_spill] sm:$0xff] %v5149_v33  ;;  %v891_v27 = vshll.u32 %v5149_v33, 30  ;;  %v1039_v25 = vand.u32 2139095040, %v5143_v29  ;;  %v1169_v10 = vshll.u32 %v7743_v19, %v1154_v58  ;;  %v1170_v63 = vshrl.u32 %v7745_v17, %v1155_v5 }
 0x18e   : > { %v1165_v57 = vor.u32 %v1164_v51, %v1163_v39  ;;  %v1168_v31 = vor.u32 %v1167_v13, %v1166_v3  ;;  %vm1172_vm5 = vcmp.lt.s32.totalorder %v1153_v20, 1  ;;  %v1004_v11 = vsub.s32 32, %v5139_v59 }
 0x18f   : > { %v5163_v38 = vsub.s32 %v888_v18, %v891_v27  ;;  %vm1173_vm6 = vcmp.lt.s32.totalorder %v1153_v20, 2  ;;  %vm1175_vm7 = vcmp.lt.s32.totalorder %v1153_v20, 4  ;;  %v7756_v4 = vmov 683565275  }
 0x190   : > { %v1156_v61 = vshrl.u32 %v7756_v4, %v1155_v5  ;;  %v1171_v33 = vor.u32 %v1170_v63, %v1169_v10  ;;  %v1177_v39 = vsel %vm1175_vm7, %v1165_v57, 2102212464  ;;  %v1180_v51 = vsel %vm1172_vm5, %v1159_v46, %v1162_v35 }
 0x191   : > { %vm518_vm8 = vcmp.lt.s32.totalorder %v4798_v42, 0  ;;  %v1009_v58 = vadd.s32 127, %v1008_v12  ;;  %v894_v3 = vsub.s32 0, %v5163_v38  ;;  %vm1174_vm9 = vcmp.lt.s32.totalorder %v1153_v20, 3 }
 0x192   : > { %v1181_v13 = vsel %vm1175_vm7, %v1168_v31, 920167782  ;;  %v1176_v18 = vsel %vm1172_vm5, %v1156_v61, %v1159_v46  ;;  %v1184_v41 = vsel %vm1172_vm5, %v1162_v35, %v1165_v57  ;;  %v1185_v9 = vsel %vm1175_vm7, %v1171_v33, 1326507024 }
 0x193   : > { %v1182_v27 = vsel %vm1174_vm9, %v1165_v57, %v1181_v13  ;;  %v4023_v23 = vmin.u32 %v894_v3, %v5163_v38  ;;  %v1178_v5 = vsel %vm1174_vm9, %v1162_v35, %v1177_v39  ;;  %v1186_v63 = vsel %vm1174_vm9, %v1168_v31, %v1185_v9 }
 0x194   : > { %v1183_v10 = vsel %vm1173_vm6, %v1180_v51, %v1182_v27  ;;  %v1187_v37 = vsel %vm1173_vm6, %v1184_v41, %v1186_v63  ;;  %v5183_v46 = vadd.f32 %v4831_v15, %v4795_v40  ;;  %v988_v57 = vadd.s32 %v5036_v45, %v5041_v21 }
 0x195   : > { %v5177_v12 = vmul.u32.u64.low %v5153_v53, %v1183_v10  ;;  %v5178_v28 = vmul.u32.u64.high %v5153_v53, %v1183_v10, %v5177_v12  ;;  %v896_v33 = vclz %v4023_v23  ;;  %v693_v41 = vshll.u32 %v5017_v60, %v5078_v8 }
 0x196   : > { %7757 = vst [vmem:[#allocation13_spill] sm:$0xff] %v5183_v46  ;;  %v5188_v35 = vmul.u32.u64.low %v5153_v53, %v1187_v37  ;;  %v5189_v61 = vmul.u32.u64.high %v5153_v53, %v1187_v37, %v5188_v35  ;;  %v699_v9 = vor.u32 4788187, %v698_v6  ;;  %v1179_v31 = vsel %vm1173_vm6, %v1176_v18, %v1178_v5 }
 0x197   : > { %v1040_v39 = vshrl.u32 %v1039_v25, 23  ;;  %v7758_v51 = vcvt.s32.f32 %v5109_v62  ;;  %v1006_v15 = vshrl.u32 %v988_v57, %v1004_v11  ;;  %v1010_v13 = vshll.u32 %v1009_v58, 23 }
 0x198   : > { %v7705_v45 = vand.u32 2147483647, %v5143_v29  ;;  %v695_v21 = vor.u32 %v5136_v2, %v693_v41  ;;  %v1198_v37 = vadd.s32 1, %v5178_v28  ;;  %v1351_v27 = vand.u32 2139095040, %v5183_v46 }
 0x199   : > { %v5196_v3 = vmul.f32 %v7758_v51, %v804_v16  ;;  %v4030_v23 = vadd.s32 4294967169, %v1040_v39  ;;  %v1005_v60 = vshll.u32 %v5081_v1, %v5139_v59  ;;  %v4024_v8 = vadd.s32 4294967294, %v896_v33 }
 0x19a   : > { %v1195_v6 = vmul.u32 %v5153_v53, %v1179_v31  ;;  %vm1197_vm10 = vc.u32 %v5189_v61, %v5177_v12  ;;  %v7759_v62 = vxor.u32 2147483648, %v5102_v0  ;;  %v700_v2 = vand.u32 2147483647, %v699_v9 }
 0x19b   : > { %v1199_v20 = vsel %vm1197_vm10, %v1198_v37, %v5178_v28  ;;  %v1046_v25 = vadd.s32 1, %v4030_v23  ;;  %v5215_v11 = vor.u32 %v1006_v15, %v1005_v60  ;;  %v5217_v1 = vor.u32 4788187, %v1010_v13  ;;  %v5242_v37 = vpop.f32.mrb[15].mxu0 }
 0x19c   : > { %v5212_v16 = vsel %vm518_vm8, %v7759_v62, %v5102_v0  ;;  %v1200_v59 = vadd.s32 %v1199_v20, %v1195_v6  ;;  %v1043_v53 = vand.u32 8388607, %v7705_v45  ;;  %v702_v58 = vcvt.s32.f32 %v695_v21 }
 0x19d   : > { %7760 = vst [vmem:[#allocation14_spill] sm:$0xff] %v5212_v16  ;;  %vm1047_vm11 = vcmp.gt.s32.totalorder %v1046_v25, 0  ;;  %v7704_v18 = vand.u32 2147483647, %v5183_v46  ;;  %v1352_v5 = vshrl.u32 %v1351_v27, 23  ;;  %vm4025_vm12 = vcmp.lt.s32.totalorder %v4024_v8, 0 }
 0x19e   : > { %v1201_v10 = vadd.s32 536870912, %v1200_v59  ;;  %v1048_v63 = vsel %vm1047_vm11, %v1046_v25, 0  ;;  %v5223_v28 = vmul.f32 %v702_v58, %v700_v2  ;;  %v884_v57 = vadd.s32 %v5089_v54, %v5096_v50 }
 0x19f   : > { %v1050_v33 = vand.u32 31, %v1048_v63  ;;  %v5229_v35 = vadd.f32 %v4795_v40, %v4837_v22  ;;  %v1044_v39 = vor.u32 8388608, %v1043_v53  ;;  %v5235_v51 = vsel %vm4025_vm12, 0, %v4024_v8 }
 0x1a0   : > { %v5233_v31 = vshrl.u32 %v1201_v10, 30  ;;  %v4042_v13 = vadd.s32 4294967169, %v1352_v5  ;;  %v1355_v21 = vand.u32 8388607, %v7704_v18  ;;  %v1049_v50 = vshrl.u32 %v1048_v63, 5 }
 0x1a1   : > { %v1051_v15 = vsub.s32 32, %v1050_v33  ;;  %v1053_v40 = vshll.u32 %v7756_v4, %v1050_v33  ;;  %v1056_v22 = vshll.u32 %v7752_v52, %v1050_v33  ;;  %v1059_v60 = vshll.u32 %v7753_v24, %v1050_v33 }
 0x1a2   : > { %7761 = vst [vmem:[#allocation15_spill] sm:$0xff] %v5233_v31  ;;  %v1203_v54 = vshll.u32 %v5233_v31, 30  ;;  %v1062_v62 = vshll.u32 %v7755_v30, %v1050_v33  ;;  %v1065_v20 = vshll.u32 %v7743_v19, %v1050_v33  ;;  %vm726_vm14 = vcmp.lt.s32.totalorder %v4806_v49, 0 }
 0x1a3   : > { %v1054_v23 = vshrl.u32 %v7752_v52, %v1051_v15  ;;  %v1057_v27 = vshrl.u32 %v7753_v24, %v1051_v15  ;;  %v1060_v8 = vshrl.u32 %v7755_v30, %v1051_v15  ;;  %v1063_v2 = vshrl.u32 %v7743_v19, %v1051_v15 }
 0x1a4   : > { %v5248_v6 = vsub.s32 %v1200_v59, %v1203_v54  ;;  %v1066_v5 = vshrl.u32 %v7745_v17, %v1051_v15  ;;  %v1084_v18 = vshll.u32 %v1044_v39, 8  ;;  %v1356_v45 = vor.u32 8388608, %v1355_v21 }
 0x1a5   : > { %v1055_v25 = vor.u32 %v1054_v23, %v1053_v40  ;;  %v1058_v53 = vor.u32 %v1057_v27, %v1056_v22  ;;  %v1061_v58 = vor.u32 %v1060_v8, %v1059_v60  ;;  %v1064_v63 = vor.u32 %v1063_v2, %v1062_v62 }
 0x1a6   : > { %v1206_v10 = vsub.s32 0, %v5248_v6  ;;  %v900_v59 = vsub.s32 32, %v5235_v51  ;;  %v1067_v54 = vor.u32 %v1066_v5, %v1065_v20  ;;  %vm1071_vm15 = vcmp.lt.s32.totalorder %v1049_v50, 4 }
 0x1a7   : > { %v1358_v9 = vadd.s32 1, %v4042_v13  ;;  %v904_v41 = vsub.s32 4294967266, %v5235_v51  ;;  %v1052_v33 = vshrl.u32 %v7756_v4, %v1051_v15  ;;  %vm1068_vm0 = vcmp.lt.s32.totalorder %v1049_v50, 1 }
 0x1a8   : > { %v1073_v40 = vsel %vm1071_vm15, %v1061_v58, 2102212464  ;;  %vm1069_vm1 = vcmp.lt.s32.totalorder %v1049_v50, 2  ;;  %vm1070_vm2 = vcmp.lt.s32.totalorder %v1049_v50, 3  ;;  %v1076_v22 = vsel %vm1068_vm0, %v1055_v25, %v1058_v53 }
 0x1a9   : > { %v1077_v23 = vsel %vm1071_vm15, %v1064_v63, 920167782  ;;  %v4035_v39 = vmin.u32 %v1206_v10, %v5248_v6  ;;  %v1072_v21 = vsel %vm1068_vm0, %v1052_v33, %v1055_v25  ;;  %v1080_v60 = vsel %vm1068_vm0, %v1058_v53, %v1061_v58 }
 0x1aa   : > { %v1078_v27 = vsel %vm1070_vm2, %v1061_v58, %v1077_v23  ;;  %v1074_v8 = vsel %vm1070_vm2, %v1058_v53, %v1073_v40  ;;  %v1081_v62 = vsel %vm1071_vm15, %v1067_v54, 1326507024  ;;  %vm1359_vm3 = vcmp.gt.s32.totalorder %v1358_v9, 0 }
 0x1ab   : > { %v1079_v13 = vsel %vm1069_vm1, %v1076_v22, %v1078_v27  ;;  %v902_v15 = vshrl.u32 %v884_v57, %v900_v59  ;;  %v1082_v2 = vsel %vm1070_vm2, %v1064_v63, %v1081_v62  ;;  %v905_v0 = vadd.s32 127, %v904_v41 }
 0x1ac   : > { %v5264_v20 = vmul.u32.u64.low %v1084_v18, %v1079_v13  ;;  %v5265_v5 = vmul.u32.u64.high %v1084_v18, %v1079_v13, %v5264_v20  ;;  %v1083_v31 = vsel %vm1069_vm1, %v1080_v60, %v1082_v2  ;;  %v1360_v16 = vsel %vm1359_vm3, %v1358_v9, 0 }
 0x1ad   : > { %v1247_v25 = vand.u32 2139095040, %v5229_v35  ;;  %v1208_v10 = vclz %v4035_v39  ;;  %v1075_v53 = vsel %vm1069_vm1, %v1072_v21, %v1074_v8  ;;  %v7762_v57 = vxor.u32 2147483648, %v5196_v3 }
 0x1ae   : > { %v5271_v58 = vmul.u32.u64.low %v1084_v18, %v1083_v31  ;;  %v5272_v33 = vmul.u32.u64.high %v1084_v18, %v1083_v31, %v5271_v58  ;;  %v704_v41 = vxor.u32 2147483648, %v5223_v28  ;;  %v901_v9 = vshll.u32 %v5163_v38, %v5235_v51 }
 0x1af   : > { %v5279_v63 = vsel %vm726_vm14, %v7762_v57, %v5196_v3  ;;  %v1362_v59 = vand.u32 31, %v1360_v16  ;;  %v7764_v54 = vand.u32 2147483647, %v5217_v1  ;;  %v7765_v50 = vcvt.s32.f32 %v5215_v11 }
 0x1b0   : > { %7763 = vst [vmem:[#allocation16_spill] sm:$0xff] %v5279_v63  ;;  %v1094_v31 = vadd.s32 1, %v5265_v5  ;;  %v5291_v22 = vshll.u32 %v1356_v45, 8  ;;  %v7708_v23 = vand.u32 2147483647, %v5229_v35  ;;  %v903_v3 = vor.u32 %v902_v15, %v901_v9 }
 0x1b1   : > { %v5288_v40 = vmul.f32 %v7765_v50, %v7764_v54  ;;  %v906_v39 = vshll.u32 %v905_v0, 23  ;;  %v1091_v21 = vmul.u32 %v1084_v18, %v1075_v53  ;;  %v1363_v27 = vsub.s32 32, %v1362_v59 }
 0x1b2   : > { %v4036_v60 = vadd.s32 4294967294, %v1208_v10  ;;  %vm1093_vm4 = vc.u32 %v5272_v33, %v5264_v20  ;;  %v1365_v38 = vshll.u32 %v7756_v4, %v1362_v59  ;;  %v1248_v1 = vshrl.u32 %v1247_v25, 23 }
 0x1b3   : > { %v1095_v11 = vsel %vm1093_vm4, %v1094_v31, %v5265_v5  ;;  %v1366_v51 = vshrl.u32 %v7752_v52, %v1363_v27  ;;  %v1368_v45 = vshll.u32 %v7752_v52, %v1362_v59  ;;  %v1369_v8 = vshrl.u32 %v7753_v24, %v1363_v27 }
 0x1b4   : > { %v1096_v13 = vadd.s32 %v1095_v11, %v1091_v21  ;;  %v1361_v62 = vshrl.u32 %v1360_v16, 5  ;;  %v1371_v18 = vshll.u32 %v7753_v24, %v1362_v59  ;;  %v1372_v0 = vshrl.u32 %v7755_v30, %v1363_v27 }
 0x1b5   : > { %v1367_v15 = vor.u32 %v1366_v51, %v1365_v38  ;;  %v1370_v2 = vor.u32 %v1369_v8, %v1368_v45  ;;  %v1374_v10 = vshll.u32 %v7755_v30, %v1362_v59  ;;  %v1375_v25 = vshrl.u32 %v7743_v19, %v1363_v27 }
 0x1b6   : > { %vm622_vm5 = vcmp.lt.s32.totalorder %v4813_v55, 0  ;;  %v907_v5 = vor.u32 4788187, %v906_v39  ;;  %v1097_v53 = vadd.s32 536870912, %v1096_v13  ;;  %v1373_v58 = vor.u32 %v1372_v0, %v1371_v18 }
 0x1b7   : > { %v1251_v57 = vand.u32 8388607, %v7708_v23  ;;  %v910_v9 = vcvt.s32.f32 %v903_v3  ;;  %v1376_v16 = vor.u32 %v1375_v25, %v1374_v10  ;;  %v1377_v54 = vshll.u32 %v7743_v19, %v1362_v59 }
 0x1b8   : > { %v1378_v50 = vshrl.u32 %v7745_v17, %v1363_v27  ;;  %vm4037_vm6 = vcmp.lt.s32.totalorder %v4036_v60, 0  ;;  %v5310_v31 = vshrl.u32 %v1097_v53, 30  ;;  %vm1380_vm7 = vcmp.lt.s32.totalorder %v1361_v62, 1 }
 0x1b9   : > { %v4038_v21 = vadd.s32 4294967169, %v1248_v1  ;;  %v1364_v38 = vshrl.u32 %v7756_v4, %v1363_v27  ;;  %vm1383_vm9 = vcmp.lt.s32.totalorder %v1361_v62, 4  ;;  %v1388_v39 = vsel %vm1380_vm7, %v1367_v15, %v1370_v2 }
 0x1ba   : > { %7766 = vst [vmem:[#allocation17_spill] sm:$0xff] %v5310_v31  ;;  %v1379_v11 = vor.u32 %v1378_v50, %v1377_v54  ;;  %vm934_vm10 = vcmp.lt.s32.totalorder %v4933_v14, 0  ;;  %v1099_v3 = vshll.u32 %v5310_v31, 30  ;;  %vm1382_vm11 = vcmp.lt.s32.totalorder %v1361_v62, 3 }
 0x1bb   : > { %v1385_v51 = vsel %vm1383_vm9, %v1373_v58, 2102212464  ;;  %v1389_v59 = vsel %vm1383_vm9, %v1376_v16, 920167782  ;;  %vm1381_vm12 = vcmp.lt.s32.totalorder %v1361_v62, 2  ;;  %v1392_v8 = vsel %vm1380_vm7, %v1370_v2, %v1373_v58 }
 0x1bc   : > { %v1390_v45 = vsel %vm1382_vm11, %v1373_v58, %v1389_v59  ;;  %v1393_v18 = vsel %vm1383_vm9, %v1379_v11, 1326507024  ;;  %v908_v0 = vand.u32 2147483647, %v907_v5  ;;  %v5317_v1 = vsub.s32 %v1096_v13, %v1099_v3 }
 0x1bd   : > { %v1384_v27 = vsel %vm1380_vm7, %v1364_v38, %v1367_v15  ;;  %v1391_v10 = vsel %vm1381_vm12, %v1388_v39, %v1390_v45  ;;  %v1386_v25 = vsel %vm1382_vm11, %v1370_v2, %v1385_v51  ;;  %v1394_v53 = vsel %vm1382_vm11, %v1376_v16, %v1393_v18  ;;  %v5352_v45 = vld [vmem:[%s7670_s2] ss:$0 sm:$0xff] }
 0x1be   : > { %v5322_v54 = vmul.u32.u64.low %v5291_v22, %v1391_v10  ;;  %v5323_v50 = vmul.u32.u64.high %v5291_v22, %v1391_v10, %v5322_v54  ;;  %v5327_v23 = vsel %vm4037_vm6, 0, %v4036_v60  ;;  %v1102_v58 = vsub.s32 0, %v5317_v1 }
 0x1bf   : > { %v1395_v5 = vsel %vm1381_vm12, %v1392_v8, %v1394_v53  ;;  %v1254_v13 = vadd.s32 1, %v4038_v21  ;;  %v5336_v15 = vsel %vm622_vm5, %v704_v41, %v5223_v28  ;;  %v1016_v2 = vxor.u32 2147483648, %v5288_v40 }
 0x1c0   : > { %v5340_v16 = vmul.u32.u64.low %v5291_v22, %v1395_v5  ;;  %v5341_v38 = vmul.u32.u64.high %v5291_v22, %v1395_v5, %v5340_v16  ;;  %v5343_v60 = vmul.f32 %v910_v9, %v908_v0  ;;  %v4031_v11 = vmin.u32 %v1102_v58, %v5317_v1 }
 0x1c1   : > { %v1387_v39 = vsel %vm1381_vm12, %v1384_v27, %v1386_v25  ;;  %vm1255_vm15 = vcmp.gt.s32.totalorder %v1254_v13, 0  ;;  %v1216_v21 = vsub.s32 4294967266, %v5327_v23  ;;  %v1406_v3 = vadd.s32 1, %v5323_v50 }
 0x1c2   : > { %v1252_v51 = vor.u32 8388608, %v1251_v57  ;;  %v1256_v28 = vsel %vm1255_vm15, %v1254_v13, 0  ;;  %v1104_v41 = vclz %v4031_v11  ;;  %v5356_v9 = vadd.f32 %v5352_v45, %v4873_v32 }
 0x1c3   : > { %v1258_v59 = vand.u32 31, %v1256_v28  ;;  %v5360_v62 = vadd.f32 %v5352_v45, %v4941_v26  ;;  %v5365_v57 = vsel %vm934_vm10, %v1016_v2, %v5288_v40  ;;  %v1196_v8 = vadd.s32 %v5177_v12, %v5189_v61 }
 0x1c4   : > { %7767 = vst [vmem:[#allocation18_spill] sm:$0xff] %v5365_v57  ;;  %v1403_v18 = vmul.u32 %v5291_v22, %v1387_v39  ;;  %vm1405_vm0 = vc.u32 %v5341_v38, %v5322_v54  ;;  %v4032_v0 = vadd.s32 4294967294, %v1104_v41  ;;  %v1212_v10 = vsub.s32 32, %v5327_v23 }
 0x1c5   : > { %v1407_v27 = vsel %vm1405_vm0, %v1406_v3, %v5323_v50  ;;  %v1259_v26 = vsub.s32 32, %v1258_v59  ;;  %v5375_v25 = vadd.s32 127, %v1216_v21  ;;  %v5377_v53 = vshll.u32 %v1252_v51, 8 }
 0x1c6   : > { %v1408_v40 = vadd.s32 %v1407_v27, %v1403_v18  ;;  %v1261_v12 = vshll.u32 %v7756_v4, %v1258_v59  ;;  %v1264_v22 = vshll.u32 %v7752_v52, %v1258_v59  ;;  %v1267_v13 = vshll.u32 %v7753_v24, %v1258_v59 }
 0x1c7   : > { %v1262_v61 = vshrl.u32 %v7752_v52, %v1259_v26  ;;  %v1265_v58 = vshrl.u32 %v7753_v24, %v1259_v26  ;;  %v1268_v50 = vshrl.u32 %v7755_v30, %v1259_v26  ;;  %v1271_v2 = vshrl.u32 %v7743_v19, %v1259_v26 }
 0x1c8   : > { %v1409_v5 = vadd.s32 536870912, %v1408_v40  ;;  %vm4033_vm1 = vcmp.lt.s32.totalorder %v4032_v0, 0  ;;  %v1257_v16 = vshrl.u32 %v1256_v28, 5  ;;  %v1270_v11 = vshll.u32 %v7755_v30, %v1258_v59 }
 0x1c9   : > { %v1559_v39 = vand.u32 2139095040, %v5356_v9  ;;  %v1263_v3 = vor.u32 %v1262_v61, %v1261_v12  ;;  %v1266_v51 = vor.u32 %v1265_v58, %v1264_v22  ;;  %v1269_v41 = vor.u32 %v1268_v50, %v1267_v13 }
 0x1ca   : > { %v5388_v21 = vshrl.u32 %v1409_v5, 30  ;;  %v1213_v18 = vshll.u32 %v5248_v6, %v5327_v23  ;;  %v1272_v27 = vor.u32 %v1271_v2, %v1270_v11  ;;  %v1273_v32 = vshll.u32 %v7743_v19, %v1258_v59  ;;  %v2076_v11 = vld [vmem:[%s7671_s3] sm:$0xff] }
 0x1cb   : > { %v1274_v31 = vshrl.u32 %v7745_v17, %v1259_v26  ;;  %v1214_v57 = vshrl.u32 %v1196_v8, %v1212_v10  ;;  %v1218_v28 = vshll.u32 %v5375_v25, 23  ;;  %v5395_v14 = vsel %vm4033_vm1, 0, %v4032_v0 }
 0x1cc   : > { %7768 = vst [vmem:[#allocation19_spill] sm:$0xff] %v5388_v21  ;;  %v1411_v63 = vshll.u32 %v5388_v21, 30  ;;  %vm1276_vm2 = vcmp.lt.s32.totalorder %v1257_v16, 1  ;;  %vm1279_vm3 = vcmp.lt.s32.totalorder %v1257_v16, 4  ;;  %v7713_v12 = vand.u32 2147483647, %v5356_v9 }
 0x1cd   : > { %v1275_v5 = vor.u32 %v1274_v31, %v1273_v32  ;;  %v1281_v6 = vsel %vm1279_vm3, %v1269_v41, 2102212464  ;;  %v1284_v23 = vsel %vm1276_vm2, %v1263_v3, %v1266_v51  ;;  %v1560_v59 = vshrl.u32 %v1559_v39, 23  ;;  %v2077_v39 = vld [vmem:[%s7671_s3 + $0x8] sm:$0xff] }
 0x1ce   : > { %v5399_v61 = vsub.s32 %v1408_v40, %v1411_v63  ;;  %v1112_v22 = vsub.s32 4294967266, %v5395_v14  ;;  %v1260_v8 = vshrl.u32 %v7756_v4, %v1259_v26  ;;  %vm1278_vm4 = vcmp.lt.s32.totalorder %v1257_v16, 3 }
 0x1cf   : > { %v1285_v0 = vsel %vm1279_vm3, %v1272_v27, 920167782  ;;  %vm1277_vm6 = vcmp.lt.s32.totalorder %v1257_v16, 2  ;;  %v1288_v32 = vsel %vm1276_vm2, %v1266_v51, %v1269_v41  ;;  %v1282_v58 = vsel %vm1278_vm4, %v1266_v51, %v1281_v6 }
 0x1d0   : > { %v1414_v10 = vsub.s32 0, %v5399_v61  ;;  %v1286_v31 = vsel %vm1278_vm4, %v1269_v41, %v1285_v0  ;;  %v1280_v25 = vsel %vm1276_vm2, %v1260_v8, %v1263_v3  ;;  %v1289_v40 = vsel %vm1279_vm3, %v1275_v5, 1326507024 }
 0x1d1   : > { %v1287_v63 = vsel %vm1277_vm6, %v1284_v23, %v1286_v31  ;;  %v1290_v50 = vsel %vm1278_vm4, %v1272_v27, %v1289_v40  ;;  %v1108_v3 = vsub.s32 32, %v5395_v14  ;;  %v1113_v51 = vadd.s32 127, %v1112_v22 }
 0x1d2   : > { %v4043_v13 = vmin.u32 %v1414_v10, %v5399_v61  ;;  %v5410_v2 = vmul.u32.u64.low %v5377_v53, %v1287_v63  ;;  %v5411_v26 = vmul.u32.u64.high %v5377_v53, %v1287_v63, %v5410_v2  ;;  %v1291_v41 = vsel %vm1277_vm6, %v1288_v32, %v1290_v50 }
 0x1d3   : > { %v4050_v5 = vadd.s32 4294967169, %v1560_v59  ;;  %v5422_v27 = vor.u32 %v1214_v57, %v1213_v18  ;;  %v5425_v23 = vmul.u32.u64.low %v5377_v53, %v1291_v41  ;;  %v5426_v8 = vmul.u32.u64.high %v5377_v53, %v1291_v41, %v5425_v23 }
 0x1d4   : > { %v1416_v6 = vclz %v4043_v13  ;;  %v1092_v0 = vadd.s32 %v5264_v20, %v5272_v33  ;;  %v1283_v10 = vsel %vm1277_vm6, %v1280_v25, %v1282_v58  ;;  %v4345_v63 = vpack.c.bf16 %v2077_v39, %v2076_v11 }
 0x1d5   : > { %v1566_v31 = vadd.s32 1, %v4050_v5  ;;  %v5431_v40 = vor.u32 4788187, %v1218_v28  ;;  %v1302_v32 = vadd.s32 1, %v5411_v26  ;;  %v1563_v57 = vand.u32 8388607, %v7713_v12 }
 0x1d6   : > { %v4044_v22 = vadd.s32 4294967294, %v1416_v6  ;;  %v1110_v18 = vshrl.u32 %v1092_v0, %v1108_v3  ;;  %v1114_v59 = vshll.u32 %v1113_v51, 23  ;;  %v1455_v13 = vand.u32 2139095040, %v5360_v62  ;;  %4346 = vmatprep.subr.bf16.mxu1 %v4345_v63 }
 0x1d7   : > { %vm1567_vm7 = vcmp.gt.s32.totalorder %v1566_v31, 0  ;;  %v1299_v33 = vmul.u32 %v5377_v53, %v1283_v10  ;;  %vm1301_vm9 = vc.u32 %v5426_v8, %v5410_v2  ;;  %4348 = vmatpush3.bf16.xpose.msra.mxu1 %v4345_v63  ;;  %v1109_v28 = vshll.u32 %v5317_v1, %v5395_v14 }
 0x1d8   : > { %v1568_v16 = vsel %vm1567_vm7, %v1566_v31, 0  ;;  %vm4045_vm11 = vcmp.lt.s32.totalorder %v4044_v22, 0  ;;  %v1303_v25 = vsel %vm1301_vm9, %v1302_v32, %v5411_v26  ;;  %v1220_v50 = vand.u32 2147483647, %v5431_v40 }
 0x1d9   : > { %v1570_v58 = vand.u32 31, %v1568_v16  ;;  %v1304_v11 = vadd.s32 %v1303_v25, %v1299_v33  ;;  %v1564_v39 = vor.u32 8388608, %v1563_v57  ;;  %v1111_v51 = vor.u32 %v1110_v18, %v1109_v28 }
 0x1da   : > { %v1115_v53 = vor.u32 4788187, %v1114_v59  ;;  %v1456_v5 = vshrl.u32 %v1455_v13, 23  ;;  %v5446_v6 = vsel %vm4045_vm11, 0, %v4044_v22  ;;  %v1569_v40 = vshrl.u32 %v1568_v16, 5 }
 0x1db   : > { %v1571_v41 = vsub.s32 32, %v1570_v58  ;;  %v1305_v23 = vadd.s32 536870912, %v1304_v11  ;;  %v1573_v0 = vshll.u32 %v7756_v4, %v1570_v58  ;;  %v1576_v14 = vshll.u32 %v7752_v52, %v1570_v58 }
 0x1dc   : > { %v1579_v10 = vshll.u32 %v7753_v24, %v1570_v58  ;;  %v1582_v32 = vshll.u32 %v7755_v30, %v1570_v58  ;;  %v1116_v57 = vand.u32 2147483647, %v1115_v53  ;;  %v1604_v25 = vshll.u32 %v1564_v39, 8 }
 0x1dd   : > { %v1574_v1 = vshrl.u32 %v7752_v52, %v1571_v41  ;;  %v1577_v26 = vshrl.u32 %v7753_v24, %v1571_v41  ;;  %v1580_v31 = vshrl.u32 %v7755_v30, %v1571_v41  ;;  %v5454_v63 = vshrl.u32 %v1305_v23, 30 }
 0x1de   : > { %v1583_v22 = vshrl.u32 %v7743_v19, %v1571_v41  ;;  %v4046_v12 = vadd.s32 4294967169, %v1456_v5  ;;  %v1420_v3 = vsub.s32 32, %v5446_v6  ;;  %v1424_v20 = vsub.s32 4294967266, %v5446_v6 }
 0x1df   : > { %7769 = vst [vmem:[#allocation20_spill] sm:$0xff] %v5454_v63  ;;  %v1575_v18 = vor.u32 %v1574_v1, %v1573_v0  ;;  %v1578_v59 = vor.u32 %v1577_v26, %v1576_v14  ;;  %v1581_v13 = vor.u32 %v1580_v31, %v1579_v10  ;;  %v1307_v33 = vshll.u32 %v5454_v63, 30 }
 0x1e0   : > { %v1584_v28 = vor.u32 %v1583_v22, %v1582_v32  ;;  %v1585_v23 = vshll.u32 %v7743_v19, %v1570_v58  ;;  %v1586_v16 = vshrl.u32 %v7745_v17, %v1571_v41  ;;  %vm1588_vm12 = vcmp.lt.s32.totalorder %v1569_v40, 1 }
 0x1e1   : > { %v5463_v21 = vsub.s32 %v1304_v11, %v1307_v33  ;;  %vm1590_vm15 = vcmp.lt.s32.totalorder %v1569_v40, 3  ;;  %vm1591_vm0 = vcmp.lt.s32.totalorder %v1569_v40, 4  ;;  %vm830_vm1 = vcmp.lt.s32.totalorder %v4975_v48, 0 }
 0x1e2   : > { %v1587_v53 = vor.u32 %v1586_v16, %v1585_v23  ;;  %v1593_v0 = vsel %vm1591_vm0, %v1581_v13, 2102212464  ;;  %v1596_v39 = vsel %vm1588_vm12, %v1575_v18, %v1578_v59  ;;  %v1597_v5 = vsel %vm1591_vm0, %v1584_v28, 920167782 }
 0x1e3   : > { %v1310_v14 = vsub.s32 0, %v5463_v21  ;;  %v1572_v1 = vshrl.u32 %v7756_v4, %v1571_v41  ;;  %vm1589_vm2 = vcmp.lt.s32.totalorder %v1569_v40, 2  ;;  %v1598_v58 = vsel %vm1590_vm15, %v1581_v13, %v1597_v5 }
 0x1e4   : > { %v1425_v26 = vadd.s32 127, %v1424_v20  ;;  %v1599_v11 = vsel %vm1589_vm2, %v1596_v39, %v1598_v58  ;;  %v1600_v10 = vsel %vm1588_vm12, %v1578_v59, %v1581_v13  ;;  %v1601_v31 = vsel %vm1591_vm0, %v1587_v53, 1326507024 }
 0x1e5   : > { %v4039_v32 = vmin.u32 %v1310_v14, %v5463_v21  ;;  %v1592_v22 = vsel %vm1588_vm12, %v1572_v1, %v1575_v18  ;;  %v1594_v33 = vsel %vm1590_vm15, %v1578_v59, %v1593_v0  ;;  %v1602_v23 = vsel %vm1590_vm15, %v1584_v28, %v1601_v31 }
 0x1e6   : > { %v1603_v16 = vsel %vm1589_vm2, %v1600_v10, %v1602_v23  ;;  %v5477_v41 = vmul.u32.u64.low %v1604_v25, %v1599_v11  ;;  %v5478_v63 = vmul.u32.u64.high %v1604_v25, %v1599_v11, %v5477_v41  ;;  %v1462_v20 = vadd.s32 1, %v4046_v12 }
 0x1e7   : > { %v1118_v5 = vcvt.s32.f32 %v1111_v51  ;;  %v1312_v39 = vclz %v4039_v32  ;;  %v5481_v58 = vmul.u32.u64.low %v1604_v25, %v1603_v16  ;;  %v5482_v13 = vmul.u32.u64.high %v1604_v25, %v1603_v16, %v5481_v58 }
 0x1e8   : > { %v7770_v53 = vcvt.s32.f32 %v5422_v27  ;;  %v1404_v18 = vadd.s32 %v5322_v54, %v5341_v38  ;;  %v1595_v59 = vsel %vm1589_vm2, %v1592_v22, %v1594_v33  ;;  %vm1463_vm3 = vcmp.gt.s32.totalorder %v1462_v20, 0 }
 0x1e9   : > { %v5491_v28 = vmul.f32 %v1118_v5, %v1116_v57  ;;  %v4040_v0 = vadd.s32 4294967294, %v1312_v39  ;;  %v7771_v12 = vand.u32 2147483647, %v5360_v62  ;;  %v1464_v1 = vsel %vm1463_vm3, %v1462_v20, 0 }
 0x1ea   : > { %v5486_v14 = vmul.f32 %v7770_v53, %v1220_v50  ;;  %v1422_v11 = vshrl.u32 %v1404_v18, %v1420_v3  ;;  %v1426_v10 = vshll.u32 %v1425_v26, 23  ;;  %v1614_v31 = vadd.s32 1, %v5478_v63 }
 0x1eb   : > { %v1459_v51 = vand.u32 8388607, %v7771_v12  ;;  %v1466_v27 = vand.u32 31, %v1464_v1  ;;  %v7772_v50 = vxor.u32 2147483648, %v5343_v60  ;;  %v1611_v38 = vmul.u32 %v1604_v25, %v1595_v59 }
 0x1ec   : > { %vm1613_vm4 = vc.u32 %v5482_v13, %v5477_v41  ;;  %v5507_v40 = vadd.f32 %v5352_v45, %v5026_v7  ;;  %v1421_v57 = vshll.u32 %v5399_v61, %v5446_v6  ;;  %vm4041_vm6 = vcmp.lt.s32.totalorder %v4040_v0, 0 }
 0x1ed   : > { %v5501_v54 = vsel %vm830_vm1, %v7772_v50, %v5343_v60  ;;  %v1615_v26 = vsel %vm1613_vm4, %v1614_v31, %v5478_v63  ;;  %v1467_v32 = vsub.s32 32, %v1466_v27  ;;  %v1460_v25 = vor.u32 8388608, %v1459_v51 }
 0x1ee   : > { %7773 = vst [vmem:[#allocation21_spill] sm:$0xff] %v5501_v54  ;;  %v1616_v60 = vadd.s32 %v1615_v26, %v1611_v38  ;;  %v5514_v33 = vor.u32 %v1422_v11, %v1421_v57  ;;  %v5516_v23 = vor.u32 4788187, %v1426_v10  ;;  %v1465_v5 = vshrl.u32 %v1464_v1, 5 }
 0x1ef   : > { %v1470_v7 = vshrl.u32 %v7752_v52, %v1467_v32  ;;  %v1473_v16 = vshrl.u32 %v7753_v24, %v1467_v32  ;;  %v1469_v61 = vshll.u32 %v7756_v4, %v1466_v27  ;;  %v1767_v6 = vand.u32 2139095040, %v5507_v40 }
 0x1f0   : > { %v1617_v20 = vadd.s32 536870912, %v1616_v60  ;;  %v5522_v63 = vsel %vm4041_vm6, 0, %v4040_v0  ;;  %v1472_v39 = vshll.u32 %v7752_v52, %v1466_v27  ;;  %v1475_v58 = vshll.u32 %v7753_v24, %v1466_v27 }
 0x1f1   : > { %v1476_v53 = vshrl.u32 %v7755_v30, %v1467_v32  ;;  %v1471_v59 = vor.u32 %v1470_v7, %v1469_v61  ;;  %v1478_v12 = vshll.u32 %v7755_v30, %v1466_v27  ;;  %v1479_v51 = vshrl.u32 %v7743_v19, %v1467_v32 }
 0x1f2   : > { %v5527_v18 = vshrl.u32 %v1617_v20, 30  ;;  %v1474_v1 = vor.u32 %v1473_v16, %v1472_v39  ;;  %v1481_v10 = vshll.u32 %v7743_v19, %v1466_v27  ;;  %v1482_v0 = vshrl.u32 %v7745_v17, %v1467_v32 }
 0x1f3   : > { %v1477_v11 = vor.u32 %v1476_v53, %v1475_v58  ;;  %v1480_v50 = vor.u32 %v1479_v51, %v1478_v12  ;;  %v1500_v38 = vshll.u32 %v1460_v25, 8  ;;  %v1316_v26 = vsub.s32 32, %v5522_v63 }
 0x1f4   : > { %7774 = vst [vmem:[#allocation22_spill] sm:$0xff] %v5527_v18  ;;  %v1619_v31 = vshll.u32 %v5527_v18, 30  ;;  %v1320_v7 = vsub.s32 4294967266, %v5522_v63  ;;  %v1483_v20 = vor.u32 %v1482_v0, %v1481_v10  ;;  %v1768_v61 = vshrl.u32 %v1767_v6, 23 }
 0x1f5   : > { %v1468_v16 = vshrl.u32 %v7756_v4, %v1467_v32  ;;  %vm1484_vm7 = vcmp.lt.s32.totalorder %v1465_v5, 1  ;;  %vm1487_vm9 = vcmp.lt.s32.totalorder %v1465_v5, 4  ;;  %vm1142_vm11 = vcmp.lt.s32.totalorder %v5032_v43, 0 }
 0x1f6   : > { %v5537_v22 = vsub.s32 %v1616_v60, %v1619_v31  ;;  %vm1486_vm12 = vcmp.lt.s32.totalorder %v1465_v5, 3  ;;  %v1489_v27 = vsel %vm1487_vm9, %v1477_v11, 2102212464  ;;  %v1492_v25 = vsel %vm1484_vm7, %v1471_v59, %v1474_v1 }
 0x1f7   : > { %v1493_v39 = vsel %vm1487_vm9, %v1480_v50, 920167782  ;;  %vm1038_vm15 = vcmp.lt.s32.totalorder %v5143_v29, 0  ;;  %vm1485_vm0 = vcmp.lt.s32.totalorder %v1465_v5, 2  ;;  %v1496_v60 = vsel %vm1484_vm7, %v1474_v1, %v1477_v11 }
 0x1f8   : > { %v1622_v58 = vsub.s32 0, %v5537_v22  ;;  %v1494_v6 = vsel %vm1486_vm12, %v1477_v11, %v1493_v39  ;;  %v1321_v53 = vadd.s32 127, %v1320_v7  ;;  %v1497_v12 = vsel %vm1487_vm9, %v1483_v20, 1326507024 }
 0x1f9   : > { %v1495_v32 = vsel %vm1485_vm0, %v1492_v25, %v1494_v6  ;;  %v4058_v51 = vadd.s32 4294967169, %v1768_v61  ;;  %v1488_v0 = vsel %vm1484_vm7, %v1468_v16, %v1471_v59  ;;  %v1490_v31 = vsel %vm1486_vm12, %v1474_v1, %v1489_v27 }
 0x1fa   : > { %v4051_v10 = vmin.u32 %v1622_v58, %v5537_v22  ;;  %v1498_v3 = vsel %vm1486_vm12, %v1480_v50, %v1497_v12  ;;  %v5552_v18 = vmul.u32.u64.low %v1500_v38, %v1495_v32  ;;  %v5553_v54 = vmul.u32.u64.high %v1500_v38, %v1495_v32, %v5552_v18 }
 0x1fb   : > { %v1499_v57 = vsel %vm1485_vm0, %v1496_v60, %v1498_v3  ;;  %v1774_v11 = vadd.s32 1, %v4058_v51  ;;  %v1300_v7 = vadd.s32 %v5410_v2, %v5426_v8  ;;  %v1428_v59 = vand.u32 2147483647, %v5516_v23 }
 0x1fc   : > { %v1624_v20 = vclz %v4051_v10  ;;  %v5558_v61 = vmul.u32.u64.low %v1500_v38, %v1499_v57  ;;  %v5559_v25 = vmul.u32.u64.high %v1500_v38, %v1499_v57, %v5558_v61  ;;  %v1491_v1 = vsel %vm1485_vm0, %v1488_v0, %v1490_v31 }
 0x1fd   : > { %vm1775_vm2 = vcmp.gt.s32.totalorder %v1774_v11, 0  ;;  %v5565_v3 = vadd.f32 %v5352_v45, %v5076_v34  ;;  %v1430_v50 = vcvt.s32.f32 %v5514_v33  ;;  %v1318_v16 = vshrl.u32 %v1300_v7, %v1316_v26 }
 0x1fe   : > { %v4052_v27 = vadd.s32 4294967294, %v1624_v20  ;;  %v1776_v39 = vsel %vm1775_vm2, %v1774_v11, 0  ;;  %v1322_v58 = vshll.u32 %v1321_v53, 23  ;;  %v1510_v2 = vadd.s32 1, %v5553_v54 }
 0x1ff   : > { %v7775_v8 = vand.u32 2147483647, %v5507_v40  ;;  %v1778_v6 = vand.u32 31, %v1776_v39  ;;  %v7776_v23 = vxor.u32 2147483648, %v5486_v14  ;;  %v1317_v34 = vshll.u32 %v5463_v21, %v5522_v63 }
 0x200   : > { %v1507_v33 = vmul.u32 %v1500_v38, %v1491_v1  ;;  %vm1509_vm3 = vc.u32 %v5559_v25, %v5552_v18  ;;  %v7778_v26 = vxor.u32 2147483648, %v5491_v28  ;;  %v5589_v53 = vmul.f32 %v1430_v50, %v1428_v59 }
 0x201   : > { %v1771_v57 = vand.u32 8388607, %v7775_v8  ;;  %v5576_v5 = vsel %vm1142_vm11, %v7776_v23, %v5486_v14  ;;  %v1511_v32 = vsel %vm1509_vm3, %v1510_v2, %v5553_v54  ;;  %v1779_v14 = vsub.s32 32, %v1778_v6 }
 0x202   : > { %7777 = vst [vmem:[#allocation23_spill] sm:$0xff] %v5576_v5  ;;  %v5587_v60 = vsel %vm1038_vm15, %v7778_v26, %v5491_v28  ;;  %v1319_v12 = vor.u32 %v1318_v16, %v1317_v34  ;;  %vm4053_vm4 = vcmp.lt.s32.totalorder %v4052_v27, 0  ;;  %v1512_v51 = vadd.s32 %v1511_v32, %v1507_v33 }
 0x203   : > { %7779 = vst [vmem:[#allocation24_spill] sm:$0xff] %v5587_v60  ;;  %v1323_v63 = vor.u32 4788187, %v1322_v58  ;;  %v1772_v38 = vor.u32 8388608, %v1771_v57  ;;  %v1782_v10 = vshrl.u32 %v7752_v52, %v1779_v14  ;;  %v1785_v0 = vshrl.u32 %v7753_v24, %v1779_v14 }
 0x204   : > { %v1513_v31 = vadd.s32 536870912, %v1512_v51  ;;  %v1777_v11 = vshrl.u32 %v1776_v39, 5  ;;  %v1781_v28 = vshll.u32 %v7756_v4, %v1778_v6  ;;  %v1663_v7 = vand.u32 2139095040, %v5565_v3 }
 0x205   : > { %v5597_v20 = vsel %vm4053_vm4, 0, %v4052_v27  ;;  %v1784_v54 = vshll.u32 %v7752_v52, %v1778_v6  ;;  %v1787_v61 = vshll.u32 %v7753_v24, %v1778_v6  ;;  %v1788_v59 = vshrl.u32 %v7755_v30, %v1779_v14 }
 0x206   : > { %v5602_v1 = vshrl.u32 %v1513_v31, 30  ;;  %v1783_v50 = vor.u32 %v1782_v10, %v1781_v28  ;;  %v1790_v16 = vshll.u32 %v7755_v30, %v1778_v6  ;;  %v1791_v58 = vshrl.u32 %v7743_v19, %v1779_v14 }
 0x207   : > { %v1786_v39 = vor.u32 %v1785_v0, %v1784_v54  ;;  %v1789_v2 = vor.u32 %v1788_v59, %v1787_v61  ;;  %v1793_v8 = vshll.u32 %v7743_v19, %v1778_v6  ;;  %v1794_v27 = vshrl.u32 %v7745_v17, %v1779_v14 }
 0x208   : > { %7780 = vst [vmem:[#allocation25_spill] sm:$0xff] %v5602_v1  ;;  %v1324_v57 = vand.u32 2147483647, %v1323_v63  ;;  %v1326_v23 = vcvt.s32.f32 %v1319_v12  ;;  %v1515_v34 = vshll.u32 %v5602_v1, 30  ;;  %v1792_v33 = vor.u32 %v1791_v58, %v1790_v16 }
 0x209   : > { %v1628_v26 = vsub.s32 32, %v5597_v20  ;;  %v1795_v32 = vor.u32 %v1794_v27, %v1793_v8  ;;  %v1812_v31 = vshll.u32 %v1772_v38, 8  ;;  %v1664_v10 = vshrl.u32 %v1663_v7, 23 }
 0x20a   : > { %v5610_v28 = vsub.s32 %v1512_v51, %v1515_v34  ;;  %v1780_v21 = vshrl.u32 %v7756_v4, %v1779_v14  ;;  %vm1796_vm6 = vcmp.lt.s32.totalorder %v1777_v11, 1  ;;  %vm1799_vm7 = vcmp.lt.s32.totalorder %v1777_v11, 4 }
 0x20b   : > { %vm1350_vm9 = vcmp.lt.s32.totalorder %v5183_v46, 0  ;;  %vm1798_vm12 = vcmp.lt.s32.totalorder %v1777_v11, 3  ;;  %v1801_v6 = vsel %vm1799_vm7, %v1789_v2, 2102212464  ;;  %v1804_v12 = vsel %vm1796_vm6, %v1783_v50, %v1786_v39 }
 0x20c   : > { %v1805_v63 = vsel %vm1799_vm7, %v1792_v33, 920167782  ;;  %v1518_v0 = vsub.s32 0, %v5610_v28  ;;  %vm1797_vm0 = vcmp.lt.s32.totalorder %v1777_v11, 2  ;;  %v1808_v38 = vsel %vm1796_vm6, %v1786_v39, %v1789_v2 }
 0x20d   : > { %v1806_v54 = vsel %vm1798_vm12, %v1789_v2, %v1805_v63  ;;  %v1632_v51 = vsub.s32 4294967266, %v5597_v20  ;;  %v1809_v14 = vsel %vm1799_vm7, %v1795_v32, 1326507024  ;;  %v4054_v61 = vadd.s32 4294967169, %v1664_v10  ;;  %v2078_v2 = vld [vmem:[%s7671_s3 + $0x10] sm:$0xff]  ;;  %v2079_v32 = vld [vmem:[%s7671_s3 + $0x18] sm:$0xff] }
 0x20e   : > { %v1807_v7 = vsel %vm1797_vm0, %v1804_v12, %v1806_v54  ;;  %v4047_v59 = vmin.u32 %v1518_v0, %v5610_v28  ;;  %v1800_v16 = vsel %vm1796_vm6, %v1780_v21, %v1783_v50  ;;  %v1802_v58 = vsel %vm1798_vm12, %v1786_v39, %v1801_v6 }
 0x20f   : > { %v1810_v8 = vsel %vm1798_vm12, %v1792_v33, %v1809_v14  ;;  %v5622_v34 = vmul.u32.u64.low %v1812_v31, %v1807_v7  ;;  %v5623_v1 = vmul.u32.u64.high %v1812_v31, %v1807_v7, %v5622_v34  ;;  %v1670_v63 = vadd.s32 1, %v4054_v61 }
 0x210   : > { %v1811_v27 = vsel %vm1797_vm0, %v1808_v38, %v1810_v8  ;;  %v1432_v10 = vxor.u32 2147483648, %v5589_v53  ;;  %v1520_v21 = vclz %v4047_v59  ;;  %v5636_v33 = vmul.f32 %v1326_v23, %v1324_v57 }
 0x211   : > { %v5633_v50 = vmul.u32.u64.low %v1812_v31, %v1811_v27  ;;  %v5634_v39 = vmul.u32.u64.high %v1812_v31, %v1811_v27, %v5633_v50  ;;  %v1612_v6 = vadd.s32 %v5477_v41, %v5482_v13  ;;  %v1803_v12 = vsel %vm1797_vm0, %v1800_v16, %v1802_v58 }
 0x212   : > { %vm1671_vm2 = vcmp.gt.s32.totalorder %v1670_v63, 0  ;;  %v4048_v0 = vadd.s32 4294967294, %v1520_v21  ;;  %v7781_v54 = vand.u32 2147483647, %v5565_v3  ;;  %v4349_v14 = vpack.c.bf16 %v2079_v32, %v2078_v2 }
 0x213   : > { %v1672_v7 = vsel %vm1671_vm2, %v1670_v63, 0  ;;  %v1630_v61 = vshrl.u32 %v1612_v6, %v1628_v26  ;;  %v1633_v8 = vadd.s32 127, %v1632_v51  ;;  %v1822_v59 = vadd.s32 1, %v5623_v1 }
 0x214   : > { %v1667_v38 = vand.u32 8388607, %v7781_v54  ;;  %v1674_v27 = vand.u32 31, %v1672_v7  ;;  %v5647_v57 = vsel %vm1350_vm9, %v1432_v10, %v5589_v53  ;;  %v1819_v41 = vmul.u32 %v1812_v31, %v1803_v12  ;;  %4350 = vmatprep.subr.bf16.mxu1 %v4349_v14 }
 0x215   : > { %7782 = vst [vmem:[#allocation26_spill] sm:$0xff] %v5647_v57  ;;  %vm1821_vm3 = vc.u32 %v5634_v39, %v5622_v34  ;;  %v5653_v13 = vadd.f32 %v5352_v45, %v5165_v36  ;;  %v1629_v23 = vshll.u32 %v5537_v22, %v5597_v20  ;;  %4352 = vmatpush3.bf16.xpose.msra.mxu1 %v4349_v14  ;;  %vm4049_vm4 = vcmp.lt.s32.totalorder %v4048_v0, 0 }
 0x216   : > { %v1823_v26 = vsel %vm1821_vm3, %v1822_v59, %v5623_v1  ;;  %v1675_v51 = vsub.s32 32, %v1674_v27  ;;  %v1508_v53 = vadd.s32 %v5552_v18, %v5559_v25  ;;  %v1668_v16 = vor.u32 8388608, %v1667_v38 }
 0x217   : > { %v1824_v31 = vadd.s32 %v1823_v26, %v1819_v41  ;;  %v5661_v58 = vor.u32 %v1630_v61, %v1629_v23  ;;  %v1634_v36 = vshll.u32 %v1633_v8, 23  ;;  %v1673_v10 = vshrl.u32 %v1672_v7, 5 }
 0x218   : > { %v1678_v63 = vshrl.u32 %v7752_v52, %v1675_v51  ;;  %v1681_v2 = vshrl.u32 %v7753_v24, %v1675_v51  ;;  %v1677_v22 = vshll.u32 %v7756_v4, %v1674_v27  ;;  %v1975_v20 = vand.u32 2139095040, %v5653_v13 }
 0x219   : > { %v1825_v32 = vadd.s32 536870912, %v1824_v31  ;;  %v5667_v1 = vsel %vm4049_vm4, 0, %v4048_v0  ;;  %v1680_v18 = vshll.u32 %v7752_v52, %v1674_v27  ;;  %v1683_v25 = vshll.u32 %v7753_v24, %v1674_v27 }
 0x21a   : > { %v1684_v21 = vshrl.u32 %v7755_v30, %v1675_v51  ;;  %v1679_v6 = vor.u32 %v1678_v63, %v1677_v22  ;;  %v1686_v12 = vshll.u32 %v7755_v30, %v1674_v27  ;;  %v1687_v54 = vshrl.u32 %v7743_v19, %v1675_v51 }
 0x21b   : > { %v5672_v50 = vshrl.u32 %v1825_v32, 30  ;;  %v1682_v38 = vor.u32 %v1681_v2, %v1680_v18  ;;  %v1689_v14 = vshll.u32 %v7743_v19, %v1674_v27  ;;  %v1690_v0 = vshrl.u32 %v7745_v17, %v1675_v51 }
 0x21c   : > { %v1685_v7 = vor.u32 %v1684_v21, %v1683_v25  ;;  %v1635_v61 = vor.u32 4788187, %v1634_v36  ;;  %v1688_v59 = vor.u32 %v1687_v54, %v1686_v12  ;;  %v1708_v41 = vshll.u32 %v1668_v16, 8 }
 0x21d   : > { %7783 = vst [vmem:[#allocation27_spill] sm:$0xff] %v5672_v50  ;;  %v1827_v8 = vshll.u32 %v5672_v50, 30  ;;  %v1524_v23 = vsub.s32 32, %v5667_v1  ;;  %v1691_v26 = vor.u32 %v1690_v0, %v1689_v14  ;;  %v1976_v32 = vshrl.u32 %v1975_v20, 23 }
 0x21e   : > { %v1676_v2 = vshrl.u32 %v7756_v4, %v1675_v51  ;;  %vm1692_vm6 = vcmp.lt.s32.totalorder %v1673_v10, 1  ;;  %vm1695_vm7 = vcmp.lt.s32.totalorder %v1673_v10, 4  ;;  %vm1694_vm12 = vcmp.lt.s32.totalorder %v1673_v10, 3 }
 0x21f   : > { %v5681_v22 = vsub.s32 %v1824_v31, %v1827_v8  ;;  %v1697_v27 = vsel %vm1695_vm7, %v1685_v7, 2102212464  ;;  %v1700_v18 = vsel %vm1692_vm6, %v1679_v6, %v1682_v38  ;;  %v1701_v36 = vsel %vm1695_vm7, %v1688_v59, 920167782 }
 0x220   : > { %vm1693_vm0 = vcmp.lt.s32.totalorder %v1673_v10, 2  ;;  %v1702_v16 = vsel %vm1694_vm12, %v1685_v7, %v1701_v36  ;;  %v1704_v21 = vsel %vm1692_vm6, %v1682_v38, %v1685_v7  ;;  %v1528_v12 = vsub.s32 4294967266, %v5667_v1  ;;  %v2080_v7 = vld [vmem:[%s7671_s3 + $0x20] sm:$0xff] }
 0x221   : > { %v1830_v25 = vsub.s32 0, %v5681_v22  ;;  %v1703_v54 = vsel %vm1693_vm0, %v1700_v18, %v1702_v16  ;;  %v1705_v20 = vsel %vm1695_vm7, %v1691_v26, 1326507024  ;;  %v4066_v31 = vadd.s32 4294967169, %v1976_v32  ;;  %v2081_v26 = vld [vmem:[%s7671_s3 + $0x28] sm:$0xff] }
 0x222   : > { %v1696_v51 = vsel %vm1692_vm6, %v1676_v2, %v1679_v6  ;;  %v1698_v0 = vsel %vm1694_vm12, %v1682_v38, %v1697_v27  ;;  %v1706_v8 = vsel %vm1694_vm12, %v1688_v59, %v1705_v20  ;;  %v1638_v32 = vcvt.s32.f32 %v5661_v58 }
 0x223   : > { %v4059_v14 = vmin.u32 %v1830_v25, %v5681_v22  ;;  %v1707_v11 = vsel %vm1693_vm0, %v1704_v21, %v1706_v8  ;;  %v5689_v63 = vmul.u32.u64.low %v1708_v41, %v1703_v54  ;;  %v5690_v50 = vmul.u32.u64.high %v1708_v41, %v1703_v54, %v5689_v63 }
 0x224   : > { %v1982_v57 = vadd.s32 1, %v4066_v31  ;;  %v5700_v38 = vmul.u32.u64.low %v1708_v41, %v1707_v11  ;;  %v5701_v59 = vmul.u32.u64.high %v1708_v41, %v1707_v11, %v5700_v38  ;;  %v1636_v2 = vand.u32 2147483647, %v1635_v61 }
 0x225   : > { %v1832_v6 = vclz %v4059_v14  ;;  %v1526_v27 = vshrl.u32 %v1508_v53, %v1524_v23  ;;  %v1699_v18 = vsel %vm1693_vm0, %v1696_v51, %v1698_v0  ;;  %v5704_v36 = vadd.s32 127, %v1528_v12 }
 0x226   : > { %vm1983_vm2 = vcmp.gt.s32.totalorder %v1982_v57, 0  ;;  %v4353_v21 = vpack.c.bf16 %v2081_v26, %v2080_v7  ;;  %v1718_v54 = vadd.s32 1, %v5690_v50  ;;  %v7784_v20 = vand.u32 2147483647, %v5653_v13 }
 0x227   : > { %v4060_v25 = vadd.s32 4294967294, %v1832_v6  ;;  %v1984_v16 = vsel %vm1983_vm2, %v1982_v57, 0  ;;  %v5711_v11 = vadd.f32 %v5352_v45, %v5242_v37  ;;  %v1525_v53 = vshll.u32 %v5610_v28, %v5667_v1 }
 0x228   : > { %v1979_v31 = vand.u32 8388607, %v7784_v20  ;;  %v1986_v58 = vand.u32 31, %v1984_v16  ;;  %v1715_v10 = vmul.u32 %v1708_v41, %v1699_v18  ;;  %vm1717_vm4 = vc.u32 %v5701_v59, %v5689_v63  ;;  %4354 = vmatprep.subr.bf16.mxu1 %v4353_v21 }
 0x229   : > { %vm4061_vm3 = vcmp.lt.s32.totalorder %v4060_v25, 0  ;;  %v5717_v57 = vmul.f32 %v1638_v32, %v1636_v2  ;;  %v5721_v61 = vadd.s32 %v5622_v34, %v5634_v39  ;;  %v1719_v23 = vsel %vm1717_vm4, %v1718_v54, %v5690_v50  ;;  %4356 = vmatpush3.bf16.xpose.msra.mxu1 %v4353_v21 }
 0x22a   : > { %v1987_v12 = vsub.s32 32, %v1986_v58  ;;  %v5724_v37 = vor.u32 %v1526_v27, %v1525_v53  ;;  %v1530_v45 = vshll.u32 %v5704_v36, 23  ;;  %v5727_v28 = vsel %vm4061_vm3, 0, %v4060_v25 }
 0x22b   : > { %v1720_v1 = vadd.s32 %v1719_v23, %v1715_v10  ;;  %v1980_v41 = vor.u32 8388608, %v1979_v31  ;;  %v7724_v0 = vand.u32 2147483647, %v5711_v11  ;;  %v1985_v39 = vshrl.u32 %v1984_v16, 5 }
 0x22c   : > { %v1990_v14 = vshrl.u32 %v7752_v52, %v1987_v12  ;;  %v1993_v51 = vshrl.u32 %v7753_v24, %v1987_v12  ;;  %v1989_v50 = vshll.u32 %v7756_v4, %v1986_v58  ;;  %v1871_v8 = vand.u32 2139095040, %v5711_v11 }
 0x22d   : > { %v1721_v34 = vadd.s32 536870912, %v1720_v1  ;;  %v1840_v7 = vsub.s32 4294967266, %v5727_v28  ;;  %v1992_v26 = vshll.u32 %v7752_v52, %v1986_v58  ;;  %v1995_v32 = vshll.u32 %v7753_v24, %v1986_v58 }
 0x22e   : > { %v1996_v6 = vshrl.u32 %v7755_v30, %v1987_v12  ;;  %v1991_v2 = vor.u32 %v1990_v14, %v1989_v50  ;;  %v1998_v27 = vshll.u32 %v7755_v30, %v1986_v58  ;;  %v1999_v18 = vshrl.u32 %v7743_v19, %v1987_v12 }
 0x22f   : > { %v5738_v38 = vshrl.u32 %v1721_v34, 30  ;;  %v1994_v36 = vor.u32 %v1993_v51, %v1992_v26  ;;  %v2001_v16 = vshll.u32 %v7743_v19, %v1986_v58  ;;  %v2002_v21 = vshrl.u32 %v7745_v17, %v1987_v12 }
 0x230   : > { %v1997_v25 = vor.u32 %v1996_v6, %v1995_v32  ;;  %v2000_v20 = vor.u32 %v1999_v18, %v1998_v27  ;;  %v5745_v31 = vshll.u32 %v1980_v41, 8  ;;  %v5749_v53 = vand.u32 8388607, %v7724_v0 }
 0x231   : > { %7785 = vst [vmem:[#allocation28_spill] sm:$0xff] %v5738_v38  ;;  %v1723_v54 = vshll.u32 %v5738_v38, 30  ;;  %v1836_v10 = vsub.s32 32, %v5727_v28  ;;  %v1841_v23 = vadd.s32 127, %v1840_v7  ;;  %v2003_v14 = vor.u32 %v2002_v21, %v2001_v16 }
 0x232   : > { %v1872_v34 = vshrl.u32 %v1871_v8, 23  ;;  %v1988_v58 = vshrl.u32 %v7756_v4, %v1987_v12  ;;  %vm2004_vm6 = vcmp.lt.s32.totalorder %v1985_v39, 1  ;;  %vm2007_vm7 = vcmp.lt.s32.totalorder %v1985_v39, 4  ;;  %v2082_v12 = vld [vmem:[%s7671_s3 + $0x30] sm:$0xff] }
 0x233   : > { %v5752_v51 = vsub.s32 %v1720_v1, %v1723_v54  ;;  %vm2006_vm12 = vcmp.lt.s32.totalorder %v1985_v39, 3  ;;  %v2009_v50 = vsel %vm2007_vm7, %v1997_v25, 2102212464  ;;  %v2012_v41 = vsel %vm2004_vm6, %v1991_v2, %v1994_v36 }
 0x234   : > { %v2013_v26 = vsel %vm2007_vm7, %v2000_v20, 920167782  ;;  %vm2005_vm0 = vcmp.lt.s32.totalorder %v1985_v39, 2  ;;  %v2016_v7 = vsel %vm2004_vm6, %v1994_v36, %v1997_v25  ;;  %v1842_v27 = vshll.u32 %v1841_v23, 23  ;;  %v2084_v23 = vld [vmem:[%s7671_s3 + $0x40] sm:$0xff] }
 0x235   : > { %v1726_v32 = vsub.s32 0, %v5752_v51  ;;  %v2014_v6 = vsel %vm2006_vm12, %v1997_v25, %v2013_v26  ;;  %v2017_v8 = vsel %vm2007_vm7, %v2003_v14, 1326507024  ;;  %v4062_v18 = vadd.s32 4294967169, %v1872_v34  ;;  %v2083_v25 = vld [vmem:[%s7671_s3 + $0x38] sm:$0xff]  ;;  %v2085_v14 = vld [vmem:[%s7671_s3 + $0x48] sm:$0xff] }
 0x236   : > { %v2015_v1 = vsel %vm2005_vm0, %v2012_v41, %v2014_v6  ;;  %v2008_v21 = vsel %vm2004_vm6, %v1988_v58, %v1991_v2  ;;  %v2010_v54 = vsel %vm2006_vm12, %v1994_v36, %v2009_v50  ;;  %v2018_v0 = vsel %vm2006_vm12, %v2000_v20, %v2017_v8 }
 0x237   : > { %v4055_v16 = vmin.u32 %v1726_v32, %v5752_v51  ;;  %v2019_v34 = vsel %vm2005_vm0, %v2016_v7, %v2018_v0  ;;  %v5778_v2 = vmul.u32.u64.low %v5745_v31, %v2015_v1  ;;  %v5779_v58 = vmul.u32.u64.high %v5745_v31, %v2015_v1, %v5778_v2 }
 0x238   : > { %v1878_v36 = vadd.s32 1, %v4062_v18  ;;  %v5782_v20 = vor.u32 4788187, %v1530_v45  ;;  %v5785_v41 = vmul.u32.u64.low %v5745_v31, %v2019_v34  ;;  %v5786_v26 = vmul.u32.u64.high %v5745_v31, %v2019_v34, %v5785_v41 }
 0x239   : > { %v1728_v50 = vclz %v4055_v16  ;;  %v2011_v32 = vsel %vm2005_vm0, %v2008_v21, %v2010_v54  ;;  %v4357_v6 = vpack.c.bf16 %v2083_v25, %v2082_v12  ;;  %v4361_v8 = vpack.c.bf16 %v2085_v14, %v2084_v23 }
 0x23a   : > { %vm1879_vm2 = vcmp.gt.s32.totalorder %v1878_v36, 0  ;;  %v1838_v7 = vshrl.u32 %v5721_v61, %v1836_v10  ;;  %v5791_v46 = vor.u32 4788187, %v1842_v27  ;;  %v2030_v45 = vadd.s32 1, %v5779_v58 }
 0x23b   : > { %v4056_v1 = vadd.s32 4294967294, %v1728_v50  ;;  %v1880_v38 = vsel %vm1879_vm2, %v1878_v36, 0  ;;  %v1876_v18 = vor.u32 8388608, %v5749_v53  ;;  %4358 = vmatprep.subr.bf16.mxu1 %v4357_v6  ;;  %v1837_v39 = vshll.u32 %v5681_v22, %v5727_v28  ;;  %v2086_v53 = vld [vmem:[%s7671_s3 + $0x50] sm:$0xff]  ;;  %v2087_v22 = vld [vmem:[%s7671_s3 + $0x58] sm:$0xff] }
 0x23c   : > { %v1882_v16 = vand.u32 31, %v1880_v38  ;;  %v2027_v12 = vmul.u32 %v5745_v31, %v2011_v32  ;;  %vm2029_vm4 = vc.u32 %v5786_v26, %v5778_v2  ;;  %4360 = vmatpush3.bf16.xpose.msra.mxu1 %v4357_v6  ;;  %v1716_v31 = vadd.s32 %v5689_v63, %v5701_v59  ;;  %v2088_v6 = vld [vmem:[%s7671_s3 + $0x60] sm:$0xff] }
 0x23d   : > { %vm4057_vm3 = vcmp.lt.s32.totalorder %v4056_v1, 0  ;;  %v2031_v27 = vsel %vm2029_vm4, %v2030_v45, %v5779_v58  ;;  %4362 = vmatprep.subr.bf16.mxu1 %v4361_v8  ;;  %v5809_v28 = vor.u32 %v1838_v7, %v1837_v39  ;;  %v5816_v58 = vshll.u32 %v1876_v18, 8  ;;  %v2089_v45 = vld [vmem:[%s7671_s3 + $0x68] sm:$0xff]  ;;  %v2091_v18 = vld [vmem:[%s7671_s3 + $0x78] sm:$0xff] }
 0x23e   : > { %v1883_v21 = vsub.s32 32, %v1882_v16  ;;  %v1731_v54 = vsel %vm4057_vm3, 0, %v4056_v1  ;;  %v2032_v25 = vadd.s32 %v2031_v27, %v2027_v12  ;;  %v1881_v50 = vshrl.u32 %v1880_v38, 5  ;;  %v2090_v38 = vld [vmem:[%s7671_s3 + $0x70] sm:$0xff] }
 0x23f   : > { %v1885_v41 = vshll.u32 %v7756_v4, %v1882_v16  ;;  %v4365_v32 = vpack.c.bf16 %v2087_v22, %v2086_v53  ;;  %v1732_v63 = vsub.s32 32, %v1731_v54  ;;  %v1888_v59 = vshll.u32 %v7752_v52, %v1882_v16 }
 0x240   : > { %v1886_v14 = vshrl.u32 %v7752_v52, %v1883_v21  ;;  %v1889_v34 = vshrl.u32 %v7753_v24, %v1883_v21  ;;  %v2033_v36 = vadd.s32 536870912, %v2032_v25  ;;  %v1891_v7 = vshll.u32 %v7753_v24, %v1882_v16 }
 0x241   : > { %v1892_v1 = vshrl.u32 %v7755_v30, %v1883_v21  ;;  %v1894_v27 = vshll.u32 %v7755_v30, %v1882_v16  ;;  %v1895_v53 = vshrl.u32 %v7743_v19, %v1883_v21  ;;  %v1897_v23 = vshll.u32 %v7743_v19, %v1882_v16 }
 0x242   : > { %v5834_v39 = vshrl.u32 %v2033_v36, 30  ;;  %v1887_v12 = vor.u32 %v1886_v14, %v1885_v41  ;;  %v1890_v22 = vor.u32 %v1889_v34, %v1888_v59  ;;  %v1898_v10 = vshrl.u32 %v7745_v17, %v1883_v21 }
 0x243   : > { %v1893_v0 = vor.u32 %v1892_v1, %v1891_v7  ;;  %v1896_v5 = vor.u32 %v1895_v53, %v1894_v27  ;;  %v5841_v43 = vpack.c.bf16 %v2089_v45, %v2088_v6  ;;  %v5843_v60 = vpack.c.bf16 %v2091_v18, %v2090_v38 }
 0x244   : > { %v2035_v61 = vshll.u32 %v5834_v39, 30  ;;  %4364 = vmatpush3.bf16.xpose.msra.mxu1 %v4361_v8  ;;  %v1736_v36 = vsub.s32 4294967266, %v1731_v54  ;;  %v1884_v14 = vshrl.u32 %v7756_v4, %v1883_v21  ;;  %v1899_v41 = vor.u32 %v1898_v10, %v1897_v23 }
 0x245   : > { %4366 = vmatprep.subr.bf16.mxu1 %v4365_v32  ;;  %v1734_v59 = vshrl.u32 %v1716_v31, %v1732_v63  ;;  %vm1900_vm6 = vcmp.lt.s32.totalorder %v1881_v50, 1  ;;  %vm1903_vm7 = vcmp.lt.s32.totalorder %v1881_v50, 4  ;;  %vm1902_vm12 = vcmp.lt.s32.totalorder %v1881_v50, 3 }
 0x246   : > { %v5847_v7 = vsub.s32 %v2032_v25, %v2035_v61  ;;  %v1905_v16 = vsel %vm1903_vm7, %v1893_v0, 2102212464  ;;  %v1908_v1 = vsel %vm1900_vm6, %v1887_v12, %v1890_v22  ;;  %v1909_v8 = vsel %vm1903_vm7, %v1896_v5, 920167782 }
 0x247   : > { %vm1901_vm0 = vcmp.lt.s32.totalorder %v1881_v50, 2  ;;  %v1910_v45 = vsel %vm1902_vm12, %v1893_v0, %v1909_v8  ;;  %v1912_v38 = vsel %vm1900_vm6, %v1890_v22, %v1893_v0  ;;  %v1733_v21 = vshll.u32 %v5752_v51, %v1731_v54 }
 0x248   : > { %v2038_v6 = vsub.s32 0, %v5847_v7  ;;  %v1737_v10 = vadd.s32 127, %v1736_v36  ;;  %v1911_v23 = vsel %vm1901_vm0, %v1908_v1, %v1910_v45  ;;  %v1913_v18 = vsel %vm1903_vm7, %v1899_v41, 1326507024 }
 0x249   : > { %v1904_v31 = vsel %vm1900_vm6, %v1884_v14, %v1887_v12  ;;  %v1906_v25 = vsel %vm1902_vm12, %v1890_v22, %v1905_v16  ;;  %v1914_v63 = vsel %vm1902_vm12, %v1896_v5, %v1913_v18  ;;  %v2028_v27 = vadd.s32 %v5778_v2, %v5786_v26 }
 0x24a   : > { %v4067_v61 = vmin.u32 %v2038_v6, %v5847_v7  ;;  %v1915_v53 = vsel %vm1901_vm0, %v1912_v38, %v1914_v63  ;;  %v5857_v34 = vmul.u32.u64.low %v5816_v58, %v1911_v23  ;;  %v5858_v8 = vmul.u32.u64.high %v5816_v58, %v1911_v23, %v5857_v34  ;;  %v7787_v63 = vld [vmem:[#allocation5_spill] sm:$0xff] }
 0x24b   : > { %v5861_v51 = vor.u32 %v1734_v59, %v1733_v21  ;;  %v5864_v54 = vmul.u32.u64.low %v5816_v58, %v1915_v53  ;;  %v5865_v36 = vmul.u32.u64.high %v5816_v58, %v1915_v53, %v5864_v54  ;;  %v1738_v12 = vshll.u32 %v1737_v10, 23 }
 0x24c   : > { %v2040_v0 = vclz %v4067_v61  ;;  %4368 = vmatpush3.bf16.xpose.msra.mxu1 %v4365_v32  ;;  %v1907_v5 = vsel %vm1901_vm0, %v1904_v31, %v1906_v25  ;;  %v429_v2 = vshll.u32 %v7756_v4, %v4950_v56  ;;  %v430_v26 = vshrl.u32 %v7752_v52, %v4971_v47 }
 0x24d   : > { %4370 = vmatprep.subr.bf16.mxu1 %v5841_v43  ;;  %v7786_v14 = vand.u32 2147483647, %v4801_v44  ;;  %v432_v59 = vshll.u32 %v7752_v52, %v4950_v56  ;;  %v433_v32 = vshrl.u32 %v7753_v24, %v4971_v47  ;;  %v1926_v50 = vadd.s32 1, %v5858_v8 }
 0x24e   : > { %v4068_v22 = vadd.s32 4294967294, %v2040_v0  ;;  %v431_v16 = vor.u32 %v430_v26, %v429_v2  ;;  %v435_v1 = vshll.u32 %v7753_v24, %v4950_v56  ;;  %v436_v6 = vshrl.u32 %v7755_v30, %v4971_v47  ;;  %v7789_v26 = vld [vmem:[#allocation11_spill] sm:$0xff] }
 0x24f   : > { %v419_v41 = vand.u32 8388607, %v7786_v14  ;;  %v1923_v45 = vmul.u32 %v5816_v58, %v1907_v5  ;;  %vm1925_vm3 = vc.u32 %v5865_v36, %v5857_v34  ;;  %v434_v38 = vor.u32 %v433_v32, %v432_v59  ;;  %v7788_v5 = vld [vmem:[#allocation10_spill] sm:$0xff] }
 0x250   : > { %vm4069_vm2 = vcmp.lt.s32.totalorder %v4068_v22, 0  ;;  %v1739_v21 = vor.u32 4788187, %v1738_v12  ;;  %v1927_v23 = vsel %vm1925_vm3, %v1926_v50, %v5858_v8  ;;  %v437_v18 = vor.u32 %v436_v6, %v435_v1 }
 0x251   : > { %v2043_v10 = vsel %vm4069_vm2, 0, %v4068_v22  ;;  %v1928_v25 = vadd.s32 %v1927_v23, %v1923_v45  ;;  %vm444_vm4 = vcmp.lt.s32.totalorder %v7787_v63, 1  ;;  %v420_v56 = vor.u32 8388608, %v419_v41 }
 0x252   : > { %v2044_v61 = vsub.s32 32, %v2043_v10  ;;  %v2048_v31 = vsub.s32 4294967266, %v2043_v10  ;;  %v428_v53 = vshrl.u32 %v7756_v4, %v4971_v47  ;;  %vm445_vm6 = vcmp.lt.s32.totalorder %v7787_v63, 2 }
 0x253   : > { %v452_v58 = vsel %vm444_vm4, %v431_v16, %v434_v38  ;;  %v1929_v12 = vadd.s32 536870912, %v1928_v25  ;;  %vm446_vm7 = vcmp.lt.s32.totalorder %v7787_v63, 3  ;;  %v449_v8 = vsel %vm447_vm13, %v437_v18, 2102212464 }
 0x254   : > { %v2046_v0 = vshrl.u32 %v2028_v27, %v2044_v61  ;;  %v2049_v54 = vadd.s32 127, %v2048_v31  ;;  %4372 = vmatpush3.bf16.xpose.msra.mxu1 %v5841_v43  ;;  %v454_v47 = vsel %vm446_vm7, %v437_v18, %v7788_v5  ;;  %v456_v2 = vsel %vm444_vm4, %v434_v38, %v437_v18  ;;  %v7790_v27 = vld [vmem:[#allocation6_spill] sm:$0xff] }
 0x255   : > { %4374 = vmatprep.subr.bf16.mxu1 %v5843_v60  ;;  %v458_v22 = vsel %vm446_vm7, %v7790_v27, %v7789_v26  ;;  %v2045_v43 = vshll.u32 %v5847_v7, %v2043_v10  ;;  %v5909_v41 = vshrl.u32 %v1929_v12, 30  ;;  %v455_v59 = vsel %vm445_vm6, %v452_v58, %v454_v47 }
 0x256   : > { %v2050_v14 = vshll.u32 %v2049_v54, 23  ;;  %v1740_v32 = vand.u32 2147483647, %v1739_v21  ;;  %v448_v50 = vsel %vm444_vm4, %v428_v53, %v431_v16  ;;  %v459_v1 = vsel %vm445_vm6, %v456_v2, %v458_v22 }
 0x257   : > { %v460_v6 = vshll.u32 %v420_v56, 8  ;;  %vm1246_vm13 = vcmp.lt.s32.totalorder %v5229_v35, 0  ;;  %vm7734_vm12 = vcmp.lt.s32.totalorder %v5356_v9, 0  ;;  %v2047_v45 = vor.u32 %v2046_v0, %v2045_v43 }
 0x258   : > { %v2051_v7 = vor.u32 4788187, %v2050_v14  ;;  %v1931_v10 = vshll.u32 %v5909_v41, 30  ;;  %v450_v23 = vsel %vm446_vm7, %v434_v38, %v449_v8  ;;  %v1846_v31 = vcvt.s32.f32 %v5809_v28  ;;  %v7797_v8 = vld [vmem:[#allocation14_spill] sm:$0xff] }
 0x259   : > { %v5922_v18 = vmul.u32.u64.low %v460_v6, %v459_v1  ;;  %v5923_v21 = vmul.u32.u64.high %v460_v6, %v459_v1, %v5922_v18  ;;  %v5925_v61 = vmul.u32.u64.low %v460_v6, %v455_v59  ;;  %v5926_v16 = vmul.u32.u64.high %v460_v6, %v455_v59, %v5925_v61 }
 0x25a   : > { %v1742_v56 = vcvt.s32.f32 %v5861_v51  ;;  %v5931_v53 = vsub.s32 %v1928_v25, %v1931_v10  ;;  %v7791_v58 = vand.u32 2147483647, %v4798_v42  ;;  %vm7735_vm2 = vcmp.lt.s32.totalorder %v5360_v62, 0  ;;  %v7796_v51 = vld [vmem:[#allocation2_spill] sm:$0xff] }
 0x25b   : > { %v7794_v38 = vand.u32 2147483647, %v5782_v20  ;;  %v7795_v54 = vcvt.s32.f32 %v5724_v37  ;;  %vm7732_vm3 = vcmp.lt.s32.totalorder %v5507_v40, 0  ;;  %v451_v28 = vsel %vm445_vm6, %v448_v50, %v450_v23 }
 0x25c   : > { %vm5935_vm0 = vcmp.le.f32.partialorder %v7791_v58, 0.7853982  ;;  %v602_v25 = vsub.s32 4, %v7796_v51  ;;  %v7798_v47 = vand.u32 2147483647, %v5791_v46  ;;  %v1743_v26 = vmul.f32 %v1742_v56, %v1740_v32  ;;  %4376 = vmatpush3.bf16.xpose.msra.mxu1 %v5843_v60  ;;  %v7802_v32 = vld [vmem:[#allocation7_spill] sm:$0xff] }
 0x25d   : > { %v1535_v12 = vmul.f32 %v7795_v54, %v7794_v38  ;;  %v604_v5 = vsel %vm5935_vm0, %v4798_v42, %v7797_v8  ;;  %v2054_v20 = vcvt.s32.f32 %v2047_v45  ;;  %v1934_v37 = vsub.s32 0, %v5931_v53 }
 0x25e   : > { %v1847_v2 = vmul.f32 %v1846_v31, %v7798_v47  ;;  %v2052_v27 = vand.u32 2147483647, %v2051_v7  ;;  %vm469_vm4 = vc.u32 %v5923_v21, %v5925_v61  ;;  %v470_v63 = vadd.s32 1, %v5926_v16 }
 0x25f   : > { %4519 = vcosq.f32 %v604_v5  ;;  %v4063_v22 = vmin.u32 %v1934_v37, %v5931_v53  ;;  %v467_v43 = vmul.u32 %v460_v6, %v451_v28  ;;  %v7799_v46 = vand.u32 2147483647, %v4813_v55 }
 0x260   : > { %4521 = vsinq.f32 %v604_v5  ;;  %v471_v59 = vsel %vm469_vm4, %v470_v63, %v5926_v16  ;;  %v603_v60 = vsel %vm518_vm8, %v602_v25, %v7796_v51  ;;  %v706_v50 = vsub.s32 4, %v7802_v32 }
 0x261   : > { %vm5962_vm6 = vcmp.le.f32.partialorder %v7799_v46, 0.7853982  ;;  %v1536_v6 = vxor.u32 2147483648, %v1535_v12  ;;  %v1848_v45 = vxor.u32 2147483648, %v1847_v2  ;;  %v1936_v7 = vclz %v4063_v22 }
 0x262   : > { %v708_v1 = vsel %vm5962_vm6, %v4813_v55, %v5336_v15  ;;  %v472_v10 = vadd.s32 %v471_v59, %v467_v43  ;;  %v7803_v23 = vxor.u32 2147483648, %v5636_v33  ;;  %v7804_v16 = vxor.u32 2147483648, %v5717_v57  ;;  %v7808_v43 = vld [vmem:[#allocation4_spill] sm:$0xff] }
 0x263   : > { %vm7733_vm8 = vcmp.lt.s32.totalorder %v5565_v3, 0  ;;  %v2055_v15 = vmul.f32 %v2054_v20, %v2052_v27  ;;  %v4064_v56 = vadd.s32 4294967294, %v1936_v7  ;;  %v605_v38 = vsel %vm5935_vm0, 0, %v603_v60  ;;  %v7812_v7 = vld [vmem:[#allocation16_spill] sm:$0xff] }
 0x264   : > { %v5980_v18 = vsel %vm1246_vm13, %v7803_v23, %v5636_v33  ;;  %v5987_v31 = vsel %vm7734_vm12, %v7804_v16, %v5717_v57  ;;  %v473_v58 = vadd.s32 536870912, %v472_v10  ;;  %4523 = vcosq.f32 %v708_v1 }
 0x265   : > { %v1744_v54 = vxor.u32 2147483648, %v1743_v26  ;;  %vm7731_vm7 = vcmp.lt.s32.totalorder %v5653_v13, 0  ;;  %v707_v33 = vsel %vm622_vm5, %v706_v50, %v7802_v32  ;;  %4525 = vsinq.f32 %v708_v1 }
 0x266   : > { %v5998_v57 = vsel %vm7735_vm2, %v1536_v6, %v1535_v12  ;;  %v6002_v28 = vsel %vm7732_vm3, %v1848_v45, %v1847_v2  ;;  %vm4065_vm4 = vcmp.lt.s32.totalorder %v4064_v56, 0  ;;  %v474_v0 = vshrl.u32 %v473_v58, 30 }
 0x267   : > { %v2056_v51 = vxor.u32 2147483648, %v2055_v15  ;;  %v1939_v25 = vsel %vm4065_vm4, 0, %v4064_v56  ;;  %v7805_v8 = vand.u32 2147483647, %v4801_v44  ;;  %v609_v47 = vadd.s32 3, %v605_v38 }
 0x268   : > { %v1940_v20 = vsub.s32 32, %v1939_v25  ;;  %v1944_v37 = vsub.s32 4294967266, %v1939_v25  ;;  %v475_v27 = vshll.u32 %v474_v0, 30  ;;  %v709_v12 = vsel %vm5962_vm6, 0, %v707_v33 }
 0x269   : > { %vm6006_vm0 = vcmp.le.f32.partialorder %v7805_v8, 0.7853982  ;;  %v4520_v63 = vpop.eup %4519  ;;  %v6014_v2 = vsel %vm7733_vm8, %v1744_v54, %v1743_v26  ;;  %vm414_vm5 = vcmp.lt.s32.totalorder %v4801_v44, 0  ;;  %v498_v22 = vsub.s32 4, %v474_v0 }
 0x26a   : > { %v810_v46 = vsub.s32 4, %v7808_v43  ;;  %v4522_v59 = vpop.eup %4521  ;;  %v1924_v60 = vadd.s32 %v5857_v34, %v5865_v36  ;;  %v1945_v32 = vadd.s32 127, %v1944_v37  ;;  %v6020_v50 = vsub.s32 %v472_v10, %v475_v27 }
 0x26b   : > { %v7809_v14 = vand.u32 2147483647, %v4806_v49  ;;  %v499_v26 = vsel %vm414_vm5, %v498_v22, %v474_v0  ;;  %v610_v6 = vand.u32 3, %v609_v47  ;;  %v713_v45 = vadd.s32 3, %v709_v12 }
 0x26c   : > { %v6036_v34 = vsel %vm7731_vm7, %v2056_v51, %v2055_v15  ;;  %v1942_v36 = vshrl.u32 %v1924_v60, %v1940_v20  ;;  %v468_v10 = vadd.s32 %v5925_v61, %v5923_v21  ;;  %v478_v16 = vsub.s32 0, %v6020_v50 }
 0x26d   : > { %vm6024_vm6 = vcmp.le.f32.partialorder %v7809_v14, 0.7853982  ;;  %v1946_v56 = vshll.u32 %v1945_v32, 23  ;;  %v613_v58 = vxor.u32 2147483648, %v4522_v59  ;;  %v616_v38 = vxor.u32 2147483648, %v4520_v63  ;;  %v7816_v14 = vld [vmem:[#allocation12_spill] sm:$0xff] }
 0x26e   : > { %v812_v23 = vsel %vm6024_vm6, %v4806_v49, %v7812_v7  ;;  %v811_v54 = vsel %vm726_vm14, %v810_v46, %v7808_v43  ;;  %v4524_v33 = vpop.eup %4523  ;;  %v1941_v0 = vshll.u32 %v5931_v53, %v1939_v25  ;;  %v4007_v8 = vmin.u32 %v478_v16, %v6020_v50 }
 0x26f   : > { %v501_v15 = vsel %vm6006_vm0, 0, %v499_v26  ;;  %vm608_vm4 = vweird.f32 %v4798_v42  ;;  %4527 = vsinq.f32 %v812_v23  ;;  %v4526_v21 = vpop.eup %4525  ;;  %vm611_vm7 = vcmp.lt.s32.totalorder %v610_v6, 2  ;;  %v7818_v42 = vld [vmem:[#allocation3_spill] sm:$0xff] }
 0x270   : > { %vm612_vm3 = vcmp.eq.s32.totalorder %v610_v6, 0  ;;  %v714_v61 = vand.u32 3, %v713_v45  ;;  %4529 = vcosq.f32 %v812_v23  ;;  %v1943_v51 = vor.u32 %v1942_v36, %v1941_v0  ;;  %v7817_v23 = vld [vmem:[#allocation21_spill] sm:$0xff] }
 0x271   : > { %v480_v47 = vclz %v4007_v8  ;;  %vm615_vm8 = vcmp.eq.s32.totalorder %v610_v6, 2  ;;  %v813_v20 = vsel %vm6024_vm6, 0, %v811_v54  ;;  %v1947_v53 = vor.u32 4788187, %v1946_v56 }
 0x272   : > { %v505_v25 = vadd.s32 3, %v501_v15  ;;  %v614_v37 = vsel %vm612_vm3, %v4520_v63, %v613_v58  ;;  %v617_v27 = vsel %vm615_vm8, %v616_v38, %v4522_v59  ;;  %v717_v22 = vxor.u32 2147483648, %v4526_v21 }
 0x273   : > { %v4008_v12 = vadd.s32 4294967294, %v480_v47  ;;  %v720_v43 = vxor.u32 2147483648, %v4524_v33  ;;  %v7813_v46 = vand.u32 2147483647, %v4975_v48  ;;  %vm715_vm12 = vcmp.lt.s32.totalorder %v714_v61, 2 }
 0x274   : > { %vm716_vm2 = vcmp.eq.s32.totalorder %v714_v61, 0  ;;  %v817_v32 = vadd.s32 3, %v813_v20  ;;  %v914_v26 = vsub.s32 4, %v7816_v14  ;;  %v1950_v1 = vcvt.s32.f32 %v1943_v51 }
 0x275   : > { %vm6053_vm14 = vcmp.le.f32.partialorder %v7813_v46, 0.7853982  ;;  %vm4009_vm6 = vcmp.lt.s32.totalorder %v4008_v12, 0  ;;  %v618_v45 = vsel %vm611_vm7, %v614_v37, %v617_v27  ;;  %vm719_vm3 = vcmp.eq.s32.totalorder %v714_v61, 2  ;;  %v7822_v37 = vld [vmem:[#allocation9_spill] sm:$0xff] }
 0x276   : > { %v1948_v63 = vand.u32 2147483647, %v1947_v53  ;;  %v483_v59 = vsel %vm4009_vm6, 0, %v4008_v12  ;;  %v6059_v7 = vand.u32 3, %v505_v25  ;;  %v916_v36 = vsel %vm6053_vm14, %v4975_v48, %v7817_v23 }
 0x277   : > { %v484_v16 = vsub.s32 32, %v483_v59  ;;  %v488_v56 = vsub.s32 4294967266, %v483_v59  ;;  %v718_v58 = vsel %vm716_vm2, %v4524_v33, %v717_v22  ;;  %v721_v38 = vsel %vm719_vm3, %v720_v43, %v4526_v21 }
 0x278   : > { %v6067_v54 = vsel %vm608_vm4, nan, %v618_v45  ;;  %v818_v6 = vand.u32 3, %v817_v32  ;;  %v915_v0 = vsel %vm830_vm1, %v914_v26, %v7816_v14  ;;  %4531 = vcosq.f32 %v916_v36 }
 0x279   : > { %v4528_v8 = vpop.eup %4527  ;;  %v485_v15 = vshll.u32 %v6020_v50, %v483_v59  ;;  %v486_v51 = vshrl.u32 %v468_v10, %v484_v16  ;;  %v489_v47 = vadd.s32 127, %v488_v56  ;;  %4533 = vsinq.f32 %v916_v36  ;;  %v7823_v10 = vld [vmem:[#allocation18_spill] sm:$0xff]  ;;  %v7828_v56 = vld [vmem:[#allocation24_spill] sm:$0xff] }
 0x27a   : > { %v4530_v20 = vpop.eup %4529  ;;  %v6073_v53 = vmul.f32 %v1950_v1, %v1948_v63  ;;  %v722_v33 = vsel %vm715_vm12, %v718_v58, %v721_v38  ;;  %v7819_v21 = vand.u32 2147483647, %v7818_v42  ;;  %v1018_v27 = vsub.s32 4, %v7822_v37  ;;  %v7827_v63 = vld [vmem:[#allocation17_spill] sm:$0xff] }
 0x27b   : > { %v487_v12 = vor.u32 %v486_v51, %v485_v15  ;;  %v490_v22 = vshll.u32 %v489_v47, 23  ;;  %v917_v50 = vsel %vm6053_vm14, 0, %v915_v0  ;;  %vm819_vm1 = vcmp.lt.s32.totalorder %v818_v6, 2  ;;  %v7829_v0 = vld [vmem:[#allocation8_spill] sm:$0xff]  ;;  %v7833_v47 = vld [vmem:[#allocation15_spill] sm:$0xff] }
 0x27c   : > { %vm6078_vm2 = vcmp.le.f32.partialorder %v7819_v21, 0.7853982  ;;  %vm820_vm12 = vcmp.eq.s32.totalorder %v818_v6, 0  ;;  %v821_v61 = vxor.u32 2147483648, %v4528_v8  ;;  %vm823_vm8 = vcmp.eq.s32.totalorder %v818_v6, 2 }
 0x27d   : > { %v1020_v43 = vsel %vm6078_vm2, %v7818_v42, %v7823_v10  ;;  %v1019_v46 = vsel %vm934_vm10, %v1018_v27, %v7822_v37  ;;  %v491_v32 = vor.u32 4788187, %v490_v22  ;;  %v824_v14 = vxor.u32 2147483648, %v4530_v20  ;;  %v7834_v27 = vld [vmem:[#allocation23_spill] sm:$0xff] }
 0x27e   : > { %v1021_v26 = vsel %vm6078_vm2, 0, %v1019_v46  ;;  %4535 = vcosq.f32 %v1020_v43  ;;  %vm712_vm7 = vweird.f32 %v4813_v55  ;;  %v921_v60 = vadd.s32 3, %v917_v50 }
 0x27f   : > { %4537 = vsinq.f32 %v1020_v43  ;;  %v7824_v1 = vand.u32 2147483647, %v5143_v29  ;;  %v1122_v59 = vsub.s32 4, %v7827_v63  ;;  %vm1870_vm10 = vcmp.lt.s32.totalorder %v5711_v11, 0 }
 0x280   : > { %v492_v23 = vand.u32 2147483647, %v491_v32  ;;  %v494_v36 = vcvt.s32.f32 %v487_v12  ;;  %vm816_vm14 = vweird.f32 %v4806_v49  ;;  %v1025_v16 = vadd.s32 3, %v1021_v26  ;;  %v7838_v49 = vld [vmem:[#allocation20_spill] sm:$0xff] }
 0x281   : > { %vm6097_vm4 = vcmp.le.f32.partialorder %v7824_v1, 0.7853982  ;;  %v1123_v38 = vsel %vm1038_vm15, %v1122_v59, %v7827_v63  ;;  %v7830_v15 = vand.u32 2147483647, %v7829_v0  ;;  %v1226_v21 = vsub.s32 4, %v7833_v47 }
 0x282   : > { %v1124_v58 = vsel %vm6097_vm4, %v5143_v29, %v7828_v56  ;;  %v495_v25 = vmul.f32 %v494_v36, %v492_v23  ;;  %v1125_v37 = vsel %vm6097_vm4, 0, %v1123_v38  ;;  %v4532_v22 = vpop.eup %4531  ;;  %v822_v50 = vsel %vm820_vm12, %v4530_v20, %v821_v61 }
 0x283   : > { %4539 = vcosq.f32 %v1124_v58  ;;  %vm6113_vm6 = vcmp.le.f32.partialorder %v7830_v15, 0.7853982  ;;  %v825_v10 = vsel %vm823_vm8, %v824_v14, %v4528_v8  ;;  %v922_v43 = vand.u32 3, %v921_v60  ;;  %v4534_v32 = vpop.eup %4533 }
 0x284   : > { %4541 = vsinq.f32 %v1124_v58  ;;  %v1228_v12 = vsel %vm6113_vm6, %v7829_v0, %v7834_v27  ;;  %v1129_v46 = vadd.s32 3, %v1125_v37  ;;  %v496_v26 = vxor.u32 2147483648, %v495_v25 }
 0x285   : > { %v928_v1 = vxor.u32 2147483648, %v4532_v22  ;;  %v1227_v45 = vsel %vm1142_vm11, %v1226_v21, %v7833_v47  ;;  %4543 = vcosq.f32 %v1228_v12  ;;  %v1952_v63 = vxor.u32 2147483648, %v6073_v53 }
 0x286   : > { %v925_v59 = vxor.u32 2147483648, %v4534_v32  ;;  %v1229_v23 = vsel %vm6113_vm6, 0, %v1227_v45  ;;  %4545 = vsinq.f32 %v1228_v12  ;;  %v497_v8 = vsel %vm414_vm5, %v496_v26, %v495_v25 }
 0x287   : > { %v826_v20 = vsel %vm819_vm1, %v822_v50, %v825_v10  ;;  %v6135_v61 = vand.u32 3, %v1025_v16  ;;  %v1233_v14 = vadd.s32 3, %v1229_v23  ;;  %v500_v60 = vsel %vm6006_vm0, %v4801_v44, %v497_v8  ;;  %v7844_v8 = vld [vmem:[#allocation26_spill] sm:$0xff] }
 0x288   : > { %vm924_vm11 = vcmp.eq.s32.totalorder %v922_v43, 0  ;;  %vm927_vm15 = vcmp.eq.s32.totalorder %v922_v43, 2  ;;  %v6140_v36 = vand.u32 3, %v1129_v46  ;;  %v4536_v56 = vpop.eup %4535  ;;  %4547 = vcosq.f32 %v500_v60  ;;  %v7839_v46 = vld [vmem:[#allocation13_spill] sm:$0xff] }
 0x289   : > { %v6144_v58 = vsel %vm712_vm7, nan, %v722_v33  ;;  %v926_v38 = vsel %vm924_vm11, %v4532_v22, %v925_v59  ;;  %v929_v6 = vsel %vm927_vm15, %v928_v1, %v4534_v32  ;;  %v4538_v15 = vpop.eup %4537  ;;  %v6149_v16 = vsel %vm1870_vm10, %v1952_v63, %v6073_v53  ;;  %v7843_v1 = vld [vmem:[#allocation19_spill] sm:$0xff] }
 0x28a   : > { %4549 = vsinq.f32 %v500_v60  ;;  %v6153_v5 = vsel %vm816_vm14, nan, %v826_v20  ;;  %vm923_vm0 = vcmp.lt.s32.totalorder %v922_v43, 2  ;;  %vm920_vm5 = vweird.f32 %v4975_v48 }
 0x28b   : > { %vm1028_vm3 = vcmp.eq.s32.totalorder %v6135_v61, 0  ;;  %vm1031_vm2 = vcmp.eq.s32.totalorder %v6135_v61, 2  ;;  %v1234_v55 = vand.u32 3, %v1233_v14  ;;  %v7835_v33 = vand.u32 2147483647, %v5229_v35 }
 0x28c   : > { %v930_v47 = vsel %vm923_vm0, %v926_v38, %v929_v6  ;;  %vm1027_vm12 = vcmp.lt.s32.totalorder %v6135_v61, 2  ;;  %vm1132_vm8 = vcmp.eq.s32.totalorder %v6140_v36, 0  ;;  %v1330_v21 = vsub.s32 4, %v7838_v49 }
 0x28d   : > { %vm6160_vm1 = vcmp.le.f32.partialorder %v7835_v33, 0.7853982  ;;  %v4540_v53 = vpop.eup %4539  ;;  %vm511_vm7 = vcmp.eq.s32.totalorder %v6059_v7, 2  ;;  %v1029_v27 = vxor.u32 2147483648, %v4538_v15  ;;  %v1032_v12 = vxor.u32 2147483648, %v4536_v56 }
 0x28e   : > { %v1332_v25 = vsel %vm6160_vm1, %v5229_v35, %v5980_v18  ;;  %v4542_v37 = vpop.eup %4541  ;;  %vm1135_vm4 = vcmp.eq.s32.totalorder %v6140_v36, 2  ;;  %vm508_vm14 = vcmp.eq.s32.totalorder %v6059_v7, 0  ;;  %v1136_v50 = vxor.u32 2147483648, %v4540_v53 }
 0x28f   : > { %4551 = vcosq.f32 %v1332_v25  ;;  %v1133_v22 = vxor.u32 2147483648, %v4542_v37  ;;  %v1331_v10 = vsel %vm1246_vm13, %v1330_v21, %v7838_v49  ;;  %v4544_v43 = vpop.eup %4543  ;;  %vm507_vm6 = vcmp.lt.s32.totalorder %v6059_v7, 2 }
 0x290   : > { %4553 = vsinq.f32 %v1332_v25  ;;  %vm1236_vm11 = vcmp.eq.s32.totalorder %v1234_v55, 0  ;;  %v1333_v18 = vsel %vm6160_vm1, 0, %v1331_v10  ;;  %v7840_v32 = vand.u32 2147483647, %v7839_v46  ;;  %v4546_v63 = vpop.eup %4545 }
 0x291   : > { %v1434_v45 = vsub.s32 4, %v7843_v1  ;;  %vm504_vm0 = vweird.f32 %v4801_v44  ;;  %vm1239_vm13 = vcmp.eq.s32.totalorder %v1234_v55, 2  ;;  %v1240_v59 = vxor.u32 2147483648, %v4544_v43 }
 0x292   : > { %vm6182_vm15 = vcmp.le.f32.partialorder %v7840_v32, 0.7853982  ;;  %v1337_v23 = vadd.s32 3, %v1333_v18  ;;  %v1033_v14 = vsel %vm1031_vm2, %v1032_v12, %v4538_v15  ;;  %v1237_v60 = vxor.u32 2147483648, %v4546_v63  ;;  %v4548_v21 = vpop.eup %4547  ;;  %v7845_v32 = vld [vmem:[#allocation25_spill] sm:$0xff] }
 0x293   : > { %v1436_v20 = vsel %vm6182_vm15, %v7839_v46, %v7844_v8  ;;  %v1435_v38 = vsel %vm1350_vm9, %v1434_v45, %v7843_v1  ;;  %v1030_v6 = vsel %vm1028_vm3, %v4536_v56, %v1029_v27  ;;  %v1134_v33 = vsel %vm1132_vm8, %v4540_v53, %v1133_v22 }
 0x294   : > { %4555 = vcosq.f32 %v1436_v20  ;;  %v1137_v51 = vsel %vm1135_vm4, %v1136_v50, %v4542_v37  ;;  %v1241_v49 = vsel %vm1239_vm13, %v1240_v59, %v4546_v63  ;;  %vm1024_vm1 = vweird.f32 %v7818_v42  ;;  %v4550_v56 = vpop.eup %4549 }
 0x295   : > { %vm1128_vm2 = vweird.f32 %v5143_v29  ;;  %v1238_v15 = vsel %vm1236_vm11, %v4544_v43, %v1237_v60  ;;  %v1338_v25 = vand.u32 3, %v1337_v23  ;;  %v1437_v12 = vsel %vm6182_vm15, 0, %v1435_v38 }
 0x296   : > { %4557 = vsinq.f32 %v1436_v20  ;;  %v512_v27 = vxor.u32 2147483648, %v4548_v21  ;;  %v931_v53 = vsel %vm920_vm5, nan, %v930_v47  ;;  %vm1131_vm9 = vcmp.lt.s32.totalorder %v6140_v36, 2 }
 0x297   : > { %vm1232_vm3 = vweird.f32 %v7829_v0  ;;  %v509_v37 = vxor.u32 2147483648, %v4550_v56  ;;  %v1034_v22 = vsel %vm1027_vm12, %v1030_v6, %v1033_v14  ;;  %v1138_v50 = vsel %vm1131_vm9, %v1134_v33, %v1137_v51  ;;  %v7853_v33 = vld [vmem:[#allocation22_spill] sm:$0xff] }
 0x298   : > { %vm1235_vm8 = vcmp.lt.s32.totalorder %v1234_v55, 2  ;;  %v513_v10 = vsel %vm511_vm7, %v512_v27, %v4550_v56  ;;  %v1441_v18 = vadd.s32 3, %v1437_v12  ;;  %v1538_v26 = vsub.s32 4, %v7845_v32 }
 0x299   : > { %v1242_v43 = vsel %vm1235_vm8, %v1238_v15, %v1241_v49  ;;  %v4552_v1 = vpop.eup %4551  ;;  %v510_v48 = vsel %vm508_vm14, %v4548_v21, %v509_v37  ;;  %vm1340_vm5 = vcmp.eq.s32.totalorder %v1338_v25, 0  ;;  %vm1343_vm4 = vcmp.eq.s32.totalorder %v1338_v25, 2  ;;  %v7858_v37 = vld [vmem:[#allocation28_spill] sm:$0xff] }
 0x29a   : > { %v7846_v36 = vand.u32 2147483647, %v5360_v62  ;;  %v4554_v55 = vpop.eup %4553  ;;  %v514_v47 = vsel %vm507_vm6, %v510_v48, %v513_v10  ;;  %v1344_v45 = vxor.u32 2147483648, %v4552_v1  ;;  %vm7849_vm12 = vcmp.lt.s32.totalorder %v5360_v62, 0 }
 0x29b   : > { %v1539_v63 = vsel %vm7849_vm12, %v1538_v26, %v7845_v32  ;;  %v515_v23 = vsel %vm504_vm0, nan, %v514_v47  ;;  %vm1336_vm7 = vweird.f32 %v5229_v35  ;;  %v1341_v8 = vxor.u32 2147483648, %v4554_v55 }
 0x29c   : > { %vm6221_vm11 = vcmp.le.f32.partialorder %v7846_v36, 0.7853982  ;;  %4289 = vmatprep.mubr.f32.mxu1 %v515_v23  ;;  %v1345_v20 = vsel %vm1343_vm4, %v1344_v45, %v4554_v55  ;;  %v1442_v14 = vand.u32 3, %v1441_v18  ;;  %v7850_v60 = vand.u32 2147483647, %v5356_v9 }
 0x29d   : > { %v1540_v59 = vsel %vm6221_vm11, %v5360_v62, %v5998_v57  ;;  %v1541_v7 = vsel %vm6221_vm11, 0, %v1539_v63  ;;  %4290 = vmatmul.mubr.f32.vlgmr.msra.gmra.mrb[0].mxu1 %v6067_v54  ;;  %v1342_v44 = vsel %vm1340_vm5, %v4552_v1, %v1341_v8  ;;  %v1642_v51 = vsub.s32 4, %v7853_v33  ;;  %v7863_v1 = vld [vmem:[#allocation27_spill] sm:$0xff] }
 0x29e   : > { %4559 = vcosq.f32 %v1540_v59  ;;  %vm6241_vm14 = vcmp.le.f32.partialorder %v7850_v60, 0.7853982  ;;  %v4556_v57 = vpop.eup %4555  ;;  %v1545_v6 = vadd.s32 3, %v1541_v7  ;;  %4292 = vmatprep.mubr.f32.mxu1 %v6144_v58  ;;  %v1035_v21 = vsel %vm1024_vm1, nan, %v1034_v22 }
 0x29f   : > { %4561 = vsinq.f32 %v1540_v59  ;;  %v1644_v49 = vsel %vm6241_vm14, %v5356_v9, %v5987_v31  ;;  %v1139_v15 = vsel %vm1128_vm2, nan, %v1138_v50  ;;  %vm1339_vm6 = vcmp.lt.s32.totalorder %v1338_v25, 2 }
 0x2a0   : > { %4563 = vcosq.f32 %v1644_v49  ;;  %v4558_v54 = vpop.eup %4557  ;;  %v1243_v12 = vsel %vm1232_vm3, nan, %v1242_v43  ;;  %v1448_v56 = vxor.u32 2147483648, %v4556_v57  ;;  %vm7854_vm15 = vcmp.lt.s32.totalorder %v5356_v9, 0 }
 0x2a1   : > { %v1643_v27 = vsel %vm7854_vm15, %v1642_v51, %v7853_v33  ;;  %4565 = vsinq.f32 %v1644_v49  ;;  %v1346_v31 = vsel %vm1339_vm6, %v1342_v44, %v1345_v20  ;;  %vm1443_vm0 = vcmp.lt.s32.totalorder %v1442_v14, 2  ;;  %4293 = vmatmul.mubr.f32.gmra.mrb[2].mxu1 %v6153_v5 }
 0x2a2   : > { %v1445_v58 = vxor.u32 2147483648, %v4558_v54  ;;  %v7855_v42 = vand.u32 2147483647, %v5565_v3  ;;  %v1546_v25 = vand.u32 3, %v1545_v6  ;;  %v1645_v0 = vsel %vm6241_vm14, 0, %v1643_v27  ;;  %4295 = vmatprep.mubr.f32.mxu1 %v931_v53 }
 0x2a3   : > { %v1746_v22 = vsub.s32 4, %v7858_v37  ;;  %vm1444_vm1 = vcmp.eq.s32.totalorder %v1442_v14, 0  ;;  %vm1447_vm2 = vcmp.eq.s32.totalorder %v1442_v14, 2  ;;  %vm1544_vm9 = vweird.f32 %v5360_v62 }
 0x2a4   : > { %vm6264_vm13 = vcmp.le.f32.partialorder %v7855_v42, 0.7853982  ;;  %v1649_v10 = vadd.s32 3, %v1645_v0  ;;  %vm1440_vm3 = vweird.f32 %v7839_v46  ;;  %v1446_v5 = vsel %vm1444_vm1, %v4556_v57, %v1445_v58 }
 0x2a5   : > { %v1748_v50 = vsel %vm6264_vm13, %v5565_v3, %v6014_v2  ;;  %v1449_v43 = vsel %vm1447_vm2, %v1448_v56, %v4558_v54  ;;  %vm7859_vm8 = vcmp.lt.s32.totalorder %v5565_v3, 0  ;;  %v1347_v32 = vsel %vm1336_vm7, nan, %v1346_v31  ;;  %4296 = vmatmul.mubr.f32.gmra.mrb[4].mxu1 %v1035_v21 }
 0x2a6   : > { %4567 = vcosq.f32 %v1748_v50  ;;  %v1747_v18 = vsel %vm7859_vm8, %v1746_v22, %v7858_v37  ;;  %v7860_v53 = vand.u32 2147483647, %v5507_v40  ;;  %v1850_v48 = vsub.s32 4, %v7863_v1  ;;  %4298 = vmatprep.mubr.f32.mxu1 %v1139_v15 }
 0x2a7   : > { %4569 = vsinq.f32 %v1748_v50  ;;  %v1749_v2 = vsel %vm6264_vm13, 0, %v1747_v18  ;;  %vm1547_vm4 = vcmp.lt.s32.totalorder %v1546_v25, 2  ;;  %vm1548_vm11 = vcmp.eq.s32.totalorder %v1546_v25, 0 }
 0x2a8   : > { %vm6287_vm5 = vcmp.le.f32.partialorder %v7860_v53, 0.7853982  ;;  %v4560_v36 = vpop.eup %4559  ;;  %v1650_v61 = vand.u32 3, %v1649_v10  ;;  %v1450_v47 = vsel %vm1443_vm0, %v1446_v5, %v1449_v43  ;;  %vm1551_vm12 = vcmp.eq.s32.totalorder %v1546_v25, 2 }
 0x2a9   : > { %v1852_v35 = vsel %vm6287_vm5, %v5507_v40, %v6002_v28  ;;  %v4562_v55 = vpop.eup %4561  ;;  %v1552_v45 = vxor.u32 2147483648, %v4560_v36  ;;  %vm1648_vm7 = vweird.f32 %v5356_v9  ;;  %v1753_v63 = vadd.s32 3, %v1749_v2  ;;  %4299 = vmatmul.mubr.f32.gmra.mrb[6].mxu1 %v1243_v12 }
 0x2aa   : > { %v1549_v59 = vxor.u32 2147483648, %v4562_v55  ;;  %vm7864_vm14 = vcmp.lt.s32.totalorder %v5507_v40, 0  ;;  %4571 = vcosq.f32 %v1852_v35  ;;  %v7865_v8 = vand.u32 2147483647, %v5711_v11  ;;  %v4564_v28 = vpop.eup %4563  ;;  %4301 = vmatprep.mubr.f32.mxu1 %v1347_v32 }
 0x2ab   : > { %v1851_v23 = vsel %vm7864_vm14, %v1850_v48, %v7863_v1  ;;  %v1553_v20 = vsel %vm1551_vm12, %v1552_v45, %v4562_v55  ;;  %4573 = vsinq.f32 %v1852_v35  ;;  %v1954_v60 = vsub.s32 4, %v5909_v41  ;;  %v4566_v38 = vpop.eup %4565 }
 0x2ac   : > { %vm6303_vm6 = vcmp.le.f32.partialorder %v7865_v8, 0.7853982  ;;  %v1853_v14 = vsel %vm6287_vm5, 0, %v1851_v23  ;;  %v1550_v57 = vsel %vm1548_vm11, %v4560_v36, %v1549_v59  ;;  %vm1652_vm15 = vcmp.eq.s32.totalorder %v1650_v61, 0 }
 0x2ad   : > { %vm1655_vm0 = vcmp.eq.s32.totalorder %v1650_v61, 2  ;;  %v1656_v44 = vxor.u32 2147483648, %v4564_v28  ;;  %v1554_v6 = vsel %vm1547_vm4, %v1550_v57, %v1553_v20  ;;  %v1653_v33 = vxor.u32 2147483648, %v4566_v38 }
 0x2ae   : > { %v1754_v51 = vand.u32 3, %v1753_v63  ;;  %v1857_v49 = vadd.s32 3, %v1853_v14  ;;  %v1555_v21 = vsel %vm1544_vm9, nan, %v1554_v6  ;;  %v1955_v54 = vsel %vm1870_vm10, %v1954_v60, %v5909_v41 }
 0x2af   : > { %v1657_v15 = vsel %vm1655_vm0, %v1656_v44, %v4566_v38  ;;  %v1956_v12 = vsel %vm6303_vm6, %v5711_v11, %v6149_v16  ;;  %v1451_v27 = vsel %vm1440_vm3, nan, %v1450_v47  ;;  %vm1651_vm13 = vcmp.lt.s32.totalorder %v1650_v61, 2 }
 0x2b0   : > { %v4568_v56 = vpop.eup %4567  ;;  %v1654_v31 = vsel %vm1652_vm15, %v4564_v28, %v1653_v33  ;;  %4575 = vcosq.f32 %v1956_v12  ;;  %4302 = vmatmul.mubr.f32.gmra.mrb[8].mxu1 %v1451_v27  ;;  %v1957_v29 = vsel %vm6303_vm6, 0, %v1955_v54  ;;  %vm1755_vm10 = vcmp.lt.s32.totalorder %v1754_v51, 2 }
 0x2b1   : > { %v4570_v58 = vpop.eup %4569  ;;  %v1658_v62 = vsel %vm1651_vm13, %v1654_v31, %v1657_v15  ;;  %v1760_v42 = vxor.u32 2147483648, %v4568_v56  ;;  %4577 = vsinq.f32 %v1956_v12  ;;  %4304 = vmatprep.mubr.f32.mxu1 %v1555_v21  ;;  %vm1756_vm1 = vcmp.eq.s32.totalorder %v1754_v51, 0 }
 0x2b2   : > { %v1757_v41 = vxor.u32 2147483648, %v4570_v58  ;;  %vm1759_vm2 = vcmp.eq.s32.totalorder %v1754_v51, 2  ;;  %v1659_v16 = vsel %vm1648_vm7, nan, %v1658_v62  ;;  %v1858_v25 = vand.u32 3, %v1857_v49 }
 0x2b3   : > { %v1761_v46 = vsel %vm1759_vm2, %v1760_v42, %v4570_v58  ;;  %v7868_v0 = vand.u32 2147483647, %v5653_v13  ;;  %v1961_v50 = vadd.s32 3, %v1957_v29  ;;  %v2058_v10 = vsub.s32 4, %v5834_v39 }
 0x2b4   : > { %v1758_v22 = vsel %vm1756_vm1, %v4568_v56, %v1757_v41  ;;  %v4572_v43 = vpop.eup %4571  ;;  %4305 = vmatmul.mubr.f32.gmra.mrb[10].mxu1 %v1659_v16  ;;  %vm1752_vm3 = vweird.f32 %v5565_v3  ;;  %vm7871_vm8 = vcmp.lt.s32.totalorder %v5653_v13, 0  ;;  %vm1863_vm5 = vcmp.eq.s32.totalorder %v1858_v25, 2 }
 0x2b5   : > { %vm6329_vm9 = vcmp.le.f32.partialorder %v7868_v0, 0.7853982  ;;  %v1762_v9 = vsel %vm1755_vm10, %v1758_v22, %v1761_v46  ;;  %v4574_v18 = vpop.eup %4573  ;;  %v1864_v2 = vxor.u32 2147483648, %v4572_v43  ;;  %v2059_v53 = vsel %vm7871_vm8, %v2058_v10, %v5834_v39 }
 0x2b6   : > { %v2060_v5 = vsel %vm6329_vm9, %v5653_v13, %v6036_v34  ;;  %v1763_v32 = vsel %vm1752_vm3, nan, %v1762_v9  ;;  %v1861_v26 = vxor.u32 2147483648, %v4574_v18  ;;  %vm1860_vm4 = vcmp.eq.s32.totalorder %v1858_v25, 0 }
 0x2b7   : > { %4579 = vcosq.f32 %v2060_v5  ;;  %4307 = vmatprep.mubr.f32.mxu1 %v1763_v32  ;;  %v1865_v1 = vsel %vm1863_vm5, %v1864_v2, %v4574_v18  ;;  %v1962_v34 = vand.u32 3, %v1961_v50  ;;  %v2061_v48 = vsel %vm6329_vm9, 0, %v2059_v53 }
 0x2b8   : > { %4581 = vsinq.f32 %v2060_v5  ;;  %vm1859_vm11 = vcmp.lt.s32.totalorder %v1858_v25, 2  ;;  %v1862_v3 = vsel %vm1860_vm4, %v4572_v43, %v1861_v26  ;;  %v2065_v36 = vadd.s32 3, %v2061_v48 }
 0x2b9   : > { %vm1856_vm12 = vweird.f32 %v5507_v40  ;;  %v1866_v35 = vsel %vm1859_vm11, %v1862_v3, %v1865_v1  ;;  %vm1967_vm7 = vcmp.eq.s32.totalorder %v1962_v34, 2  ;;  %vm1964_vm14 = vcmp.eq.s32.totalorder %v1962_v34, 0 }
 0x2ba   : > { %v4576_v61 = vpop.eup %4575  ;;  %v1867_v47 = vsel %vm1856_vm12, nan, %v1866_v35  ;;  %v2066_v59 = vand.u32 3, %v2065_v36  ;;  %vm1963_vm6 = vcmp.lt.s32.totalorder %v1962_v34, 2  ;;  %vm1960_vm15 = vweird.f32 %v5711_v11  ;;  %v6350_v11 = vld [vmem:[%s7672_s4] ss:$0 sm:$0xff] }
 0x2bb   : > { %v4578_v55 = vpop.eup %4577  ;;  %v1968_v39 = vxor.u32 2147483648, %v4576_v61  ;;  %4308 = vmatmul.mubr.f32.gmra.mrb[12].mxu1 %v1867_v47  ;;  %vm2064_vm1 = vweird.f32 %v5653_v13 }
 0x2bc   : > { %v1965_v45 = vxor.u32 2147483648, %v4578_v55  ;;  %vm2071_vm0 = vcmp.eq.s32.totalorder %v2066_v59, 2  ;;  %vm2068_vm13 = vcmp.eq.s32.totalorder %v2066_v59, 0  ;;  %vm2067_vm10 = vcmp.lt.s32.totalorder %v2066_v59, 2 }
 0x2bd   : > { %v1969_v63 = vsel %vm1967_vm7, %v1968_v39, %v4578_v55 }
 0x2be   : > { %v1966_v23 = vsel %vm1964_vm14, %v4576_v61, %v1965_v45 }
 0x2bf   : > { %v1970_v7 = vsel %vm1963_vm6, %v1966_v23, %v1969_v63 }
 0x2c0   : > { %v1971_v20 = vsel %vm1960_vm15, nan, %v1970_v7 }
 0x2c1   : > { %v4580_v8 = vpop.eup %4579  ;;  %4310 = vmatprep.mubr.f32.mxu1 %v1971_v20 }
 0x2c2   : > { %v4582_v28 = vpop.eup %4581  ;;  %v2072_v14 = vxor.u32 2147483648, %v4580_v8 }
 0x2c3   : > { %v2069_v40 = vxor.u32 2147483648, %v4582_v28 }
 0x2c4   : > { %v2073_v60 = vsel %vm2071_vm0, %v2072_v14, %v4582_v28 }
 0x2c5   : > { %v2070_v38 = vsel %vm2068_vm13, %v4580_v8, %v2069_v40 }
 0x2c6   : > { %v2074_v57 = vsel %vm2067_vm10, %v2070_v38, %v2073_v60 }
 0x2c7   : > { %v2075_v44 = vsel %vm2064_vm1, nan, %v2074_v57 }
 0x2c8   : > { %4311 = vmatmul.mubr.f32.gmra.mrb[14].mxu1 %v2075_v44 }
 0x370   : > { %v4291_v6 = vpop.f32.mrb[0].mxu1 }
 0x371   : > { %v6353_v33 = vadd.f32 %v4291_v6, %v6350_v11  ;;  %v2165_v51 = vpop.f32.mrb[1].mxu1 }
 0x372   : > { %v6356_v49 = vadd.f32 %v6350_v11, %v2165_v51 }
 0x373   : > { %v2348_v21 = vand.u32 2147483647, %v6353_v33  ;;  %v2351_v13 = vand.u32 2139095040, %v6353_v33  ;;  %vm2350_vm13 = vcmp.lt.s32.totalorder %v6353_v33, 0 }
 0x374   : > { %v2244_v15 = vand.u32 2147483647, %v6356_v49  ;;  %v2247_v54 = vand.u32 2139095040, %v6356_v49  ;;  %v4294_v12 = vpop.f32.mrb[2].mxu1  ;;  %vm2246_vm1 = vcmp.lt.s32.totalorder %v6356_v49, 0 }
 0x375   : > { %v2352_v56 = vshrl.u32 %v2351_v13, 23  ;;  %v2355_v27 = vand.u32 8388607, %v2348_v21  ;;  %v6365_v31 = vadd.f32 %v4294_v12, %v6350_v11  ;;  %v2175_v58 = vpop.f32.mrb[3].mxu1  ;;  %vm6489_vm10 = vcmp.le.f32.partialorder %v2348_v21, 0.7853982 }
 0x376   : > { %v2248_v62 = vshrl.u32 %v2247_v54, 23  ;;  %v2251_v42 = vand.u32 8388607, %v2244_v15  ;;  %v6378_v26 = vadd.f32 %v6350_v11, %v2175_v58 }
 0x377   : > { %v4075_v29 = vadd.s32 4294967169, %v2352_v56  ;;  %v2559_v16 = vand.u32 2139095040, %v6365_v31  ;;  %v2356_v25 = vor.u32 8388608, %v2355_v27  ;;  %v2556_v50 = vand.u32 2147483647, %v6365_v31 }
 0x378   : > { %v4071_v41 = vadd.s32 4294967169, %v2248_v62  ;;  %v6370_v46 = vpop.f32.mrb[4].mxu1  ;;  %v2252_v37 = vor.u32 8388608, %v2251_v42 }
 0x379   : > { %v2358_v0 = vadd.s32 1, %v4075_v29  ;;  %v2560_v10 = vshrl.u32 %v2559_v16, 23  ;;  %v6373_v5 = vpop.f32.mrb[5].mxu1  ;;  %v6380_v1 = vshll.u32 %v2356_v25, 8  ;;  %v6388_v3 = vand.u32 8388607, %v2556_v50 }
 0x37a   : > { %v2254_v22 = vadd.s32 1, %v4071_v41  ;;  %v6384_v48 = vshll.u32 %v2252_v37, 8 }
 0x37b   : > { %vm2359_vm2 = vcmp.gt.s32.totalorder %v2358_v0, 0  ;;  %v4083_v9 = vadd.s32 4294967169, %v2560_v10 }
 0x37c   : > { %v2360_v43 = vsel %vm2359_vm2, %v2358_v0, 0  ;;  %vm2255_vm9 = vcmp.gt.s32.totalorder %v2254_v22, 0  ;;  %v6375_v18 = vpop.f32.mrb[6].mxu1 }
 0x37d   : > { %v2361_v32 = vshrl.u32 %v2360_v43, 5  ;;  %v2362_v2 = vand.u32 31, %v2360_v43  ;;  %v2256_v53 = vsel %vm2255_vm9, %v2254_v22, 0  ;;  %v6390_v36 = vpop.f32.mrb[7].mxu1  ;;  %v6393_v47 = vadd.s32 1, %v4083_v9 }
 0x37e   : > { %v6382_v34 = vshrl.u32 %v2256_v53, 5  ;;  %v2258_v55 = vand.u32 31, %v2256_v53 }
 0x37f   : > { %v2363_v61 = vsub.s32 32, %v2362_v2  ;;  %v2365_v35 = vshll.u32 %v7756_v4, %v2362_v2  ;;  %v2368_v39 = vshll.u32 %v7752_v52, %v2362_v2  ;;  %v2371_v45 = vshll.u32 %v7753_v24, %v2362_v2 }
 0x380   : > { %v2374_v63 = vshll.u32 %v7755_v30, %v2362_v2  ;;  %v2377_v59 = vshll.u32 %v7743_v19, %v2362_v2  ;;  %vm2380_vm3 = vcmp.lt.s32.totalorder %v2361_v32, 1  ;;  %vm2381_vm8 = vcmp.lt.s32.totalorder %v2361_v32, 2 }
 0x381   : > { %v2366_v23 = vshrl.u32 %v7752_v52, %v2363_v61  ;;  %v2369_v8 = vshrl.u32 %v7753_v24, %v2363_v61  ;;  %v2372_v7 = vshrl.u32 %v7755_v30, %v2363_v61  ;;  %v2364_v28 = vshrl.u32 %v7756_v4, %v2363_v61 }
 0x382   : > { %v2375_v20 = vshrl.u32 %v7743_v19, %v2363_v61  ;;  %v2378_v14 = vshrl.u32 %v7745_v17, %v2363_v61  ;;  %v2259_v57 = vsub.s32 32, %v2258_v55  ;;  %vm2382_vm5 = vcmp.lt.s32.totalorder %v2361_v32, 3 }
 0x383   : > { %v2367_v40 = vor.u32 %v2366_v23, %v2365_v35  ;;  %v2370_v60 = vor.u32 %v2369_v8, %v2368_v39  ;;  %v2373_v38 = vor.u32 %v2372_v7, %v2371_v45  ;;  %vm2383_vm4 = vcmp.lt.s32.totalorder %v2361_v32, 4 }
 0x384   : > { %v2376_v44 = vor.u32 %v2375_v20, %v2374_v63  ;;  %v2379_v6 = vor.u32 %v2378_v14, %v2377_v59  ;;  %v2261_v62 = vshll.u32 %v7756_v4, %v2258_v55  ;;  %v2262_v41 = vshrl.u32 %v7752_v52, %v2259_v57 }
 0x385   : > { %v2384_v51 = vsel %vm2380_vm3, %v2364_v28, %v2367_v40  ;;  %v2385_v13 = vsel %vm2383_vm4, %v2373_v38, 2102212464  ;;  %v2388_v54 = vsel %vm2380_vm3, %v2367_v40, %v2370_v60  ;;  %v2392_v12 = vsel %vm2380_vm3, %v2370_v60, %v2373_v38 }
 0x386   : > { %v2386_v56 = vsel %vm2382_vm5, %v2370_v60, %v2385_v13  ;;  %v2389_v27 = vsel %vm2383_vm4, %v2376_v44, 920167782  ;;  %v2393_v58 = vsel %vm2383_vm4, %v2379_v6, 1326507024  ;;  %v2264_v16 = vshll.u32 %v7752_v52, %v2258_v55 }
 0x387   : > { %v2390_v42 = vsel %vm2382_vm5, %v2373_v38, %v2389_v27  ;;  %v2394_v29 = vsel %vm2382_vm5, %v2376_v44, %v2393_v58  ;;  %v2387_v25 = vsel %vm2381_vm8, %v2384_v51, %v2386_v56  ;;  %v2265_v22 = vshrl.u32 %v7753_v24, %v2259_v57 }
 0x388   : > { %v2391_v0 = vsel %vm2381_vm8, %v2388_v54, %v2390_v42  ;;  %v2395_v37 = vsel %vm2381_vm8, %v2392_v12, %v2394_v29  ;;  %v2263_v53 = vor.u32 %v2262_v41, %v2261_v62  ;;  %v2267_v35 = vshll.u32 %v7753_v24, %v2258_v55 }
 0x389   : > { %v6416_v10 = vmul.u32.u64.low %v6380_v1, %v2395_v37  ;;  %v6417_v43 = vmul.u32.u64.high %v6380_v1, %v2395_v37, %v6416_v10  ;;  %v6420_v9 = vmul.u32.u64.low %v6380_v1, %v2391_v0  ;;  %v6421_v2 = vmul.u32.u64.high %v6380_v1, %v2391_v0, %v6420_v9 }
 0x38a   : > { %v2266_v61 = vor.u32 %v2265_v22, %v2264_v16  ;;  %v2268_v39 = vshrl.u32 %v7755_v30, %v2259_v57  ;;  %v2260_v45 = vshrl.u32 %v7756_v4, %v2259_v57  ;;  %v2270_v32 = vshll.u32 %v7755_v30, %v2258_v55  ;;  %v6456_v22 = vpop.f32.mrb[8].mxu1 }
 0x38b   : > { %v2271_v63 = vshrl.u32 %v7743_v19, %v2259_v57  ;;  %v2274_v59 = vshrl.u32 %v7745_v17, %v2259_v57  ;;  %v2403_v23 = vmul.u32 %v6380_v1, %v2387_v25  ;;  %v2273_v7 = vshll.u32 %v7743_v19, %v2258_v55 }
 0x38c   : > { %v2269_v8 = vor.u32 %v2268_v39, %v2267_v35  ;;  %vm2276_vm11 = vcmp.lt.s32.totalorder %v6382_v34, 1  ;;  %vm2405_vm12 = vc.u32 %v6417_v43, %v6420_v9  ;;  %v2406_v28 = vadd.s32 1, %v6421_v2 }
 0x38d   : > { %v2272_v20 = vor.u32 %v2271_v63, %v2270_v32  ;;  %vm2277_vm7 = vcmp.lt.s32.totalorder %v6382_v34, 2  ;;  %v2275_v14 = vor.u32 %v2274_v59, %v2273_v7  ;;  %vm2278_vm14 = vcmp.lt.s32.totalorder %v6382_v34, 3 }
 0x38e   : > { %vm2279_vm6 = vcmp.lt.s32.totalorder %v6382_v34, 4  ;;  %v2284_v40 = vsel %vm2276_vm11, %v2263_v53, %v2266_v61  ;;  %v2407_v1 = vsel %vm2405_vm12, %v2406_v28, %v6421_v2  ;;  %v2288_v55 = vsel %vm2276_vm11, %v2266_v61, %v2269_v8 }
 0x38f   : > { %v2281_v60 = vsel %vm2279_vm6, %v2269_v8, 2102212464  ;;  %v2285_v38 = vsel %vm2279_vm6, %v2272_v20, 920167782  ;;  %v2408_v57 = vadd.s32 %v2407_v1, %v2403_v23  ;;  %v2280_v44 = vsel %vm2276_vm11, %v2260_v45, %v2263_v53 }
 0x390   : > { %v2286_v6 = vsel %vm2278_vm14, %v2269_v8, %v2285_v38  ;;  %v2289_v51 = vsel %vm2279_vm6, %v2275_v14, 1326507024  ;;  %v2282_v13 = vsel %vm2278_vm14, %v2266_v61, %v2281_v60  ;;  %vm2567_vm15 = vcmp.gt.s32.totalorder %v6393_v47, 0 }
 0x391   : > { %v2287_v54 = vsel %vm2277_vm7, %v2284_v40, %v2286_v6  ;;  %v2290_v12 = vsel %vm2278_vm14, %v2272_v20, %v2289_v51  ;;  %v2409_v56 = vadd.s32 536870912, %v2408_v57  ;;  %v2568_v41 = vsel %vm2567_vm15, %v6393_v47, 0 }
 0x392   : > { %v2291_v27 = vsel %vm2277_vm7, %v2288_v55, %v2290_v12  ;;  %v6444_v58 = vmul.u32.u64.low %v6384_v48, %v2287_v54  ;;  %v6445_v62 = vmul.u32.u64.high %v6384_v48, %v2287_v54, %v6444_v58  ;;  %v2283_v25 = vsel %vm2277_vm7, %v2280_v44, %v2282_v13 }
 0x393   : > { %v6449_v42 = vmul.u32.u64.low %v6384_v48, %v2291_v27  ;;  %v6450_v29 = vmul.u32.u64.high %v6384_v48, %v2291_v27, %v6449_v42  ;;  %v2410_v16 = vshrl.u32 %v2409_v56, 30  ;;  %v2570_v0 = vand.u32 31, %v2568_v41 }
 0x394   : > { %v2455_v37 = vand.u32 2139095040, %v6378_v26  ;;  %v2302_v2 = vadd.s32 1, %v6445_v62  ;;  %v2564_v53 = vor.u32 8388608, %v6388_v3  ;;  %v2299_v61 = vmul.u32 %v6384_v48, %v2283_v25 }
 0x395   : > { %v2411_v10 = vshll.u32 %v2410_v16, 30  ;;  %vm2301_vm0 = vc.u32 %v6450_v29, %v6444_v58  ;;  %v2571_v47 = vsub.s32 32, %v2570_v0  ;;  %v2452_v32 = vand.u32 2147483647, %v6378_v26 }
 0x396   : > { %v2303_v34 = vsel %vm2301_vm0, %v2302_v2, %v6445_v62  ;;  %v2456_v39 = vshrl.u32 %v2455_v37, 23  ;;  %v2404_v63 = vadd.s32 %v6420_v9, %v6417_v43  ;;  %v6470_v59 = vshrl.u32 %v2568_v41, 5 }
 0x397   : > { %v6463_v35 = vsub.s32 %v2408_v57, %v2411_v10  ;;  %v2304_v45 = vadd.s32 %v2303_v34, %v2299_v61  ;;  %v6472_v48 = vshll.u32 %v2564_v53, 8  ;;  %v2434_v23 = vsub.s32 4, %v2410_v16 }
 0x398   : > { %v2574_v7 = vshrl.u32 %v7752_v52, %v2571_v47  ;;  %v2577_v28 = vshrl.u32 %v7753_v24, %v2571_v47  ;;  %v2580_v14 = vshrl.u32 %v7755_v30, %v2571_v47  ;;  %v2583_v40 = vshrl.u32 %v7743_v19, %v2571_v47 }
 0x399   : > { %v2414_v3 = vsub.s32 0, %v6463_v35  ;;  %v2305_v8 = vadd.s32 536870912, %v2304_v45  ;;  %v6479_v1 = vadd.s32 4294967169, %v2456_v39  ;;  %v2573_v9 = vshll.u32 %v7756_v4, %v2570_v0 }
 0x39a   : > { %v2576_v60 = vshll.u32 %v7752_v52, %v2570_v0  ;;  %v6485_v38 = vand.u32 8388607, %v2452_v32  ;;  %v2579_v44 = vshll.u32 %v7753_v24, %v2570_v0  ;;  %v2582_v6 = vshll.u32 %v7755_v30, %v2570_v0 }
 0x39b   : > { %v4076_v20 = vmin.u32 %v2414_v3, %v6463_v35  ;;  %v2306_v43 = vshrl.u32 %v2305_v8, 30  ;;  %v2586_v51 = vshrl.u32 %v7745_v17, %v2571_v47  ;;  %v2435_v13 = vsel %vm2350_vm13, %v2434_v23, %v2410_v16 }
 0x39c   : > { %v2575_v12 = vor.u32 %v2574_v7, %v2573_v9  ;;  %v2578_v56 = vor.u32 %v2577_v28, %v2576_v60  ;;  %v2581_v21 = vor.u32 %v2580_v14, %v2579_v44  ;;  %v2584_v62 = vor.u32 %v2583_v40, %v2582_v6 }
 0x39d   : > { %v2416_v57 = vclz %v4076_v20  ;;  %v2307_v54 = vshll.u32 %v2306_v43, 30  ;;  %v2585_v42 = vshll.u32 %v7743_v19, %v2570_v0  ;;  %v2330_v25 = vsub.s32 4, %v2306_v43 }
 0x39e   : > { %v2572_v37 = vshrl.u32 %v7756_v4, %v2571_v47  ;;  %vm2588_vm2 = vcmp.lt.s32.totalorder %v6470_v59, 1  ;;  %vm2589_vm3 = vcmp.lt.s32.totalorder %v6470_v59, 2  ;;  %vm2590_vm8 = vcmp.lt.s32.totalorder %v6470_v59, 3 }
 0x39f   : > { %v4077_v27 = vadd.s32 4294967294, %v2416_v57  ;;  %v6500_v41 = vsub.s32 %v2304_v45, %v2307_v54  ;;  %v2587_v10 = vor.u32 %v2586_v51, %v2585_v42  ;;  %vm6508_vm5 = vcmp.le.f32.partialorder %v2244_v15, 0.7853982 }
 0x3a0   : > { %vm2591_vm4 = vcmp.lt.s32.totalorder %v6470_v59, 4  ;;  %v2596_v53 = vsel %vm2588_vm2, %v2575_v12, %v2578_v56  ;;  %v2600_v23 = vsel %vm2588_vm2, %v2578_v56, %v2581_v21  ;;  %v2437_v14 = vsel %vm6489_vm10, 0, %v2435_v13 }
 0x3a1   : > { %vm4078_vm9 = vcmp.lt.s32.totalorder %v4077_v27, 0  ;;  %v2310_v0 = vsub.s32 0, %v6500_v41  ;;  %v2593_v34 = vsel %vm2591_vm4, %v2581_v21, 2102212464  ;;  %v2597_v39 = vsel %vm2591_vm4, %v2584_v62, 920167782 }
 0x3a2   : > { %v2419_v16 = vsel %vm4078_vm9, 0, %v4077_v27  ;;  %v2598_v15 = vsel %vm2590_vm8, %v2581_v21, %v2597_v39  ;;  %v2601_v20 = vsel %vm2591_vm4, %v2587_v10, 1326507024  ;;  %v2594_v9 = vsel %vm2590_vm8, %v2578_v56, %v2593_v34 }
 0x3a3   : > { %v2420_v61 = vsub.s32 32, %v2419_v16  ;;  %v2424_v47 = vsub.s32 4294967266, %v2419_v16  ;;  %v2421_v45 = vshll.u32 %v6463_v35, %v2419_v16  ;;  %v4072_v3 = vmin.u32 %v2310_v0, %v6500_v41 }
 0x3a4   : > { %v2599_v28 = vsel %vm2589_vm3, %v2596_v53, %v2598_v15  ;;  %v2592_v35 = vsel %vm2588_vm2, %v2572_v37, %v2575_v12  ;;  %v2602_v44 = vsel %vm2590_vm8, %v2584_v62, %v2601_v20  ;;  %v2300_v62 = vadd.s32 %v6444_v58, %v6450_v29 }
 0x3a5   : > { %v2422_v8 = vshrl.u32 %v2404_v63, %v2420_v61  ;;  %v2425_v7 = vadd.s32 127, %v2424_v47  ;;  %v2312_v40 = vclz %v4072_v3  ;;  %v2331_v63 = vsel %vm2246_vm1, %v2330_v25, %v2306_v43  ;;  %v6549_v25 = vpop.f32.mrb[9].mxu1 }
 0x3a6   : > { %v2603_v51 = vsel %vm2589_vm3, %v2600_v23, %v2602_v44  ;;  %v6537_v13 = vmul.u32.u64.low %v6472_v48, %v2599_v28  ;;  %v6538_v54 = vmul.u32.u64.high %v6472_v48, %v2599_v28, %v6537_v13  ;;  %v2595_v56 = vsel %vm2589_vm3, %v2592_v35, %v2594_v9 }
 0x3a7   : > { %v2423_v60 = vor.u32 %v2422_v8, %v2421_v45  ;;  %v2426_v57 = vshll.u32 %v2425_v7, 23  ;;  %v4073_v6 = vadd.s32 4294967294, %v2312_v40  ;;  %v2441_v43 = vadd.s32 3, %v2437_v14 }
 0x3a8   : > { %v6543_v27 = vmul.u32.u64.low %v6472_v48, %v2603_v51  ;;  %v6544_v21 = vmul.u32.u64.high %v6472_v48, %v2603_v51, %v6543_v27  ;;  %v2462_v42 = vadd.s32 1, %v6479_v1  ;;  %v2333_v59 = vsel %vm6508_vm5, 0, %v2331_v63 }
 0x3a9   : > { %v2427_v12 = vor.u32 4788187, %v2426_v57  ;;  %vm4074_vm11 = vcmp.lt.s32.totalorder %v4073_v6, 0  ;;  %v2430_v10 = vcvt.s32.f32 %v2423_v60  ;;  %v2611_v61 = vmul.u32 %v6472_v48, %v2595_v56 }
 0x3aa   : > { %v2315_v16 = vsel %vm4074_vm11, 0, %v4073_v6  ;;  %v2614_v47 = vadd.s32 1, %v6538_v54  ;;  %vm2613_vm12 = vc.u32 %v6544_v21, %v6537_v13  ;;  %vm2463_vm7 = vcmp.gt.s32.totalorder %v2462_v42, 0 }
 0x3ab   : > { %v2428_v37 = vand.u32 2147483647, %v2427_v12  ;;  %v2316_v0 = vsub.s32 32, %v2315_v16  ;;  %v2320_v53 = vsub.s32 4294967266, %v2315_v16  ;;  %v2317_v58 = vshll.u32 %v6500_v41, %v2315_v16 }
 0x3ac   : > { %v2615_v39 = vsel %vm2613_vm12, %v2614_v47, %v6538_v54  ;;  %v2464_v45 = vsel %vm2463_vm7, %v2462_v42, 0  ;;  %v2337_v15 = vadd.s32 3, %v2333_v59  ;;  %v6560_v48 = vadd.f32 %v6370_v46, %v6350_v11 }
 0x3ad   : > { %v2431_v34 = vmul.f32 %v2430_v10, %v2428_v37  ;;  %v2318_v29 = vshrl.u32 %v2300_v62, %v2316_v0  ;;  %v2321_v1 = vadd.s32 127, %v2320_v53  ;;  %v2616_v23 = vadd.s32 %v2615_v39, %v2611_v61 }
 0x3ae   : > { %v2466_v8 = vand.u32 31, %v2464_v45  ;;  %v6567_v35 = vand.u32 3, %v2441_v43  ;;  %v6569_v60 = vand.u32 3, %v2337_v15  ;;  %vm2558_vm14 = vcmp.lt.s32.totalorder %v6365_v31, 0 }
 0x3af   : > { %v2432_v3 = vxor.u32 2147483648, %v2431_v34  ;;  %v2319_v7 = vor.u32 %v2318_v29, %v2317_v58  ;;  %v2322_v28 = vshll.u32 %v2321_v1, 23  ;;  %v2617_v20 = vadd.s32 536870912, %v2616_v23 }
 0x3b0   : > { %v2467_v14 = vsub.s32 32, %v2466_v8  ;;  %v2460_v46 = vor.u32 8388608, %v6485_v38  ;;  %v2767_v6 = vand.u32 2139095040, %v6560_v48  ;;  %v6575_v51 = vadd.s32 %v6537_v13, %v6544_v21 }
 0x3b1   : > { %v2433_v41 = vsel %vm2350_vm13, %v2432_v3, %v2431_v34  ;;  %v2323_v9 = vor.u32 4788187, %v2322_v28  ;;  %v2618_v57 = vshrl.u32 %v2617_v20, 30  ;;  %v2326_v44 = vcvt.s32.f32 %v2319_v7 }
 0x3b2   : > { %v2436_v40 = vsel %vm6489_vm10, %v6353_v33, %v2433_v41  ;;  %v6577_v54 = vshrl.u32 %v2464_v45, 5  ;;  %v2476_v12 = vshrl.u32 %v7755_v30, %v2467_v14  ;;  %v2470_v27 = vshrl.u32 %v7752_v52, %v2467_v14 }
 0x3b3   : > { %4583 = vcosq.f32 %v2436_v40  ;;  %v2324_v63 = vand.u32 2147483647, %v2323_v9  ;;  %v2619_v55 = vshll.u32 %v2618_v57, 30  ;;  %v2478_v43 = vshll.u32 %v7755_v30, %v2466_v8 }
 0x3b4   : > { %4585 = vsinq.f32 %v2436_v40  ;;  %v2479_v38 = vshrl.u32 %v7743_v19, %v2467_v14  ;;  %vm2447_vm6 = vcmp.eq.s32.totalorder %v6567_v35, 2  ;;  %v2469_v42 = vshll.u32 %v7756_v4, %v2466_v8 }
 0x3b5   : > { %v2327_v56 = vmul.f32 %v2326_v44, %v2324_v63  ;;  %v6584_v62 = vsub.s32 %v2616_v23, %v2619_v55  ;;  %v2473_v13 = vshrl.u32 %v7753_v24, %v2467_v14  ;;  %v2475_v21 = vshll.u32 %v7753_v24, %v2466_v8 }
 0x3b6   : > { %vm2444_vm15 = vcmp.eq.s32.totalorder %v6567_v35, 0  ;;  %v2642_v10 = vsub.s32 4, %v2618_v57  ;;  %v2480_v16 = vor.u32 %v2479_v38, %v2478_v43  ;;  %v2482_v59 = vshrl.u32 %v7745_v17, %v2467_v14 }
 0x3b7   : > { %v2328_v37 = vxor.u32 2147483648, %v2327_v56  ;;  %vm2443_vm0 = vcmp.lt.s32.totalorder %v6567_v35, 2  ;;  %v2622_v0 = vsub.s32 0, %v6584_v62  ;;  %v2472_v53 = vshll.u32 %v7752_v52, %v2466_v8 }
 0x3b8   : > { %v2477_v61 = vor.u32 %v2476_v12, %v2475_v21  ;;  %v6594_v47 = vshll.u32 %v2460_v46, 8  ;;  %vm2440_vm13 = vweird.f32 %v6353_v33  ;;  %v2468_v58 = vshrl.u32 %v7756_v4, %v2467_v14 }
 0x3b9   : > { %v2329_v34 = vsel %vm2246_vm1, %v2328_v37, %v2327_v56  ;;  %v2471_v29 = vor.u32 %v2470_v27, %v2469_v42  ;;  %v2481_v1 = vshll.u32 %v7743_v19, %v2466_v8  ;;  %v4084_v45 = vmin.u32 %v2622_v0, %v6584_v62 }
 0x3ba   : > { %v2332_v39 = vsel %vm6508_vm5, %v6356_v49, %v2329_v34  ;;  %v2474_v3 = vor.u32 %v2473_v13, %v2472_v53  ;;  %vm2487_vm10 = vcmp.lt.s32.totalorder %v6577_v54, 4  ;;  %v2643_v15 = vsel %vm2558_vm14, %v2642_v10, %v2618_v57 }
 0x3bb   : > { %4587 = vcosq.f32 %v2332_v39  ;;  %v2483_v23 = vor.u32 %v2482_v59, %v2481_v1  ;;  %v2493_v7 = vsel %vm2487_vm10, %v2480_v16, 920167782  ;;  %vm6612_vm1 = vcmp.le.f32.partialorder %v2556_v50, 0.7853982 }
 0x3bc   : > { %4589 = vsinq.f32 %v2332_v39  ;;  %v2624_v8 = vclz %v4084_v45  ;;  %vm2484_vm2 = vcmp.lt.s32.totalorder %v6577_v54, 1  ;;  %v2489_v41 = vsel %vm2487_vm10, %v2477_v61, 2102212464 }
 0x3bd   : > { %v4584_v28 = vpop.eup %4583  ;;  %vm2485_vm9 = vcmp.lt.s32.totalorder %v6577_v54, 2  ;;  %vm2486_vm3 = vcmp.lt.s32.totalorder %v6577_v54, 3  ;;  %v2488_v40 = vsel %vm2484_vm2, %v2468_v58, %v2471_v29  ;;  %v2492_v50 = vsel %vm2484_vm2, %v2471_v29, %v2474_v3 }
 0x3be   : > { %v4586_v20 = vpop.eup %4585  ;;  %v2448_v14 = vxor.u32 2147483648, %v4584_v28  ;;  %v4085_v57 = vadd.s32 4294967294, %v2624_v8  ;;  %v2494_v46 = vsel %vm2486_vm3, %v2477_v61, %v2493_v7  ;;  %v2490_v44 = vsel %vm2486_vm3, %v2474_v3, %v2489_v41 }
 0x3bf   : > { %v2445_v9 = vxor.u32 2147483648, %v4586_v20  ;;  %v2496_v55 = vsel %vm2484_vm2, %v2474_v3, %v2477_v61  ;;  %v2497_v12 = vsel %vm2487_vm10, %v2483_v23, 1326507024  ;;  %v2768_v43 = vshrl.u32 %v2767_v6, 23 }
 0x3c0   : > { %v2449_v63 = vsel %vm2447_vm6, %v2448_v14, %v4586_v20  ;;  %vm4086_vm8 = vcmp.lt.s32.totalorder %v4085_v57, 0  ;;  %v2498_v27 = vsel %vm2486_vm3, %v2480_v16, %v2497_v12  ;;  %v2495_v13 = vsel %vm2485_vm9, %v2492_v50, %v2494_v46  ;;  %v4648_v16 = vld [vmem:[%s4744_s11 + $0x8] sm:$0xff] }
 0x3c1   : > { %v2446_v56 = vsel %vm2444_vm15, %v4584_v28, %v2445_v9  ;;  %v2627_v42 = vsel %vm4086_vm8, 0, %v4085_v57  ;;  %v2499_v21 = vsel %vm2485_vm9, %v2496_v55, %v2498_v27  ;;  %vm2336_vm5 = vweird.f32 %v6356_v49  ;;  %v6670_v57 = vpop.f32.mrb[10].mxu1  ;;  %v4649_v27 = vld [vmem:[%s4744_s11] sm:$0xff] }
 0x3c2   : > { %v2450_v38 = vsel %vm2443_vm0, %v2446_v56, %v2449_v63  ;;  %v2628_v35 = vsub.s32 32, %v2627_v42  ;;  %v2629_v37 = vshll.u32 %v6584_v62, %v2627_v42  ;;  %v2632_v10 = vsub.s32 4294967266, %v2627_v42 }
 0x3c3   : > { %v2451_v6 = vsel %vm2440_vm13, nan, %v2450_v38  ;;  %v6646_v0 = vmul.u32.u64.low %v6594_v47, %v2499_v21  ;;  %v6647_v53 = vmul.u32.u64.high %v6594_v47, %v2499_v21, %v6646_v0  ;;  %v4091_v61 = vadd.s32 4294967169, %v2768_v43 }
 0x3c4   : > { %v3909_v59 = vadd.f32 %v4648_v16, %v2451_v6  ;;  %v2630_v34 = vshrl.u32 %v6575_v51, %v2628_v35  ;;  %v2633_v58 = vadd.s32 127, %v2632_v10  ;;  %vm2339_vm4 = vcmp.lt.s32.totalorder %v6569_v60, 2 }
 0x3c5   : > { %v6651_v33 = vmul.u32.u64.low %v6594_v47, %v2495_v13  ;;  %v6652_v29 = vmul.u32.u64.high %v6594_v47, %v2495_v13, %v6651_v33  ;;  %v4588_v1 = vpop.eup %4587  ;;  %vm2340_vm11 = vcmp.eq.s32.totalorder %v6569_v60, 0  ;;  %v2645_v62 = vsel %vm6612_vm1, 0, %v2643_v15 }
 0x3c6   : > { %3925 = vst [vmem:[%s6638_s8 + $0x8] sm:$0xff] %v3909_v59  ;;  %v2774_v39 = vadd.s32 1, %v4091_v61  ;;  %v4590_v45 = vpop.eup %4589  ;;  %v2344_v3 = vxor.u32 2147483648, %v4588_v1  ;;  %v2631_v23 = vor.u32 %v2630_v34, %v2629_v37  ;;  %v2634_v51 = vshll.u32 %v2633_v58, 23 }
 0x3c7   : > { %v2491_v7 = vsel %vm2485_vm9, %v2488_v40, %v2490_v44  ;;  %v2341_v28 = vxor.u32 2147483648, %v4590_v45  ;;  %vm2343_vm12 = vcmp.eq.s32.totalorder %v6569_v60, 2  ;;  %vm2509_vm7 = vc.u32 %v6647_v53, %v6651_v33 }
 0x3c8   : > { %vm2775_vm6 = vcmp.gt.s32.totalorder %v2774_v39, 0  ;;  %v2345_v8 = vsel %vm2343_vm12, %v2344_v3, %v4590_v45  ;;  %v2635_v41 = vor.u32 4788187, %v2634_v51  ;;  %v2649_v20 = vadd.s32 3, %v2645_v62 }
 0x3c9   : > { %v2510_v15 = vadd.s32 1, %v6652_v29  ;;  %v2342_v14 = vsel %vm2340_vm11, %v4588_v1, %v2341_v28  ;;  %v2507_v9 = vmul.u32 %v6594_v47, %v2491_v7  ;;  %v2764_v54 = vand.u32 2147483647, %v6560_v48 }
 0x3ca   : > { %v2776_v40 = vsel %vm2775_vm6, %v2774_v39, 0  ;;  %v2346_v50 = vsel %vm2339_vm4, %v2342_v14, %v2345_v8  ;;  %v2636_v46 = vand.u32 2147483647, %v2635_v41  ;;  %v2638_v63 = vcvt.s32.f32 %v2631_v23 }
 0x3cb   : > { %v2511_v44 = vsel %vm2509_vm7, %v2510_v15, %v6652_v29  ;;  %v2347_v55 = vsel %vm2336_vm5, nan, %v2346_v50  ;;  %v2778_v56 = vand.u32 31, %v2776_v40  ;;  %v6678_v38 = vand.u32 3, %v2649_v20 }
 0x3cc   : > { %v2512_v12 = vadd.s32 %v2511_v44, %v2507_v9  ;;  %v3908_v47 = vadd.f32 %v4649_v27, %v2347_v55  ;;  %v2639_v43 = vmul.f32 %v2638_v63, %v2636_v46  ;;  %v6682_v42 = vadd.f32 %v6350_v11, %v6373_v5 }
 0x3cd   : > { %v2771_v13 = vand.u32 8388607, %v2764_v54  ;;  %v2777_v21 = vshrl.u32 %v2776_v40, 5  ;;  %v2779_v6 = vsub.s32 32, %v2778_v56  ;;  %v2781_v35 = vshll.u32 %v7756_v4, %v2778_v56 }
 0x3ce   : > { %v2513_v60 = vadd.s32 536870912, %v2512_v12  ;;  %3924 = vst [vmem:[%s6638_s8] sm:$0xff] %v3908_v47  ;;  %v2640_v49 = vxor.u32 2147483648, %v2639_v43  ;;  %v2784_v37 = vshll.u32 %v7752_v52, %v2778_v56  ;;  %v2787_v10 = vshll.u32 %v7753_v24, %v2778_v56 }
 0x3cf   : > { %v2782_v59 = vshrl.u32 %v7752_v52, %v2779_v6  ;;  %v2785_v5 = vshrl.u32 %v7753_v24, %v2779_v6  ;;  %v2790_v0 = vshll.u32 %v7755_v30, %v2778_v56  ;;  %v2788_v34 = vshrl.u32 %v7755_v30, %v2779_v6 }
 0x3d0   : > { %v6690_v16 = vshrl.u32 %v2513_v60, 30  ;;  %v2641_v61 = vsel %vm2558_vm14, %v2640_v49, %v2639_v43  ;;  %v2791_v58 = vshrl.u32 %v7743_v19, %v2779_v6  ;;  %v2794_v29 = vshrl.u32 %v7745_v17, %v2779_v6 }
 0x3d1   : > { %v2644_v1 = vsel %vm6612_vm1, %v6365_v31, %v2641_v61  ;;  %v2783_v39 = vor.u32 %v2782_v59, %v2781_v35  ;;  %v2793_v45 = vshll.u32 %v7743_v19, %v2778_v56  ;;  %v2786_v3 = vor.u32 %v2785_v5, %v2784_v37 }
 0x3d2   : > { %v2515_v62 = vshll.u32 %v6690_v16, 30  ;;  %4591 = vcosq.f32 %v2644_v1  ;;  %v2789_v23 = vor.u32 %v2788_v34, %v2787_v10  ;;  %v2792_v51 = vor.u32 %v2791_v58, %v2790_v0  ;;  %v6726_v34 = vpop.f32.mrb[11].mxu1 }
 0x3d3   : > { %4593 = vsinq.f32 %v2644_v1  ;;  %v2772_v28 = vor.u32 8388608, %v2771_v13  ;;  %v2795_v8 = vor.u32 %v2794_v29, %v2793_v45  ;;  %v2780_v41 = vshrl.u32 %v7756_v4, %v2779_v6 }
 0x3d4   : > { %v6705_v7 = vsub.s32 %v2512_v12, %v2515_v62  ;;  %vm2796_vm14 = vcmp.lt.s32.totalorder %v2777_v21, 1  ;;  %vm2799_vm15 = vcmp.lt.s32.totalorder %v2777_v21, 4  ;;  %v2663_v2 = vand.u32 2139095040, %v6682_v42 }
 0x3d5   : > { %vm2798_vm0 = vcmp.lt.s32.totalorder %v2777_v21, 3  ;;  %v2801_v15 = vsel %vm2799_vm15, %v2789_v23, 2102212464  ;;  %v2804_v14 = vsel %vm2796_vm14, %v2783_v39, %v2786_v3  ;;  %v2800_v9 = vsel %vm2796_vm14, %v2780_v41, %v2783_v39 }
 0x3d6   : > { %v2518_v20 = vsub.s32 0, %v6705_v7  ;;  %v2802_v40 = vsel %vm2798_vm0, %v2786_v3, %v2801_v15  ;;  %v2805_v50 = vsel %vm2799_vm15, %v2792_v51, 920167782  ;;  %v2809_v46 = vsel %vm2799_vm15, %v2795_v8, 1326507024 }
 0x3d7   : > { %vm2797_vm13 = vcmp.lt.s32.totalorder %v2777_v21, 2  ;;  %v2806_v44 = vsel %vm2798_vm0, %v2789_v23, %v2805_v50  ;;  %v2808_v55 = vsel %vm2796_vm14, %v2786_v3, %v2789_v23  ;;  %v2810_v56 = vsel %vm2798_vm0, %v2792_v51, %v2809_v46  ;;  %v4650_v46 = vld [vmem:[%s4744_s11 + $0x18] sm:$0xff] }
 0x3d8   : > { %v4080_v63 = vmin.u32 %v2518_v20, %v6705_v7  ;;  %v2807_v12 = vsel %vm2797_vm13, %v2804_v14, %v2806_v44  ;;  %v2812_v27 = vshll.u32 %v2772_v28, 8  ;;  %v2664_v47 = vshrl.u32 %v2663_v2, 23 }
 0x3d9   : > { %vm2648_vm10 = vweird.f32 %v6365_v31  ;;  %vm2651_vm1 = vcmp.lt.s32.totalorder %v6678_v38, 2  ;;  %vm2454_vm2 = vcmp.lt.s32.totalorder %v6378_v26, 0  ;;  %v2803_v60 = vsel %vm2797_vm13, %v2800_v9, %v2802_v40 }
 0x3da   : > { %v2520_v43 = vclz %v4080_v63  ;;  %v2811_v13 = vsel %vm2797_vm13, %v2808_v55, %v2810_v56  ;;  %v6714_v6 = vmul.u32.u64.low %v2812_v27, %v2807_v12  ;;  %v6715_v49 = vmul.u32.u64.high %v2812_v27, %v2807_v12, %v6714_v6 }
 0x3db   : > { %v4087_v21 = vadd.s32 4294967169, %v2664_v47  ;;  %v6718_v37 = vmul.u32.u64.low %v2812_v27, %v2811_v13  ;;  %v6719_v10 = vmul.u32.u64.high %v2812_v27, %v2811_v13, %v6718_v37  ;;  %v2660_v59 = vand.u32 2147483647, %v6682_v42 }
 0x3dc   : > { %v4081_v35 = vadd.s32 4294967294, %v2520_v43  ;;  %v4592_v5 = vpop.eup %4591  ;;  %vm2652_vm9 = vcmp.eq.s32.totalorder %v6678_v38, 0  ;;  %vm2655_vm3 = vcmp.eq.s32.totalorder %v6678_v38, 2  ;;  %v2508_v0 = vadd.s32 %v6651_v33, %v6647_v53 }
 0x3dd   : > { %v2670_v61 = vadd.s32 1, %v4087_v21  ;;  %v4594_v58 = vpop.eup %4593  ;;  %v2656_v29 = vxor.u32 2147483648, %v4592_v5  ;;  %v2538_v1 = vsub.s32 4, %v6690_v16  ;;  %v2819_v62 = vmul.u32 %v2812_v27, %v2803_v60 }
 0x3de   : > { %vm4082_vm8 = vcmp.lt.s32.totalorder %v4081_v35, 0  ;;  %v2653_v39 = vxor.u32 2147483648, %v4594_v58  ;;  %v2822_v3 = vadd.s32 1, %v6715_v49  ;;  %v2667_v53 = vand.u32 8388607, %v2660_v59 }
 0x3df   : > { %v2523_v45 = vsel %vm4082_vm8, 0, %v4081_v35  ;;  %vm2671_vm5 = vcmp.gt.s32.totalorder %v2670_v61, 0  ;;  %v2657_v23 = vsel %vm2655_vm3, %v2656_v29, %v4594_v58  ;;  %vm2821_vm4 = vc.u32 %v6719_v10, %v6714_v6 }
 0x3e0   : > { %v2524_v51 = vsub.s32 32, %v2523_v45  ;;  %v2528_v28 = vsub.s32 4294967266, %v2523_v45  ;;  %v2654_v33 = vsel %vm2652_vm9, %v4592_v5, %v2653_v39  ;;  %v2525_v8 = vshll.u32 %v6705_v7, %v2523_v45 }
 0x3e1   : > { %v2672_v41 = vsel %vm2671_vm5, %v2670_v61, 0  ;;  %v2658_v2 = vsel %vm2651_vm1, %v2654_v33, %v2657_v23  ;;  %v2823_v14 = vsel %vm2821_vm4, %v2822_v3, %v6715_v49  ;;  %v2539_v40 = vsel %vm2454_vm2, %v2538_v1, %v6690_v16 }
 0x3e2   : > { %v2526_v20 = vshrl.u32 %v2508_v0, %v2524_v51  ;;  %v2529_v15 = vadd.s32 127, %v2528_v28  ;;  %v2659_v9 = vsel %vm2648_vm10, nan, %v2658_v2  ;;  %v2824_v7 = vadd.s32 %v2823_v14, %v2819_v62 }
 0x3e3   : > { %v2674_v50 = vand.u32 31, %v2672_v41  ;;  %v3911_v63 = vadd.f32 %v4650_v46, %v2659_v9  ;;  %vm6748_vm11 = vcmp.le.f32.partialorder %v2452_v32, 0.7853982  ;;  %v2668_v16 = vor.u32 8388608, %v2667_v53 }
 0x3e4   : > { %v2527_v44 = vor.u32 %v2526_v20, %v2525_v8  ;;  %v2530_v55 = vshll.u32 %v2529_v15, 23  ;;  %v2825_v12 = vadd.s32 536870912, %v2824_v7  ;;  %v2541_v27 = vsel %vm6748_vm11, 0, %v2539_v40 }
 0x3e5   : > { %v2675_v56 = vsub.s32 32, %v2674_v50  ;;  %3927 = vst [vmem:[%s6638_s8 + $0x18] sm:$0xff] %v3911_v63  ;;  %v2673_v47 = vshrl.u32 %v2672_v41, 5  ;;  %v2686_v35 = vshll.u32 %v7755_v30, %v2674_v50  ;;  %v2677_v0 = vshll.u32 %v7756_v4, %v2674_v50 }
 0x3e6   : > { %v2531_v31 = vor.u32 4788187, %v2530_v55  ;;  %v2534_v43 = vcvt.s32.f32 %v2527_v44  ;;  %v6755_v60 = vshrl.u32 %v2825_v12, 30  ;;  %v2680_v61 = vshll.u32 %v7752_v52, %v2674_v50 }
 0x3e7   : > { %v2678_v13 = vshrl.u32 %v7752_v52, %v2675_v56  ;;  %v2681_v49 = vshrl.u32 %v7753_v24, %v2675_v56  ;;  %v2684_v21 = vshrl.u32 %v7755_v30, %v2675_v56  ;;  %v2687_v37 = vshrl.u32 %v7743_v19, %v2675_v56 }
 0x3e8   : > { %v2532_v32 = vand.u32 2147483647, %v2531_v31  ;;  %v2827_v5 = vshll.u32 %v6755_v60, 30  ;;  %v2683_v58 = vshll.u32 %v7753_v24, %v2674_v50  ;;  %v2690_v62 = vshrl.u32 %v7745_v17, %v2675_v56 }
 0x3e9   : > { %v2688_v1 = vor.u32 %v2687_v37, %v2686_v35  ;;  %v2679_v45 = vor.u32 %v2678_v13, %v2677_v0  ;;  %v2682_v3 = vor.u32 %v2681_v49, %v2680_v61  ;;  %v2545_v28 = vadd.s32 3, %v2541_v27 }
 0x3ea   : > { %v2535_v29 = vmul.f32 %v2534_v43, %v2532_v32  ;;  %v6767_v39 = vsub.s32 %v2824_v7, %v2827_v5  ;;  %v2685_v23 = vor.u32 %v2684_v21, %v2683_v58  ;;  %v2689_v53 = vshll.u32 %v7743_v19, %v2674_v50 }
 0x3eb   : > { %v6772_v33 = vadd.f32 %v6375_v18, %v6350_v11  ;;  %vm2692_vm12 = vcmp.lt.s32.totalorder %v2673_v47, 1  ;;  %vm2695_vm7 = vcmp.lt.s32.totalorder %v2673_v47, 4  ;;  %v2708_v41 = vshll.u32 %v2668_v16, 8 }
 0x3ec   : > { %v2536_v51 = vxor.u32 2147483648, %v2535_v29  ;;  %v2830_v8 = vsub.s32 0, %v6767_v39  ;;  %v2691_v20 = vor.u32 %v2690_v62, %v2689_v53  ;;  %vm2694_vm6 = vcmp.lt.s32.totalorder %v2673_v47, 3 }
 0x3ed   : > { %v2701_v15 = vsel %vm2695_vm7, %v2688_v1, 920167782  ;;  %v2697_v11 = vsel %vm2695_vm7, %v2685_v23, 2102212464  ;;  %v2700_v18 = vsel %vm2692_vm12, %v2679_v45, %v2682_v3  ;;  %v2850_v40 = vsub.s32 4, %v6755_v60 }
 0x3ee   : > { %v2537_v2 = vsel %vm2454_vm2, %v2536_v51, %v2535_v29  ;;  %v4092_v9 = vmin.u32 %v2830_v8, %v6767_v39  ;;  %v2676_v7 = vshrl.u32 %v7756_v4, %v2675_v56  ;;  %v2702_v50 = vsel %vm2694_vm6, %v2685_v23, %v2701_v15 }
 0x3ef   : > { %v2540_v14 = vsel %vm6748_vm11, %v6378_v26, %v2537_v2  ;;  %vm2693_vm14 = vcmp.lt.s32.totalorder %v2673_v47, 2  ;;  %v2704_v63 = vsel %vm2692_vm12, %v2682_v3, %v2685_v23  ;;  %v2698_v55 = vsel %vm2694_vm6, %v2682_v3, %v2697_v11 }
 0x3f0   : > { %4595 = vcosq.f32 %v2540_v14  ;;  %v2832_v46 = vclz %v4092_v9  ;;  %v2696_v44 = vsel %vm2692_vm12, %v2676_v7, %v2679_v45  ;;  %v2703_v38 = vsel %vm2693_vm14, %v2700_v18, %v2702_v50  ;;  %v6817_v45 = vld [vmem:[%s7672_s4] ss:$0 sm:$0xff] }
 0x3f1   : > { %4597 = vsinq.f32 %v2540_v14  ;;  %v2705_v12 = vsel %vm2695_vm7, %v2691_v20, 1326507024  ;;  %v6792_v16 = vmul.u32.u64.low %v2708_v41, %v2703_v38  ;;  %v6793_v43 = vmul.u32.u64.high %v2708_v41, %v2703_v38, %v6792_v16 }
 0x3f2   : > { %v4093_v31 = vadd.s32 4294967294, %v2832_v46  ;;  %v2706_v27 = vsel %vm2694_vm6, %v2688_v1, %v2705_v12  ;;  %v2546_v56 = vand.u32 3, %v2545_v28  ;;  %vm2766_vm15 = vcmp.lt.s32.totalorder %v6560_v48, 0 }
 0x3f3   : > { %v2707_v13 = vsel %vm2693_vm14, %v2704_v63, %v2706_v27  ;;  %v2975_v49 = vand.u32 2139095040, %v6772_v33  ;;  %v2699_v32 = vsel %vm2693_vm14, %v2696_v44, %v2698_v55  ;;  %vm6803_vm13 = vcmp.le.f32.partialorder %v2764_v54, 0.7853982 }
 0x3f4   : > { %vm4094_vm0 = vcmp.lt.s32.totalorder %v4093_v31, 0  ;;  %v6798_v21 = vmul.u32.u64.low %v2708_v41, %v2707_v13  ;;  %v6799_v35 = vmul.u32.u64.high %v2708_v41, %v2707_v13, %v6798_v21  ;;  %v2820_v37 = vadd.s32 %v6714_v6, %v6719_v10  ;;  %v6823_v10 = vpop.f32.mrb[12].mxu1 }
 0x3f5   : > { %v2835_v5 = vsel %vm4094_vm0, 0, %v4093_v31  ;;  %v2976_v0 = vshrl.u32 %v2975_v49, 23  ;;  %vm2544_vm10 = vweird.f32 %v6378_v26  ;;  %v2851_v29 = vsel %vm2766_vm15, %v2850_v40, %v6755_v60 }
 0x3f6   : > { %v2836_v61 = vsub.s32 32, %v2835_v5  ;;  %v2840_v58 = vsub.s32 4294967266, %v2835_v5  ;;  %v2718_v1 = vadd.s32 1, %v6793_v43  ;;  %vm2547_vm1 = vcmp.lt.s32.totalorder %v2546_v56, 2 }
 0x3f7   : > { %v2715_v54 = vmul.u32 %v2708_v41, %v2699_v32  ;;  %v4099_v62 = vadd.s32 4294967169, %v2976_v0  ;;  %v6821_v6 = vadd.f32 %v6817_v45, %v6390_v36  ;;  %v2837_v3 = vshll.u32 %v6767_v39, %v2835_v5 }
 0x3f8   : > { %v2838_v23 = vshrl.u32 %v2820_v37, %v2836_v61  ;;  %v2841_v60 = vadd.s32 127, %v2840_v58  ;;  %vm2717_vm2 = vc.u32 %v6799_v35, %v6792_v16  ;;  %v2853_v28 = vsel %vm6803_vm13, 0, %v2851_v29 }
 0x3f9   : > { %v2719_v53 = vsel %vm2717_vm2, %v2718_v1, %v6793_v43  ;;  %v2972_v8 = vand.u32 2147483647, %v6772_v33  ;;  %v2982_v41 = vadd.s32 1, %v4099_v62  ;;  %vm2548_vm9 = vcmp.eq.s32.totalorder %v2546_v56, 0  ;;  %v4652_v43 = vld [vmem:[%s4744_s11 + $0x10] sm:$0xff] }
 0x3fa   : > { %v4596_v51 = vpop.eup %4595  ;;  %v2839_v20 = vor.u32 %v2838_v23, %v2837_v3  ;;  %v2842_v15 = vshll.u32 %v2841_v60, 23  ;;  %v2720_v14 = vadd.s32 %v2719_v53, %v2715_v54  ;;  %vm2551_vm3 = vcmp.eq.s32.totalorder %v2546_v56, 2 }
 0x3fb   : > { %v4598_v36 = vpop.eup %4597  ;;  %v2552_v2 = vxor.u32 2147483648, %v4596_v51  ;;  %vm2983_vm8 = vcmp.gt.s32.totalorder %v2982_v41, 0  ;;  %v2857_v18 = vadd.s32 3, %v2853_v28  ;;  %v2979_v50 = vand.u32 8388607, %v2972_v8 }
 0x3fc   : > { %v2549_v39 = vxor.u32 2147483648, %v4598_v36  ;;  %v2843_v11 = vor.u32 4788187, %v2842_v15  ;;  %v2721_v40 = vadd.s32 536870912, %v2720_v14  ;;  %v2984_v46 = vsel %vm2983_vm8, %v2982_v41, 0 }
 0x3fd   : > { %v2553_v9 = vsel %vm2551_vm3, %v2552_v2, %v4598_v36  ;;  %v2871_v63 = vand.u32 2139095040, %v6821_v6  ;;  %v2846_v38 = vcvt.s32.f32 %v2839_v20  ;;  %v2986_v27 = vand.u32 31, %v2984_v46 }
 0x3fe   : > { %v2550_v7 = vsel %vm2548_vm9, %v4596_v51, %v2549_v39  ;;  %v2844_v55 = vand.u32 2147483647, %v2843_v11  ;;  %v6836_v12 = vshrl.u32 %v2721_v40, 30  ;;  %v6842_v21 = vand.u32 3, %v2857_v18 }
 0x3ff   : > { %v2554_v44 = vsel %vm2547_vm1, %v2550_v7, %v2553_v9  ;;  %v2980_v37 = vor.u32 8388608, %v2979_v50  ;;  %v2987_v5 = vsub.s32 32, %v2986_v27  ;;  %v6847_v61 = vshrl.u32 %v2984_v46, 5 }
 0x400   : > { %v2555_v31 = vsel %vm2544_vm10, nan, %v2554_v44  ;;  %v2847_v49 = vmul.f32 %v2846_v38, %v2844_v55  ;;  %v2723_v32 = vshll.u32 %v6836_v12, 30  ;;  %v2872_v58 = vshrl.u32 %v2871_v63, 23 }
 0x401   : > { %v3910_v13 = vadd.f32 %v4652_v43, %v2555_v31  ;;  %v2989_v26 = vshll.u32 %v7756_v4, %v2986_v27  ;;  %v2990_v29 = vshrl.u32 %v7752_v52, %v2987_v5  ;;  %v2992_v1 = vshll.u32 %v7752_v52, %v2986_v27 }
 0x402   : > { %v2848_v56 = vxor.u32 2147483648, %v2847_v49  ;;  %v6845_v0 = vsub.s32 %v2720_v14, %v2723_v32  ;;  %v2993_v54 = vshrl.u32 %v7753_v24, %v2987_v5  ;;  %v2995_v23 = vshll.u32 %v7753_v24, %v2986_v27 }
 0x403   : > { %3926 = vst [vmem:[%s6638_s8 + $0x10] sm:$0xff] %v3910_v13  ;;  %v2996_v60 = vshrl.u32 %v7755_v30, %v2987_v5  ;;  %v2991_v28 = vor.u32 %v2990_v29, %v2989_v26  ;;  %v2998_v53 = vshll.u32 %v7755_v30, %v2986_v27  ;;  %v2999_v41 = vshrl.u32 %v7743_v19, %v2987_v5 }
 0x404   : > { %v2849_v62 = vsel %vm2766_vm15, %v2848_v56, %v2847_v49  ;;  %v2726_v3 = vsub.s32 0, %v6845_v0  ;;  %v2994_v2 = vor.u32 %v2993_v54, %v2992_v1  ;;  %v3001_v14 = vshll.u32 %v7743_v19, %v2986_v27  ;;  %v6911_v1 = vpop.f32.mrb[13].mxu1 }
 0x405   : > { %v2852_v51 = vsel %vm6803_vm13, %v6560_v48, %v2849_v62  ;;  %v2997_v20 = vor.u32 %v2996_v60, %v2995_v23  ;;  %v3000_v15 = vor.u32 %v2999_v41, %v2998_v53  ;;  %v3002_v39 = vshrl.u32 %v7745_v17, %v2987_v5 }
 0x406   : > { %4599 = vcosq.f32 %v2852_v51  ;;  %v4088_v36 = vmin.u32 %v2726_v3, %v6845_v0  ;;  %vm2662_vm5 = vcmp.lt.s32.totalorder %v6682_v42, 0  ;;  %v2716_v47 = vadd.s32 %v6792_v16, %v6799_v35 }
 0x407   : > { %4601 = vsinq.f32 %v2852_v51  ;;  %v6869_v11 = vshll.u32 %v2980_v37, 8  ;;  %v2988_v18 = vshrl.u32 %v7756_v4, %v2987_v5  ;;  %v3003_v40 = vor.u32 %v3002_v39, %v3001_v14 }
 0x408   : > { %v2728_v9 = vclz %v4088_v36  ;;  %vm3004_vm4 = vcmp.lt.s32.totalorder %v6847_v61, 1  ;;  %v4095_v7 = vadd.s32 4294967169, %v2872_v58  ;;  %vm3006_vm11 = vcmp.lt.s32.totalorder %v6847_v61, 3 }
 0x409   : > { %vm3007_vm12 = vcmp.lt.s32.totalorder %v6847_v61, 4  ;;  %v3012_v46 = vsel %vm3004_vm4, %v2991_v28, %v2994_v2  ;;  %vm2860_vm7 = vcmp.eq.s32.totalorder %v6842_v21, 0  ;;  %v3016_v63 = vsel %vm3004_vm4, %v2994_v2, %v2997_v20 }
 0x40a   : > { %v4089_v50 = vadd.s32 4294967294, %v2728_v9  ;;  %v3009_v16 = vsel %vm3007_vm12, %v2997_v20, 2102212464  ;;  %v3013_v35 = vsel %vm3007_vm12, %v3000_v15, 920167782  ;;  %vm2859_vm6 = vcmp.lt.s32.totalorder %v6842_v21, 2 }
 0x40b   : > { %v3017_v44 = vsel %vm3007_vm12, %v3003_v40, 1326507024  ;;  %vm6883_vm14 = vcmp.le.f32.partialorder %v2660_v59, 0.7853982  ;;  %vm3005_vm0 = vcmp.lt.s32.totalorder %v6847_v61, 2  ;;  %v3014_v38 = vsel %vm3006_vm11, %v2997_v20, %v3013_v35 }
 0x40c   : > { %vm4090_vm15 = vcmp.lt.s32.totalorder %v4089_v50, 0  ;;  %v3018_v31 = vsel %vm3006_vm11, %v3000_v15, %v3017_v44  ;;  %vm2856_vm13 = vweird.f32 %v6560_v48  ;;  %v2746_v43 = vsub.s32 4, %v6836_v12 }
 0x40d   : > { %v2731_v27 = vsel %vm4090_vm15, 0, %v4089_v50  ;;  %v3015_v59 = vsel %vm3005_vm0, %v3012_v46, %v3014_v38  ;;  %v3019_v13 = vsel %vm3005_vm0, %v3016_v63, %v3018_v31  ;;  %v3008_v37 = vsel %vm3004_vm4, %v2988_v18, %v2991_v28  ;;  %v4653_v63 = vld [vmem:[%s4744_s11 + $0x28] sm:$0xff] }
 0x40e   : > { %v2732_v49 = vsub.s32 32, %v2731_v27  ;;  %v2736_v32 = vsub.s32 4294967266, %v2731_v27  ;;  %v3010_v5 = vsel %vm3006_vm11, %v2994_v2, %v3009_v16  ;;  %v2733_v62 = vshll.u32 %v6845_v0, %v2731_v27 }
 0x40f   : > { %v6903_v56 = vmul.u32.u64.low %v6869_v11, %v3019_v13  ;;  %v6904_v58 = vmul.u32.u64.high %v6869_v11, %v3019_v13, %v6903_v56  ;;  %v6907_v26 = vmul.u32.u64.low %v6869_v11, %v3015_v59  ;;  %v6908_v29 = vmul.u32.u64.high %v6869_v11, %v3015_v59, %v6907_v26 }
 0x410   : > { %v4600_v54 = vpop.eup %4599  ;;  %v2734_v3 = vshrl.u32 %v2716_v47, %v2732_v49  ;;  %v2737_v23 = vadd.s32 127, %v2736_v32  ;;  %v2878_v60 = vadd.s32 1, %v4095_v7  ;;  %vm2863_vm10 = vcmp.eq.s32.totalorder %v6842_v21, 2 }
 0x411   : > { %v4602_v51 = vpop.eup %4601  ;;  %v2864_v28 = vxor.u32 2147483648, %v4600_v54  ;;  %v2747_v53 = vsel %vm2662_vm5, %v2746_v43, %v6836_v12  ;;  %v3011_v41 = vsel %vm3005_vm0, %v3008_v37, %v3010_v5  ;;  %vm3029_vm2 = vc.u32 %v6904_v58, %v6907_v26 }
 0x412   : > { %v2861_v36 = vxor.u32 2147483648, %v4602_v51  ;;  %v2735_v2 = vor.u32 %v2734_v3, %v2733_v62  ;;  %v2738_v20 = vshll.u32 %v2737_v23, 23  ;;  %vm2879_vm1 = vcmp.gt.s32.totalorder %v2878_v60, 0 }
 0x413   : > { %v2865_v15 = vsel %vm2863_vm10, %v2864_v28, %v4602_v51  ;;  %v3030_v0 = vadd.s32 1, %v6908_v29  ;;  %v2868_v14 = vand.u32 2147483647, %v6821_v6  ;;  %v3027_v61 = vmul.u32 %v6869_v11, %v3011_v41 }
 0x414   : > { %v2862_v39 = vsel %vm2860_vm7, %v4600_v54, %v2861_v36  ;;  %v2739_v12 = vor.u32 4788187, %v2738_v20  ;;  %v2880_v47 = vsel %vm2879_vm1, %v2878_v60, 0  ;;  %v2749_v18 = vsel %vm6883_vm14, 0, %v2747_v53 }
 0x415   : > { %v2866_v9 = vsel %vm2859_vm6, %v2862_v39, %v2865_v15  ;;  %v3031_v40 = vsel %vm3029_vm2, %v3030_v0, %v6908_v29  ;;  %v2882_v7 = vand.u32 31, %v2880_v47  ;;  %v2742_v16 = vcvt.s32.f32 %v2735_v2 }
 0x416   : > { %v2867_v50 = vsel %vm2856_vm13, nan, %v2866_v9  ;;  %v2740_v46 = vand.u32 2147483647, %v2739_v12  ;;  %v3032_v35 = vadd.s32 %v3031_v40, %v3027_v61  ;;  %v2875_v11 = vand.u32 8388607, %v2868_v14 }
 0x417   : > { %v3913_v44 = vadd.f32 %v4653_v63, %v2867_v50  ;;  %v2883_v21 = vsub.s32 32, %v2882_v7  ;;  %v6939_v38 = vadd.f32 %v6817_v45, %v6456_v22  ;;  %v2753_v27 = vadd.s32 3, %v2749_v18 }
 0x418   : > { %v2743_v31 = vmul.f32 %v2742_v16, %v2740_v46  ;;  %v3033_v43 = vadd.s32 536870912, %v3032_v35  ;;  %v6941_v59 = vshrl.u32 %v2880_v47, 5  ;;  %v2885_v48 = vshll.u32 %v7756_v4, %v2882_v7 }
 0x419   : > { %3929 = vst [vmem:[%s6638_s8 + $0x28] sm:$0xff] %v3913_v44  ;;  %v2886_v13 = vshrl.u32 %v7752_v52, %v2883_v21  ;;  %v2889_v49 = vshrl.u32 %v7753_v24, %v2883_v21  ;;  %v2892_v32 = vshrl.u32 %v7755_v30, %v2883_v21  ;;  %v2888_v56 = vshll.u32 %v7752_v52, %v2882_v7 }
 0x41a   : > { %v2744_v37 = vxor.u32 2147483648, %v2743_v31  ;;  %v3034_v5 = vshrl.u32 %v3033_v43, 30  ;;  %v2895_v22 = vshrl.u32 %v7743_v19, %v2883_v21  ;;  %vm2974_vm9 = vcmp.lt.s32.totalorder %v6772_v33, 0 }
 0x41b   : > { %v2891_v29 = vshll.u32 %v7753_v24, %v2882_v7  ;;  %v2894_v54 = vshll.u32 %v7755_v30, %v2882_v7  ;;  %v2897_v62 = vshll.u32 %v7743_v19, %v2882_v7  ;;  %v2898_v3 = vshrl.u32 %v7745_v17, %v2883_v21 }
 0x41c   : > { %v2745_v23 = vsel %vm2662_vm5, %v2744_v37, %v2743_v31  ;;  %v3035_v60 = vshll.u32 %v3034_v5, 30  ;;  %v2887_v51 = vor.u32 %v2886_v13, %v2885_v48  ;;  %v2890_v28 = vor.u32 %v2889_v49, %v2888_v56 }
 0x41d   : > { %v2748_v53 = vsel %vm6883_vm14, %v6682_v42, %v2745_v23  ;;  %v2893_v41 = vor.u32 %v2892_v32, %v2891_v29  ;;  %v2896_v36 = vor.u32 %v2895_v22, %v2894_v54  ;;  %v2899_v2 = vor.u32 %v2898_v3, %v2897_v62  ;;  %v7009_v29 = vpop.f32.mrb[14].mxu1 }
 0x41e   : > { %4603 = vcosq.f32 %v2748_v53  ;;  %v6960_v20 = vand.u32 3, %v2753_v27  ;;  %v6962_v15 = vsub.s32 %v3032_v35, %v3035_v60  ;;  %v2876_v0 = vor.u32 8388608, %v2875_v11 }
 0x41f   : > { %4605 = vsinq.f32 %v2748_v53  ;;  %vm6966_vm3 = vcmp.le.f32.partialorder %v2972_v8, 0.7853982  ;;  %v3058_v12 = vsub.s32 4, %v3034_v5  ;;  %vm2900_vm8 = vcmp.lt.s32.totalorder %v6941_v59, 1 }
 0x420   : > { %v3183_v55 = vand.u32 2139095040, %v6939_v38  ;;  %v3038_v61 = vsub.s32 0, %v6962_v15  ;;  %vm2902_vm5 = vcmp.lt.s32.totalorder %v6941_v59, 3  ;;  %vm2903_vm4 = vcmp.lt.s32.totalorder %v6941_v59, 4 }
 0x421   : > { %v2908_v47 = vsel %vm2900_vm8, %v2887_v51, %v2890_v28  ;;  %v2884_v9 = vshrl.u32 %v7756_v4, %v2883_v21  ;;  %v2905_v8 = vsel %vm2903_vm4, %v2893_v41, 2102212464  ;;  %v2909_v18 = vsel %vm2903_vm4, %v2896_v36, 920167782 }
 0x422   : > { %v2913_v40 = vsel %vm2903_vm4, %v2899_v2, 1326507024  ;;  %v4100_v7 = vmin.u32 %v3038_v61, %v6962_v15  ;;  %vm2901_vm11 = vcmp.lt.s32.totalorder %v6941_v59, 2  ;;  %v2910_v50 = vsel %vm2902_vm5, %v2893_v41, %v2909_v18 }
 0x423   : > { %v2912_v46 = vsel %vm2900_vm8, %v2890_v28, %v2893_v41  ;;  %v2911_v16 = vsel %vm2901_vm11, %v2908_v47, %v2910_v50  ;;  %v2914_v35 = vsel %vm2902_vm5, %v2896_v36, %v2913_v40  ;;  %v2916_v63 = vshll.u32 %v2876_v0, 8 }
 0x424   : > { %v3184_v44 = vshrl.u32 %v3183_v55, 23  ;;  %v3040_v11 = vclz %v4100_v7  ;;  %v3059_v21 = vsel %vm2974_vm9, %v3058_v12, %v3034_v5  ;;  %v2904_v31 = vsel %vm2900_vm8, %v2884_v9, %v2887_v51 }
 0x425   : > { %v2906_v27 = vsel %vm2902_vm5, %v2890_v28, %v2905_v8  ;;  %vm2752_vm12 = vweird.f32 %v6682_v42  ;;  %v2915_v43 = vsel %vm2901_vm11, %v2912_v46, %v2914_v35  ;;  %vm2755_vm7 = vcmp.lt.s32.totalorder %v6960_v20, 2  ;;  %v4654_v46 = vld [vmem:[%s4744_s11 + $0x20] sm:$0xff] }
 0x426   : > { %v6997_v48 = vmul.u32.u64.low %v2916_v63, %v2911_v16  ;;  %v6998_v13 = vmul.u32.u64.high %v2916_v63, %v2911_v16, %v6997_v48  ;;  %v4107_v49 = vadd.s32 4294967169, %v3184_v44  ;;  %v4101_v32 = vadd.s32 4294967294, %v3040_v11 }
 0x427   : > { %v7002_v37 = vmul.u32.u64.low %v2916_v63, %v2915_v43  ;;  %v7003_v5 = vmul.u32.u64.high %v2916_v63, %v2915_v43, %v7002_v37  ;;  %vm2756_vm6 = vcmp.eq.s32.totalorder %v6960_v20, 0  ;;  %vm2759_vm14 = vcmp.eq.s32.totalorder %v6960_v20, 2 }
 0x428   : > { %v2907_v56 = vsel %vm2901_vm11, %v2904_v31, %v2906_v27  ;;  %v3190_v22 = vadd.s32 1, %v4107_v49  ;;  %v4604_v54 = vpop.eup %4603  ;;  %v3028_v62 = vadd.s32 %v6907_v26, %v6904_v58  ;;  %vm4102_vm15 = vcmp.lt.s32.totalorder %v4101_v32, 0 }
 0x429   : > { %v3061_v3 = vsel %vm6966_vm3, 0, %v3059_v21  ;;  %v3180_v23 = vand.u32 2147483647, %v6939_v38  ;;  %v4606_v60 = vpop.eup %4605  ;;  %v2760_v51 = vxor.u32 2147483648, %v4604_v54  ;;  %v3043_v28 = vsel %vm4102_vm15, 0, %v4101_v32 }
 0x42a   : > { %v2926_v53 = vadd.s32 1, %v6998_v13  ;;  %vm3191_vm0 = vcmp.gt.s32.totalorder %v3190_v22, 0  ;;  %v2757_v59 = vxor.u32 2147483648, %v4606_v60  ;;  %v3044_v41 = vsub.s32 32, %v3043_v28 }
 0x42b   : > { %v3048_v36 = vsub.s32 4294967266, %v3043_v28  ;;  %v2923_v2 = vmul.u32 %v2916_v63, %v2907_v56  ;;  %v2761_v58 = vsel %vm2759_vm14, %v2760_v51, %v4606_v60  ;;  %v3045_v26 = vshll.u32 %v6962_v15, %v3043_v28 }
 0x42c   : > { %vm2925_vm13 = vc.u32 %v7003_v5, %v6997_v48  ;;  %v3192_v0 = vsel %vm3191_vm0, %v3190_v22, 0  ;;  %v2758_v12 = vsel %vm2756_vm6, %v4604_v54, %v2757_v59  ;;  %v3046_v55 = vshrl.u32 %v3028_v62, %v3044_v41 }
 0x42d   : > { %v3049_v61 = vadd.s32 127, %v3048_v36  ;;  %v2927_v47 = vsel %vm2925_vm13, %v2926_v53, %v6998_v13  ;;  %v2762_v9 = vsel %vm2755_vm7, %v2758_v12, %v2761_v58  ;;  %v3065_v8 = vadd.s32 3, %v3061_v3 }
 0x42e   : > { %v2928_v18 = vadd.s32 %v2927_v47, %v2923_v2  ;;  %v3194_v40 = vand.u32 31, %v3192_v0  ;;  %v2763_v15 = vsel %vm2752_vm12, nan, %v2762_v9  ;;  %v3047_v7 = vor.u32 %v3046_v55, %v3045_v26 }
 0x42f   : > { %v3050_v50 = vshll.u32 %v3049_v61, 23  ;;  %v3912_v16 = vadd.f32 %v4654_v46, %v2763_v15  ;;  %v3187_v63 = vand.u32 8388607, %v3180_v23  ;;  %v7033_v20 = vand.u32 3, %v3065_v8 }
 0x430   : > { %v2929_v35 = vadd.s32 536870912, %v2928_v18  ;;  %v3195_v44 = vsub.s32 32, %v3194_v40  ;;  %v3054_v21 = vcvt.s32.f32 %v3047_v7  ;;  %v3197_v56 = vshll.u32 %v7756_v4, %v3194_v40 }
 0x431   : > { %v3051_v11 = vor.u32 4788187, %v3050_v50  ;;  %3928 = vst [vmem:[%s6638_s8 + $0x20] sm:$0xff] %v3912_v16  ;;  %v3188_v37 = vor.u32 8388608, %v3187_v63  ;;  %v3203_v22 = vshll.u32 %v7753_v24, %v3194_v40  ;;  %v3193_v62 = vshrl.u32 %v3192_v0, 5 }
 0x432   : > { %v2930_v31 = vshrl.u32 %v2929_v35, 30  ;;  %v3198_v27 = vshrl.u32 %v7752_v52, %v3195_v44  ;;  %v3201_v42 = vshrl.u32 %v7753_v24, %v3195_v44  ;;  %v3204_v13 = vshrl.u32 %v7755_v30, %v3195_v44 }
 0x433   : > { %v3052_v43 = vand.u32 2147483647, %v3051_v11  ;;  %v3207_v49 = vshrl.u32 %v7743_v19, %v3195_v44  ;;  %v3200_v3 = vshll.u32 %v7752_v52, %v3194_v40  ;;  %v3206_v60 = vshll.u32 %v7755_v30, %v3194_v40 }
 0x434   : > { %v2931_v32 = vshll.u32 %v2930_v31, 30  ;;  %v3199_v28 = vor.u32 %v3198_v27, %v3197_v56  ;;  %v3205_v53 = vor.u32 %v3204_v13, %v3203_v22  ;;  %v3210_v59 = vshrl.u32 %v7745_v17, %v3195_v44 }
 0x435   : > { %v3055_v54 = vmul.f32 %v3054_v21, %v3052_v43  ;;  %v3202_v36 = vor.u32 %v3201_v42, %v3200_v3  ;;  %v3208_v2 = vor.u32 %v3207_v49, %v3206_v60  ;;  %v3209_v58 = vshll.u32 %v7743_v19, %v3194_v40 }
 0x436   : > { %v7043_v51 = vsub.s32 %v2928_v18, %v2931_v32  ;;  %v3196_v12 = vshrl.u32 %v7756_v4, %v3195_v44  ;;  %v3228_v0 = vshll.u32 %v3188_v37, 8  ;;  %v7051_v55 = vadd.f32 %v6817_v45, %v6549_v25 }
 0x437   : > { %v3056_v41 = vxor.u32 2147483648, %v3055_v54  ;;  %v2954_v47 = vsub.s32 4, %v2930_v31  ;;  %v3211_v9 = vor.u32 %v3210_v59, %v3209_v58  ;;  %vm3215_vm10 = vcmp.lt.s32.totalorder %v3193_v62, 4 }
 0x438   : > { %v2934_v26 = vsub.s32 0, %v7043_v51  ;;  %vm3212_vm1 = vcmp.lt.s32.totalorder %v3193_v62, 1  ;;  %v3217_v40 = vsel %vm3215_vm10, %v3205_v53, 2102212464  ;;  %vm3213_vm2 = vcmp.lt.s32.totalorder %v3193_v62, 2 }
 0x439   : > { %v3057_v61 = vsel %vm2974_vm9, %v3056_v41, %v3055_v54  ;;  %v3220_v15 = vsel %vm3212_vm1, %v3199_v28, %v3202_v36  ;;  %v3221_v25 = vsel %vm3215_vm10, %v3208_v2, 920167782  ;;  %vm3214_vm9 = vcmp.lt.s32.totalorder %v3193_v62, 3 }
 0x43a   : > { %v3060_v8 = vsel %vm6966_vm3, %v6772_v33, %v3057_v61  ;;  %v4096_v18 = vmin.u32 %v2934_v26, %v7043_v51  ;;  %v3224_v50 = vsel %vm3212_vm1, %v3202_v36, %v3205_v53  ;;  %v3216_v46 = vsel %vm3212_vm1, %v3196_v12, %v3199_v28 }
 0x43b   : > { %4607 = vcosq.f32 %v3060_v8  ;;  %v3218_v16 = vsel %vm3214_vm9, %v3202_v36, %v3217_v40  ;;  %v3222_v35 = vsel %vm3214_vm9, %v3205_v53, %v3221_v25  ;;  %v3225_v39 = vsel %vm3215_vm10, %v3211_v9, 1326507024 }
 0x43c   : > { %4609 = vsinq.f32 %v3060_v8  ;;  %v2936_v7 = vclz %v4096_v18  ;;  %vm2870_vm3 = vcmp.lt.s32.totalorder %v6821_v6, 0  ;;  %v3223_v44 = vsel %vm3213_vm2, %v3220_v15, %v3222_v35 }
 0x43d   : > { %v3226_v11 = vsel %vm3214_vm9, %v3208_v2, %v3225_v39  ;;  %v2955_v21 = vsel %vm2870_vm3, %v2954_v47, %v2930_v31  ;;  %v7067_v43 = vmul.u32.u64.low %v3228_v0, %v3223_v44  ;;  %v7068_v42 = vmul.u32.u64.high %v3228_v0, %v3223_v44, %v7067_v43  ;;  %v7093_v2 = vpop.f32.mrb[15].mxu1 }
 0x43e   : > { %v4097_v63 = vadd.s32 4294967294, %v2936_v7  ;;  %v3227_v27 = vsel %vm3213_vm2, %v3224_v50, %v3226_v11  ;;  %v3219_v13 = vsel %vm3213_vm2, %v3216_v46, %v3218_v16  ;;  %vm3067_vm5 = vcmp.lt.s32.totalorder %v7033_v20, 2 }
 0x43f   : > { %v7072_v49 = vmul.u32.u64.low %v3228_v0, %v3227_v27  ;;  %v7073_v32 = vmul.u32.u64.high %v3228_v0, %v3227_v27, %v7072_v49  ;;  %vm7078_vm4 = vcmp.le.f32.partialorder %v2868_v14, 0.7853982  ;;  %v3079_v56 = vand.u32 2139095040, %v7051_v55 }
 0x440   : > { %vm4098_vm8 = vcmp.lt.s32.totalorder %v4097_v63, 0  ;;  %vm3064_vm11 = vweird.f32 %v6772_v33  ;;  %v2924_v22 = vadd.s32 %v6997_v48, %v7003_v5  ;;  %v2957_v3 = vsel %vm7078_vm4, 0, %v2955_v21  ;;  %v4655_v21 = vld [vmem:[%s4744_s11 + $0x38] sm:$0xff] }
 0x441   : > { %v2939_v31 = vsel %vm4098_vm8, 0, %v4097_v63  ;;  %v3235_v60 = vmul.u32 %v3228_v0, %v3219_v13  ;;  %v3238_v28 = vadd.s32 1, %v7068_v42  ;;  %v3076_v14 = vand.u32 2147483647, %v7051_v55 }
 0x442   : > { %v2940_v54 = vsub.s32 32, %v2939_v31  ;;  %v2944_v62 = vsub.s32 4294967266, %v2939_v31  ;;  %v3080_v53 = vshrl.u32 %v3079_v56, 23  ;;  %v2941_v59 = vshll.u32 %v7043_v51, %v2939_v31 }
 0x443   : > { %vm3237_vm12 = vc.u32 %v7073_v32, %v7067_v43  ;;  %vm3068_vm7 = vcmp.eq.s32.totalorder %v7033_v20, 0  ;;  %v7099_v26 = vadd.f32 %v6817_v45, %v6670_v57  ;;  %vm3071_vm6 = vcmp.eq.s32.totalorder %v7033_v20, 2 }
 0x444   : > { %v2942_v41 = vshrl.u32 %v2924_v22, %v2940_v54  ;;  %v2945_v36 = vadd.s32 127, %v2944_v62  ;;  %v3239_v5 = vsel %vm3237_vm12, %v3238_v28, %v7068_v42  ;;  %v4103_v58 = vadd.s32 4294967169, %v3080_v53 }
 0x445   : > { %v4608_v48 = vpop.eup %4607  ;;  %v3240_v47 = vadd.s32 %v3239_v5, %v3235_v60  ;;  %v2961_v8 = vadd.s32 3, %v2957_v3  ;;  %v3083_v7 = vand.u32 8388607, %v3076_v14  ;;  %v3391_v46 = vand.u32 2139095040, %v7099_v26 }
 0x446   : > { %v4610_v12 = vpop.eup %4609  ;;  %v3072_v0 = vxor.u32 2147483648, %v4608_v48  ;;  %v2943_v51 = vor.u32 %v2942_v41, %v2941_v59  ;;  %v2946_v61 = vshll.u32 %v2945_v36, 23  ;;  %v3086_v18 = vadd.s32 1, %v4103_v58 }
 0x447   : > { %v3069_v9 = vxor.u32 2147483648, %v4610_v12  ;;  %v3241_v25 = vadd.s32 536870912, %v3240_v47  ;;  %v7115_v49 = vand.u32 3, %v2961_v8  ;;  %v3084_v31 = vor.u32 8388608, %v3083_v7 }
 0x448   : > { %v3073_v40 = vsel %vm3071_vm6, %v3072_v0, %v4610_v12  ;;  %v2947_v15 = vor.u32 4788187, %v2946_v61  ;;  %v2950_v50 = vcvt.s32.f32 %v2943_v51  ;;  %vm3087_vm14 = vcmp.gt.s32.totalorder %v3086_v18, 0 }
 0x449   : > { %v3070_v57 = vsel %vm3068_vm7, %v4608_v48, %v3069_v9  ;;  %v7109_v39 = vshrl.u32 %v3241_v25, 30  ;;  %v3088_v63 = vsel %vm3087_vm14, %v3086_v18, 0  ;;  %v3392_v62 = vshrl.u32 %v3391_v46, 23 }
 0x44a   : > { %v3074_v16 = vsel %vm3067_vm5, %v3070_v57, %v3073_v40  ;;  %v2948_v35 = vand.u32 2147483647, %v2947_v15  ;;  %v3090_v11 = vand.u32 31, %v3088_v63  ;;  %v7120_v54 = vshrl.u32 %v3088_v63, 5 }
 0x44b   : > { %v3075_v44 = vsel %vm3064_vm11, nan, %v3074_v16  ;;  %v3243_v13 = vshll.u32 %v7109_v39, 30  ;;  %vm3182_vm15 = vcmp.lt.s32.totalorder %v6939_v38, 0  ;;  %v3236_v37 = vadd.s32 %v7067_v43, %v7073_v32 }
 0x44c   : > { %v3915_v27 = vadd.f32 %v4655_v21, %v3075_v44  ;;  %v2951_v42 = vmul.f32 %v2950_v50, %v2948_v35  ;;  %v3091_v56 = vsub.s32 32, %v3090_v11  ;;  %v3093_v33 = vshll.u32 %v7756_v4, %v3090_v11 }
 0x44d   : > { %v7118_v22 = vsub.s32 %v3240_v47, %v3243_v13  ;;  %v3096_v60 = vshll.u32 %v7752_v52, %v3090_v11  ;;  %v3099_v41 = vshll.u32 %v7753_v24, %v3090_v11  ;;  %v3102_v58 = vshll.u32 %v7755_v30, %v3090_v11 }
 0x44e   : > { %3931 = vst [vmem:[%s6638_s8 + $0x38] sm:$0xff] %v3915_v27  ;;  %v2952_v20 = vxor.u32 2147483648, %v2951_v42  ;;  %v3094_v3 = vshrl.u32 %v7752_v52, %v3091_v56  ;;  %v3097_v28 = vshrl.u32 %v7753_v24, %v3091_v56  ;;  %v3100_v36 = vshrl.u32 %v7755_v30, %v3091_v56 }
 0x44f   : > { %v3246_v59 = vsub.s32 0, %v7118_v22  ;;  %v3103_v12 = vshrl.u32 %v7743_v19, %v3091_v56  ;;  %v3105_v9 = vshll.u32 %v7743_v19, %v3090_v11  ;;  %v3106_v8 = vshrl.u32 %v7745_v17, %v3091_v56 }
 0x450   : > { %v2953_v53 = vsel %vm2870_vm3, %v2952_v20, %v2951_v42  ;;  %v3095_v5 = vor.u32 %v3094_v3, %v3093_v33  ;;  %v3098_v51 = vor.u32 %v3097_v28, %v3096_v60  ;;  %v3101_v61 = vor.u32 %v3100_v36, %v3099_v41 }
 0x451   : > { %v2956_v48 = vsel %vm7078_vm4, %v6821_v6, %v2953_v53  ;;  %v4108_v0 = vmin.u32 %v3246_v59, %v7118_v22  ;;  %v3104_v47 = vor.u32 %v3103_v12, %v3102_v58  ;;  %v7142_v40 = vshll.u32 %v3084_v31, 8 }
 0x452   : > { %4611 = vcosq.f32 %v2956_v48  ;;  %v3092_v15 = vshrl.u32 %v7756_v4, %v3091_v56  ;;  %v3107_v25 = vor.u32 %v3106_v8, %v3105_v9  ;;  %vm3108_vm0 = vcmp.lt.s32.totalorder %v7120_v54, 1 }
 0x453   : > { %4613 = vsinq.f32 %v2956_v48  ;;  %v3248_v18 = vclz %v4108_v0  ;;  %v4115_v7 = vadd.s32 4294967169, %v3392_v62  ;;  %vm3110_vm13 = vcmp.lt.s32.totalorder %v7120_v54, 3 }
 0x454   : > { %vm3111_vm10 = vcmp.lt.s32.totalorder %v7120_v54, 4  ;;  %v3116_v50 = vsel %vm3108_vm0, %v3095_v5, %v3098_v51  ;;  %vm2964_vm1 = vcmp.eq.s32.totalorder %v7115_v49, 0  ;;  %v3120_v46 = vsel %vm3108_vm0, %v3098_v51, %v3101_v61 }
 0x455   : > { %v4109_v57 = vadd.s32 4294967294, %v3248_v18  ;;  %v3113_v43 = vsel %vm3111_vm10, %v3101_v61, 2102212464  ;;  %v3117_v32 = vsel %vm3111_vm10, %v3104_v47, 920167782  ;;  %vm2963_vm2 = vcmp.lt.s32.totalorder %v7115_v49, 2 }
 0x456   : > { %v3121_v16 = vsel %vm3111_vm10, %v3107_v25, 1326507024  ;;  %vm7156_vm9 = vcmp.le.f32.partialorder %v3180_v23, 0.7853982  ;;  %vm3109_vm8 = vcmp.lt.s32.totalorder %v7120_v54, 2  ;;  %v3118_v63 = vsel %vm3110_vm13, %v3101_v61, %v3117_v32  ;;  %v4656_v32 = vld [vmem:[%s4744_s11 + $0x30] sm:$0xff] }
 0x457   : > { %vm4110_vm3 = vcmp.lt.s32.totalorder %v4109_v57, 0  ;;  %v3122_v44 = vsel %vm3110_vm13, %v3104_v47, %v3121_v16  ;;  %vm2960_vm5 = vweird.f32 %v6821_v6  ;;  %v3266_v21 = vsub.s32 4, %v7109_v39 }
 0x458   : > { %v3251_v11 = vsel %vm4110_vm3, 0, %v4109_v57  ;;  %v3119_v23 = vsel %vm3109_vm8, %v3116_v50, %v3118_v63  ;;  %v3123_v27 = vsel %vm3109_vm8, %v3120_v46, %v3122_v44  ;;  %v3112_v31 = vsel %vm3108_vm0, %v3092_v15, %v3095_v5 }
 0x459   : > { %v3252_v42 = vsub.s32 32, %v3251_v11  ;;  %v3256_v13 = vsub.s32 4294967266, %v3251_v11  ;;  %v3114_v56 = vsel %vm3110_vm13, %v3098_v51, %v3113_v43  ;;  %v3253_v28 = vshll.u32 %v7118_v22, %v3251_v11 }
 0x45a   : > { %v7176_v20 = vmul.u32.u64.low %v7142_v40, %v3123_v27  ;;  %v7177_v62 = vmul.u32.u64.high %v7142_v40, %v3123_v27, %v7176_v20  ;;  %v7180_v33 = vmul.u32.u64.low %v7142_v40, %v3119_v23  ;;  %v7181_v3 = vmul.u32.u64.high %v7142_v40, %v3119_v23, %v7180_v33 }
 0x45b   : > { %v3254_v53 = vshrl.u32 %v3236_v37, %v3252_v42  ;;  %v3257_v59 = vadd.s32 127, %v3256_v13  ;;  %v3398_v41 = vadd.s32 1, %v4115_v7  ;;  %vm2967_vm4 = vcmp.eq.s32.totalorder %v7115_v49, 2 }
 0x45c   : > { %v4612_v60 = vpop.eup %4611  ;;  %v3267_v5 = vsel %vm3182_vm15, %v3266_v21, %v7109_v39  ;;  %v3115_v58 = vsel %vm3109_vm8, %v3112_v31, %v3114_v56  ;;  %vm3133_vm12 = vc.u32 %v7177_v62, %v7180_v33  ;;  %v3134_v22 = vadd.s32 1, %v7181_v3 }
 0x45d   : > { %v4614_v36 = vpop.eup %4613  ;;  %v2968_v48 = vxor.u32 2147483648, %v4612_v60  ;;  %v3255_v0 = vor.u32 %v3254_v53, %v3253_v28  ;;  %v3258_v51 = vshll.u32 %v3257_v59, 23  ;;  %vm3399_vm11 = vcmp.gt.s32.totalorder %v3398_v41, 0 }
 0x45e   : > { %v2965_v12 = vxor.u32 2147483648, %v4614_v36  ;;  %v3388_v47 = vand.u32 2147483647, %v7099_v26  ;;  %v3131_v54 = vmul.u32 %v7142_v40, %v3115_v58  ;;  %v3400_v8 = vsel %vm3399_vm11, %v3398_v41, 0 }
 0x45f   : > { %v2969_v61 = vsel %vm2967_vm4, %v2968_v48, %v4614_v36  ;;  %v3259_v39 = vor.u32 4788187, %v3258_v51  ;;  %v3269_v18 = vsel %vm7156_vm9, 0, %v3267_v5  ;;  %v3135_v15 = vsel %vm3133_vm12, %v3134_v22, %v7181_v3 }
 0x460   : > { %v2966_v9 = vsel %vm2964_vm1, %v4612_v60, %v2965_v12  ;;  %v3402_v25 = vand.u32 31, %v3400_v8  ;;  %v3262_v50 = vcvt.s32.f32 %v3255_v0  ;;  %v3136_v43 = vadd.s32 %v3135_v15, %v3131_v54 }
 0x461   : > { %v2970_v37 = vsel %vm2963_vm2, %v2966_v9, %v2969_v61  ;;  %v3260_v57 = vand.u32 2147483647, %v3259_v39  ;;  %v3395_v40 = vand.u32 8388607, %v3388_v47  ;;  %v3273_v63 = vadd.s32 3, %v3269_v18 }
 0x462   : > { %v2971_v7 = vsel %vm2960_vm5, nan, %v2970_v37  ;;  %v3403_v49 = vsub.s32 32, %v3402_v25  ;;  %v3137_v44 = vadd.s32 536870912, %v3136_v43  ;;  %v3401_v11 = vshrl.u32 %v3400_v8, 5 }
 0x463   : > { %v3914_v46 = vadd.f32 %v4656_v32, %v2971_v7  ;;  %v3263_v16 = vmul.f32 %v3262_v50, %v3260_v57  ;;  %v3405_v21 = vshll.u32 %v7756_v4, %v3402_v25  ;;  %v3408_v31 = vshll.u32 %v7752_v52, %v3402_v25 }
 0x464   : > { %v3406_v23 = vshrl.u32 %v7752_v52, %v3403_v49  ;;  %v3409_v6 = vshrl.u32 %v7753_v24, %v3403_v49  ;;  %v3412_v27 = vshrl.u32 %v7755_v30, %v3403_v49  ;;  %v3138_v13 = vshrl.u32 %v3137_v44, 30 }
 0x465   : > { %3930 = vst [vmem:[%s6638_s8 + $0x30] sm:$0xff] %v3914_v46  ;;  %v3264_v42 = vxor.u32 2147483648, %v3263_v16  ;;  %v3415_v56 = vshrl.u32 %v7743_v19, %v3403_v49  ;;  %v3411_v20 = vshll.u32 %v7753_v24, %v3402_v25  ;;  %v3414_v3 = vshll.u32 %v7755_v30, %v3402_v25 }
 0x466   : > { %v3417_v60 = vshll.u32 %v7743_v19, %v3402_v25  ;;  %v3418_v28 = vshrl.u32 %v7745_v17, %v3403_v49  ;;  %v3139_v59 = vshll.u32 %v3138_v13, 30  ;;  %v3407_v41 = vor.u32 %v3406_v23, %v3405_v21 }
 0x467   : > { %v3265_v53 = vsel %vm3182_vm15, %v3264_v42, %v3263_v16  ;;  %v3410_v36 = vor.u32 %v3409_v6, %v3408_v31  ;;  %v3413_v5 = vor.u32 %v3412_v27, %v3411_v20  ;;  %v3416_v58 = vor.u32 %v3415_v56, %v3414_v3 }
 0x468   : > { %v3268_v48 = vsel %vm7156_vm9, %v6939_v38, %v3265_v53  ;;  %v3419_v12 = vor.u32 %v3418_v28, %v3417_v60  ;;  %v7224_v0 = vsub.s32 %v3136_v43, %v3139_v59  ;;  %v7228_v51 = vadd.f32 %v6817_v45, %v6726_v34 }
 0x469   : > { %4615 = vcosq.f32 %v3268_v48  ;;  %v3274_v61 = vand.u32 3, %v3273_v63  ;;  %vm3078_vm7 = vcmp.lt.s32.totalorder %v7051_v55, 0  ;;  %v3396_v22 = vor.u32 8388608, %v3395_v40 }
 0x46a   : > { %4617 = vsinq.f32 %v3268_v48  ;;  %vm3420_vm6 = vcmp.lt.s32.totalorder %v3401_v11, 1  ;;  %v3142_v9 = vsub.s32 0, %v7224_v0  ;;  %vm3422_vm14 = vcmp.lt.s32.totalorder %v3401_v11, 3 }
 0x46b   : > { %vm3423_vm15 = vcmp.lt.s32.totalorder %v3401_v11, 4  ;;  %v3428_v35 = vsel %vm3420_vm6, %v3407_v41, %v3410_v36  ;;  %v3404_v39 = vshrl.u32 %v7756_v4, %v3403_v49  ;;  %vm3421_vm0 = vcmp.lt.s32.totalorder %v3401_v11, 2 }
 0x46c   : > { %v3425_v54 = vsel %vm3423_vm15, %v3413_v5, 2102212464  ;;  %v3429_v8 = vsel %vm3423_vm15, %v3416_v58, 920167782  ;;  %v3433_v37 = vsel %vm3423_vm15, %v3419_v12, 1326507024  ;;  %v4104_v34 = vmin.u32 %v3142_v9, %v7224_v0 }
 0x46d   : > { %v3430_v45 = vsel %vm3422_vm14, %v3413_v5, %v3429_v8  ;;  %v3432_v18 = vsel %vm3420_vm6, %v3410_v36, %v3413_v5  ;;  %v3434_v25 = vsel %vm3422_vm14, %v3416_v58, %v3433_v37  ;;  %v3436_v7 = vshll.u32 %v3396_v22, 8 }
 0x46e   : > { %v3431_v15 = vsel %vm3421_vm0, %v3428_v35, %v3430_v45  ;;  %v3287_v57 = vand.u32 2139095040, %v7228_v51  ;;  %v3144_v50 = vclz %v4104_v34  ;;  %v3162_v43 = vsub.s32 4, %v3138_v13  ;;  %v4657_v34 = vld [vmem:[%s4744_s11 + $0x48] sm:$0xff] }
 0x46f   : > { %v3424_v32 = vsel %vm3420_vm6, %v3404_v39, %v3407_v41  ;;  %v3426_v46 = vsel %vm3422_vm14, %v3410_v36, %v3425_v54  ;;  %vm3272_vm13 = vweird.f32 %v6939_v38  ;;  %vm7245_vm10 = vcmp.le.f32.partialorder %v3076_v14, 0.7853982 }
 0x470   : > { %v3435_v49 = vsel %vm3421_vm0, %v3432_v18, %v3434_v25  ;;  %v7250_v16 = vmul.u32.u64.low %v3436_v7, %v3431_v15  ;;  %v7251_v63 = vmul.u32.u64.high %v3436_v7, %v3431_v15, %v7250_v16  ;;  %v3288_v44 = vshrl.u32 %v3287_v57, 23  ;;  %v7281_v25 = vld [vmem:[%s7672_s4] ss:$0 sm:$0xff] }
 0x471   : > { %vm3275_vm1 = vcmp.lt.s32.totalorder %v3274_v61, 2  ;;  %v4105_v21 = vadd.s32 4294967294, %v3144_v50  ;;  %v7254_v23 = vmul.u32.u64.low %v3436_v7, %v3435_v49  ;;  %v7255_v6 = vmul.u32.u64.high %v3436_v7, %v3435_v49, %v7254_v23 }
 0x472   : > { %vm3276_vm2 = vcmp.eq.s32.totalorder %v3274_v61, 0  ;;  %vm3279_vm9 = vcmp.eq.s32.totalorder %v3274_v61, 2  ;;  %v3427_v27 = vsel %vm3421_vm0, %v3424_v32, %v3426_v46  ;;  %v4111_v14 = vadd.s32 4294967169, %v3288_v44 }
 0x473   : > { %v4616_v42 = vpop.eup %4615  ;;  %v3132_v31 = vadd.s32 %v7180_v33, %v7177_v62  ;;  %vm4106_vm3 = vcmp.lt.s32.totalorder %v4105_v21, 0  ;;  %v3163_v56 = vsel %vm3078_vm7, %v3162_v43, %v3138_v13  ;;  %v3284_v20 = vand.u32 2147483647, %v7228_v51 }
 0x474   : > { %v4618_v3 = vpop.eup %4617  ;;  %v3280_v60 = vxor.u32 2147483648, %v4616_v42  ;;  %v3147_v28 = vsel %vm4106_vm3, 0, %v4105_v21  ;;  %v3446_v53 = vadd.s32 1, %v7251_v63  ;;  %v3294_v59 = vadd.s32 1, %v4111_v14 }
 0x475   : > { %v3277_v41 = vxor.u32 2147483648, %v4618_v3  ;;  %v3148_v11 = vsub.s32 32, %v3147_v28  ;;  %v3152_v36 = vsub.s32 4294967266, %v3147_v28  ;;  %v3443_v48 = vmul.u32 %v3436_v7, %v3427_v27 }
 0x476   : > { %v3281_v5 = vsel %vm3279_vm9, %v3280_v60, %v4618_v3  ;;  %v3149_v62 = vshll.u32 %v7224_v0, %v3147_v28  ;;  %vm3445_vm8 = vc.u32 %v7255_v6, %v7250_v16  ;;  %vm3295_vm5 = vcmp.gt.s32.totalorder %v3294_v59, 0 }
 0x477   : > { %v3278_v33 = vsel %vm3276_vm2, %v4616_v42, %v3277_v41  ;;  %v3150_v13 = vshrl.u32 %v3132_v31, %v3148_v11  ;;  %v3153_v58 = vadd.s32 127, %v3152_v36  ;;  %v3447_v12 = vsel %vm3445_vm8, %v3446_v53, %v7251_v63 }
 0x478   : > { %v3282_v22 = vsel %vm3275_vm1, %v3278_v33, %v3281_v5  ;;  %v3448_v9 = vadd.s32 %v3447_v12, %v3443_v48  ;;  %v3291_v35 = vand.u32 8388607, %v3284_v20  ;;  %v3296_v39 = vsel %vm3295_vm5, %v3294_v59, 0 }
 0x479   : > { %v3283_v0 = vsel %vm3272_vm13, nan, %v3282_v22  ;;  %v3151_v54 = vor.u32 %v3150_v13, %v3149_v62  ;;  %v3154_v8 = vshll.u32 %v3153_v58, 23  ;;  %v3165_v37 = vsel %vm7245_vm10, 0, %v3163_v56 }
 0x47a   : > { %v3917_v45 = vadd.f32 %v4657_v34, %v3283_v0  ;;  %v3449_v18 = vadd.s32 536870912, %v3448_v9  ;;  %v3298_v15 = vand.u32 31, %v3296_v39  ;;  %v7285_v7 = vadd.f32 %v7281_v25, %v6823_v10 }
 0x47b   : > { %v3155_v61 = vor.u32 4788187, %v3154_v8  ;;  %v3169_v38 = vadd.s32 3, %v3165_v37  ;;  %v3292_v50 = vor.u32 8388608, %v3291_v35  ;;  %v3158_v46 = vcvt.s32.f32 %v3151_v54 }
 0x47c   : > { %3933 = vst [vmem:[%s6638_s8 + $0x48] sm:$0xff] %v3917_v45  ;;  %v3450_v57 = vshrl.u32 %v3449_v18, 30  ;;  %v3299_v43 = vsub.s32 32, %v3298_v15  ;;  %v7288_v49 = vshrl.u32 %v3296_v39, 5  ;;  %v3301_v63 = vshll.u32 %v7756_v4, %v3298_v15 }
 0x47d   : > { %v3156_v32 = vand.u32 2147483647, %v3155_v61  ;;  %v3304_v23 = vshll.u32 %v7752_v52, %v3298_v15  ;;  %v3307_v27 = vshll.u32 %v7753_v24, %v3298_v15  ;;  %v7297_v56 = vand.u32 3, %v3169_v38 }
 0x47e   : > { %v3451_v44 = vshll.u32 %v3450_v57, 30  ;;  %v3302_v21 = vshrl.u32 %v7752_v52, %v3299_v43  ;;  %v3305_v14 = vshrl.u32 %v7753_v24, %v3299_v43  ;;  %v3308_v42 = vshrl.u32 %v7755_v30, %v3299_v43 }
 0x47f   : > { %v3159_v10 = vmul.f32 %v3158_v46, %v3156_v32  ;;  %v3311_v31 = vshrl.u32 %v7743_v19, %v3299_v43  ;;  %v3310_v60 = vshll.u32 %v7755_v30, %v3298_v15  ;;  %v3314_v28 = vshrl.u32 %v7745_v17, %v3299_v43 }
 0x480   : > { %v7299_v3 = vsub.s32 %v3448_v9, %v3451_v44  ;;  %vm3390_vm4 = vcmp.lt.s32.totalorder %v7099_v26, 0  ;;  %v3303_v59 = vor.u32 %v3302_v21, %v3301_v63  ;;  %v3306_v41 = vor.u32 %v3305_v14, %v3304_v23 }
 0x481   : > { %v3160_v53 = vxor.u32 2147483648, %v3159_v10  ;;  %v3309_v11 = vor.u32 %v3308_v42, %v3307_v27  ;;  %v3312_v48 = vor.u32 %v3311_v31, %v3310_v60  ;;  %v3313_v5 = vshll.u32 %v7743_v19, %v3298_v15 }
 0x482   : > { %v3454_v36 = vsub.s32 0, %v7299_v3  ;;  %v3599_v62 = vand.u32 2139095040, %v7285_v7  ;;  %v3300_v13 = vshrl.u32 %v7756_v4, %v3299_v43  ;;  %vm3316_vm11 = vcmp.lt.s32.totalorder %v7288_v49, 1 }
 0x483   : > { %v3161_v33 = vsel %vm3078_vm7, %v3160_v53, %v3159_v10  ;;  %v3332_v58 = vshll.u32 %v3292_v50, 8  ;;  %v3315_v9 = vor.u32 %v3314_v28, %v3313_v5  ;;  %vm3319_vm12 = vcmp.lt.s32.totalorder %v7288_v49, 4 }
 0x484   : > { %v3164_v12 = vsel %vm7245_vm10, %v7051_v55, %v3161_v33  ;;  %v4116_v22 = vmin.u32 %v3454_v36, %v7299_v3  ;;  %vm7318_vm6 = vcmp.le.f32.partialorder %v3388_v47, 0.7853982  ;;  %v3321_v39 = vsel %vm3319_vm12, %v3309_v11, 2102212464 }
 0x485   : > { %4619 = vcosq.f32 %v3164_v12  ;;  %v3324_v0 = vsel %vm3316_vm11, %v3303_v59, %v3306_v41  ;;  %v3325_v40 = vsel %vm3319_vm12, %v3312_v48, 920167782  ;;  %v3474_v8 = vsub.s32 4, %v3450_v57 }
 0x486   : > { %4621 = vsinq.f32 %v3164_v12  ;;  %v3456_v54 = vclz %v4116_v22  ;;  %vm3318_vm7 = vcmp.lt.s32.totalorder %v7288_v49, 3  ;;  %vm3317_vm14 = vcmp.lt.s32.totalorder %v7288_v49, 2 }
 0x487   : > { %v3320_v47 = vsel %vm3316_vm11, %v3300_v13, %v3303_v59  ;;  %v3326_v37 = vsel %vm3318_vm7, %v3309_v11, %v3325_v40  ;;  %v3328_v34 = vsel %vm3316_vm11, %v3306_v41, %v3309_v11  ;;  %v3322_v18 = vsel %vm3318_vm7, %v3306_v41, %v3321_v39 }
 0x488   : > { %v4117_v45 = vadd.s32 4294967294, %v3456_v54  ;;  %v3327_v15 = vsel %vm3317_vm14, %v3324_v0, %v3326_v37  ;;  %v3329_v61 = vsel %vm3319_vm12, %v3315_v9, 1326507024  ;;  %v3600_v32 = vshrl.u32 %v3599_v62, 23 }
 0x489   : > { %v3330_v38 = vsel %vm3318_vm7, %v3312_v48, %v3329_v61  ;;  %v7338_v50 = vmul.u32.u64.low %v3332_v58, %v3327_v15  ;;  %v7339_v43 = vmul.u32.u64.high %v3332_v58, %v3327_v15, %v7338_v50  ;;  %v3475_v46 = vsel %vm3390_vm4, %v3474_v8, %v3450_v57 }
 0x48a   : > { %vm4118_vm15 = vcmp.lt.s32.totalorder %v4117_v45, 0  ;;  %v3331_v63 = vsel %vm3317_vm14, %v3328_v34, %v3330_v38  ;;  %v3596_v44 = vand.u32 2147483647, %v7285_v7  ;;  %v4123_v10 = vadd.s32 4294967169, %v3600_v32 }
 0x48b   : > { %v3459_v21 = vsel %vm4118_vm15, 0, %v4117_v45  ;;  %v7347_v23 = vmul.u32.u64.low %v3332_v58, %v3331_v63  ;;  %v7348_v27 = vmul.u32.u64.high %v3332_v58, %v3331_v63, %v7347_v23  ;;  %v3444_v14 = vadd.s32 %v7250_v16, %v7255_v6 }
 0x48c   : > { %v3460_v42 = vsub.s32 32, %v3459_v21  ;;  %v3464_v31 = vsub.s32 4294967266, %v3459_v21  ;;  %v3323_v60 = vsel %vm3317_vm14, %v3320_v47, %v3322_v18  ;;  %vm3171_vm0 = vcmp.lt.s32.totalorder %v7297_v56, 2 }
 0x48d   : > { %vm3172_vm13 = vcmp.eq.s32.totalorder %v7297_v56, 0  ;;  %v3342_v57 = vadd.s32 1, %v7339_v43  ;;  %v3606_v28 = vadd.s32 1, %v4123_v10  ;;  %v3461_v53 = vshll.u32 %v7299_v3, %v3459_v21 }
 0x48e   : > { %v3462_v59 = vshrl.u32 %v3444_v14, %v3460_v42  ;;  %v3465_v41 = vadd.s32 127, %v3464_v31  ;;  %v3477_v11 = vsel %vm7318_vm6, 0, %v3475_v46  ;;  %v3339_v6 = vmul.u32 %v3332_v58, %v3323_v60 }
 0x48f   : > { %v4620_v16 = vpop.eup %4619  ;;  %vm3341_vm10 = vc.u32 %v7348_v27, %v7338_v50  ;;  %v3603_v49 = vand.u32 8388607, %v3596_v44  ;;  %vm3607_vm1 = vcmp.gt.s32.totalorder %v3606_v28, 0  ;;  %vm3175_vm2 = vcmp.eq.s32.totalorder %v7297_v56, 2 }
 0x490   : > { %v4622_v36 = vpop.eup %4621  ;;  %v3176_v48 = vxor.u32 2147483648, %v4620_v16  ;;  %v3463_v5 = vor.u32 %v3462_v59, %v3461_v53  ;;  %v3466_v62 = vshll.u32 %v3465_v41, 23  ;;  %v3343_v3 = vsel %vm3341_vm10, %v3342_v57, %v7339_v43 }
 0x491   : > { %v3173_v33 = vxor.u32 2147483648, %v4622_v36  ;;  %v3344_v13 = vadd.s32 %v3343_v3, %v3339_v6  ;;  %v3608_v12 = vsel %vm3607_vm1, %v3606_v28, 0  ;;  %v3481_v9 = vadd.s32 3, %v3477_v11 }
 0x492   : > { %v3177_v58 = vsel %vm3175_vm2, %v3176_v48, %v4622_v36  ;;  %v3467_v22 = vor.u32 4788187, %v3466_v62  ;;  %v7368_v39 = vadd.f32 %v7281_v25, %v6911_v1  ;;  %v3604_v54 = vor.u32 8388608, %v3603_v49  ;;  %v4659_v1 = vld [vmem:[%s4744_s11 + $0x40] sm:$0xff] }
 0x493   : > { %v3174_v0 = vsel %vm3172_vm13, %v4620_v16, %v3173_v33  ;;  %v3345_v40 = vadd.s32 536870912, %v3344_v13  ;;  %v3610_v8 = vand.u32 31, %v3608_v12  ;;  %vm3168_vm9 = vweird.f32 %v7051_v55 }
 0x494   : > { %v3178_v47 = vsel %vm3171_vm0, %v3174_v0, %v3177_v58  ;;  %v3468_v37 = vand.u32 2147483647, %v3467_v22  ;;  %v3470_v34 = vcvt.s32.f32 %v3463_v5  ;;  %v7378_v43 = vand.u32 3, %v3481_v9 }
 0x495   : > { %v3179_v45 = vsel %vm3168_vm9, nan, %v3178_v47  ;;  %v7375_v18 = vshrl.u32 %v3345_v40, 30  ;;  %v3611_v15 = vsub.s32 32, %v3610_v8  ;;  %v3495_v32 = vand.u32 2139095040, %v7368_v39 }
 0x496   : > { %v3916_v61 = vadd.f32 %v4659_v1, %v3179_v45  ;;  %v3471_v38 = vmul.f32 %v3470_v34, %v3468_v37  ;;  %v3609_v55 = vshrl.u32 %v3608_v12, 5  ;;  %v7383_v63 = vshll.u32 %v3604_v54, 8 }
 0x497   : > { %v3347_v46 = vshll.u32 %v7375_v18, 30  ;;  %v3614_v56 = vshrl.u32 %v7752_v52, %v3611_v15  ;;  %v3617_v23 = vshrl.u32 %v7753_v24, %v3611_v15  ;;  %v3619_v10 = vshll.u32 %v7753_v24, %v3610_v8 }
 0x498   : > { %3932 = vst [vmem:[%s6638_s8 + $0x40] sm:$0xff] %v3916_v61  ;;  %v3472_v21 = vxor.u32 2147483648, %v3471_v38  ;;  %v3620_v14 = vshrl.u32 %v7755_v30, %v3611_v15  ;;  %v3613_v31 = vshll.u32 %v7756_v4, %v3610_v8  ;;  %v3616_v60 = vshll.u32 %v7752_v52, %v3610_v8 }
 0x499   : > { %v7389_v42 = vsub.s32 %v3344_v13, %v3347_v46  ;;  %v3623_v57 = vshrl.u32 %v7743_v19, %v3611_v15  ;;  %v3622_v59 = vshll.u32 %v7755_v30, %v3610_v8  ;;  %v3496_v41 = vshrl.u32 %v3495_v32, 23 }
 0x49a   : > { %v3473_v28 = vsel %vm3390_vm4, %v3472_v21, %v3471_v38  ;;  %v3621_v53 = vor.u32 %v3620_v14, %v3619_v10  ;;  %v3615_v6 = vor.u32 %v3614_v56, %v3613_v31  ;;  %v3618_v49 = vor.u32 %v3617_v23, %v3616_v60 }
 0x49b   : > { %v3476_v11 = vsel %vm7318_vm6, %v7099_v26, %v3473_v28  ;;  %v3350_v16 = vsub.s32 0, %v7389_v42  ;;  %v3624_v36 = vor.u32 %v3623_v57, %v3622_v59  ;;  %v3625_v48 = vshll.u32 %v7743_v19, %v3610_v8 }
 0x49c   : > { %4623 = vcosq.f32 %v3476_v11  ;;  %v3626_v5 = vshrl.u32 %v7745_v17, %v3611_v15  ;;  %vm3286_vm3 = vcmp.lt.s32.totalorder %v7228_v51, 0  ;;  %v3612_v3 = vshrl.u32 %v7756_v4, %v3611_v15 }
 0x49d   : > { %4625 = vsinq.f32 %v3476_v11  ;;  %v4112_v62 = vmin.u32 %v3350_v16, %v7389_v42  ;;  %vm3631_vm8 = vcmp.lt.s32.totalorder %v3609_v55, 4  ;;  %vm3628_vm5 = vcmp.lt.s32.totalorder %v3609_v55, 1 }
 0x49e   : > { %v3627_v35 = vor.u32 %v3626_v5, %v3625_v48  ;;  %v3633_v33 = vsel %vm3631_vm8, %v3621_v53, 2102212464  ;;  %v4119_v13 = vadd.s32 4294967169, %v3496_v41  ;;  %vm3630_vm4 = vcmp.lt.s32.totalorder %v3609_v55, 3 }
 0x49f   : > { %v3352_v12 = vclz %v4112_v62  ;;  %v3632_v58 = vsel %vm3628_vm5, %v3612_v3, %v3615_v6  ;;  %v3636_v22 = vsel %vm3628_vm5, %v3615_v6, %v3618_v49  ;;  %v3634_v9 = vsel %vm3630_vm4, %v3618_v49, %v3633_v33 }
 0x4a0   : > { %v3637_v0 = vsel %vm3631_vm8, %v3624_v36, 920167782  ;;  %v3640_v40 = vsel %vm3628_vm5, %v3618_v49, %v3621_v53  ;;  %v3641_v54 = vsel %vm3631_vm8, %v3627_v35, 1326507024  ;;  %vm3484_vm11 = vcmp.eq.s32.totalorder %v7378_v43, 0 }
 0x4a1   : > { %v4113_v8 = vadd.s32 4294967294, %v3352_v12  ;;  %vm3629_vm12 = vcmp.lt.s32.totalorder %v3609_v55, 2  ;;  %v3638_v47 = vsel %vm3630_vm4, %v3621_v53, %v3637_v0  ;;  %v3642_v37 = vsel %vm3630_vm4, %v3624_v36, %v3641_v54 }
 0x4a2   : > { %v3370_v34 = vsub.s32 4, %v7375_v18  ;;  %v3635_v45 = vsel %vm3629_vm12, %v3632_v58, %v3634_v9  ;;  %v3639_v15 = vsel %vm3629_vm12, %v3636_v22, %v3638_v47  ;;  %v3643_v1 = vsel %vm3629_vm12, %v3640_v40, %v3642_v37 }
 0x4a3   : > { %vm3480_vm6 = vweird.f32 %v7099_v26  ;;  %vm4114_vm7 = vcmp.lt.s32.totalorder %v4113_v8, 0  ;;  %v7410_v61 = vmul.u32.u64.low %v7383_v63, %v3643_v1  ;;  %v7411_v38 = vmul.u32.u64.high %v7383_v63, %v3643_v1, %v7410_v61 }
 0x4a4   : > { %v3502_v32 = vadd.s32 1, %v4119_v13  ;;  %v3355_v46 = vsel %vm4114_vm7, 0, %v4113_v8  ;;  %v7414_v56 = vmul.u32.u64.low %v7383_v63, %v3639_v15  ;;  %v7415_v21 = vmul.u32.u64.high %v7383_v63, %v3639_v15, %v7414_v56 }
 0x4a5   : > { %v3492_v55 = vand.u32 2147483647, %v7368_v39  ;;  %v3340_v23 = vadd.s32 %v7338_v50, %v7348_v27  ;;  %v3356_v10 = vsub.s32 32, %v3355_v46  ;;  %v3360_v14 = vsub.s32 4294967266, %v3355_v46 }
 0x4a6   : > { %vm3503_vm14 = vcmp.gt.s32.totalorder %v3502_v32, 0  ;;  %v4624_v31 = vpop.eup %4623  ;;  %vm3487_vm15 = vcmp.eq.s32.totalorder %v7378_v43, 2  ;;  %v3371_v60 = vsel %vm3286_vm3, %v3370_v34, %v7375_v18  ;;  %v3651_v57 = vmul.u32 %v7383_v63, %v3635_v45 }
 0x4a7   : > { %v3504_v28 = vsel %vm3503_vm14, %v3502_v32, 0  ;;  %v4626_v53 = vpop.eup %4625  ;;  %v3488_v59 = vxor.u32 2147483648, %v4624_v31  ;;  %v3357_v41 = vshll.u32 %v7389_v42, %v3355_v46  ;;  %v3358_v11 = vshrl.u32 %v3340_v23, %v3356_v10 }
 0x4a8   : > { %v3361_v16 = vadd.s32 127, %v3360_v14  ;;  %v3485_v50 = vxor.u32 2147483648, %v4626_v53  ;;  %vm3653_vm0 = vc.u32 %v7411_v38, %v7414_v56  ;;  %v3654_v27 = vadd.s32 1, %v7415_v21 }
 0x4a9   : > { %v3499_v6 = vand.u32 8388607, %v3492_v55  ;;  %v3489_v49 = vsel %vm3487_vm15, %v3488_v59, %v4626_v53  ;;  %v3359_v18 = vor.u32 %v3358_v11, %v3357_v41  ;;  %v3506_v36 = vand.u32 31, %v3504_v28 }
 0x4aa   : > { %v3362_v63 = vshll.u32 %v3361_v16, 23  ;;  %vm3483_vm13 = vcmp.lt.s32.totalorder %v7378_v43, 2  ;;  %v3486_v42 = vsel %vm3484_vm11, %v4624_v31, %v3485_v50  ;;  %vm7437_vm10 = vcmp.le.f32.partialorder %v3284_v20, 0.7853982  ;;  %v4660_v20 = vld [vmem:[%s4744_s11 + $0x58] sm:$0xff] }
 0x4ab   : > { %v3655_v5 = vsel %vm3653_vm0, %v3654_v27, %v7415_v21  ;;  %v3490_v62 = vsel %vm3483_vm13, %v3486_v42, %v3489_v49  ;;  %v3373_v35 = vsel %vm7437_vm10, 0, %v3371_v60  ;;  %v3500_v43 = vor.u32 8388608, %v3499_v6 }
 0x4ac   : > { %v3363_v3 = vor.u32 4788187, %v3362_v63  ;;  %v3656_v33 = vadd.s32 %v3655_v5, %v3651_v57  ;;  %v3491_v13 = vsel %vm3480_vm6, nan, %v3490_v62  ;;  %v7446_v12 = vshrl.u32 %v3504_v28, 5 }
 0x4ad   : > { %v3507_v58 = vsub.s32 32, %v3506_v36  ;;  %v3919_v22 = vadd.f32 %v4660_v20, %v3491_v13  ;;  %v3366_v0 = vcvt.s32.f32 %v3359_v18  ;;  %v3509_v54 = vshll.u32 %v7756_v4, %v3506_v36 }
 0x4ae   : > { %v3364_v9 = vand.u32 2147483647, %v3363_v3  ;;  %v3657_v40 = vadd.s32 536870912, %v3656_v33  ;;  %v3512_v45 = vshll.u32 %v7752_v52, %v3506_v36  ;;  %v3377_v1 = vadd.s32 3, %v3373_v35 }
 0x4af   : > { %v3510_v8 = vshrl.u32 %v7752_v52, %v3507_v58  ;;  %v3513_v47 = vshrl.u32 %v7753_v24, %v3507_v58  ;;  %v3516_v37 = vshrl.u32 %v7755_v30, %v3507_v58  ;;  %3935 = vst [vmem:[%s6638_s8 + $0x58] sm:$0xff] %v3919_v22  ;;  %v3519_v15 = vshrl.u32 %v7743_v19, %v3507_v58 }
 0x4b0   : > { %v3367_v26 = vmul.f32 %v3366_v0, %v3364_v9  ;;  %v3658_v34 = vshrl.u32 %v3657_v40, 30  ;;  %v3515_v61 = vshll.u32 %v7753_v24, %v3506_v36  ;;  %v3518_v32 = vshll.u32 %v7755_v30, %v3506_v36 }
 0x4b1   : > { %v3511_v23 = vor.u32 %v3510_v8, %v3509_v54  ;;  %v3514_v10 = vor.u32 %v3513_v47, %v3512_v45  ;;  %v3521_v60 = vshll.u32 %v7743_v19, %v3506_v36  ;;  %v3522_v57 = vshrl.u32 %v7745_v17, %v3507_v58 }
 0x4b2   : > { %v3368_v46 = vxor.u32 2147483648, %v3367_v26  ;;  %v3659_v21 = vshll.u32 %v3658_v34, 30  ;;  %v3517_v14 = vor.u32 %v3516_v37, %v3515_v61  ;;  %v3520_v31 = vor.u32 %v3519_v15, %v3518_v32 }
 0x4b3   : > { %vm3524_vm1 = vcmp.lt.s32.totalorder %v7446_v12, 1  ;;  %v3540_v59 = vshll.u32 %v3500_v43, 8  ;;  %v3508_v11 = vshrl.u32 %v7756_v4, %v3507_v58  ;;  %v3523_v16 = vor.u32 %v3522_v57, %v3521_v60 }
 0x4b4   : > { %v3369_v28 = vsel %vm3286_vm3, %v3368_v46, %v3367_v26  ;;  %v7462_v53 = vsub.s32 %v3656_v33, %v3659_v21  ;;  %vm3525_vm2 = vcmp.lt.s32.totalorder %v7446_v12, 2  ;;  %vm3526_vm9 = vcmp.lt.s32.totalorder %v7446_v12, 3 }
 0x4b5   : > { %v3372_v41 = vsel %vm7437_vm10, %v7228_v51, %v3369_v28  ;;  %vm3527_vm3 = vcmp.lt.s32.totalorder %v7446_v12, 4  ;;  %v3532_v6 = vsel %vm3524_vm1, %v3511_v23, %v3514_v10  ;;  %v3536_v36 = vsel %vm3524_vm1, %v3514_v10, %v3517_v14 }
 0x4b6   : > { %4627 = vcosq.f32 %v3372_v41  ;;  %v3662_v50 = vsub.s32 0, %v7462_v53  ;;  %v3529_v27 = vsel %vm3527_vm3, %v3517_v14, 2102212464  ;;  %v3533_v49 = vsel %vm3527_vm3, %v3520_v31, 920167782 }
 0x4b7   : > { %4629 = vsinq.f32 %v3372_v41  ;;  %v3534_v63 = vsel %vm3526_vm9, %v3517_v14, %v3533_v49  ;;  %v3537_v42 = vsel %vm3527_vm3, %v3523_v16, 1326507024  ;;  %v3682_v48 = vsub.s32 4, %v3658_v34 }
 0x4b8   : > { %v4124_v18 = vmin.u32 %v3662_v50, %v7462_v53  ;;  %v3535_v5 = vsel %vm3525_vm2, %v3532_v6, %v3534_v63  ;;  %v3538_v62 = vsel %vm3526_vm9, %v3520_v31, %v3537_v42  ;;  %v7486_v3 = vadd.f32 %v7281_v25, %v7009_v29 }
 0x4b9   : > { %v3378_v35 = vand.u32 3, %v3377_v1  ;;  %v3528_v13 = vsel %vm3524_vm1, %v3508_v11, %v3511_v23  ;;  %v3530_v43 = vsel %vm3526_vm9, %v3514_v10, %v3529_v27  ;;  %v3539_v58 = vsel %vm3525_vm2, %v3536_v36, %v3538_v62 }
 0x4ba   : > { %v3664_v33 = vclz %v4124_v18  ;;  %v7494_v20 = vmul.u32.u64.low %v3540_v59, %v3535_v5  ;;  %v7495_v22 = vmul.u32.u64.high %v3540_v59, %v3535_v5, %v7494_v20  ;;  %vm3598_vm8 = vcmp.lt.s32.totalorder %v7285_v7, 0  ;;  %v4661_v18 = vld [vmem:[%s4744_s11 + $0x50] sm:$0xff] }
 0x4bb   : > { %v7499_v29 = vmul.u32.u64.low %v3540_v59, %v3539_v58  ;;  %v7500_v0 = vmul.u32.u64.high %v3540_v59, %v3539_v58, %v7499_v29  ;;  %v3683_v40 = vsel %vm3598_vm8, %v3682_v48, %v3658_v34  ;;  %v3531_v54 = vsel %vm3525_vm2, %v3528_v13, %v3530_v43 }
 0x4bc   : > { %v4125_v9 = vadd.s32 4294967294, %v3664_v33  ;;  %v3807_v8 = vand.u32 2139095040, %v7486_v3  ;;  %vm3380_vm5 = vcmp.eq.s32.totalorder %v3378_v35, 0  ;;  %vm3383_vm4 = vcmp.eq.s32.totalorder %v3378_v35, 2 }
 0x4bd   : > { %vm7509_vm11 = vcmp.le.f32.partialorder %v3596_v44, 0.7853982  ;;  %v3652_v37 = vadd.s32 %v7414_v56, %v7411_v38  ;;  %v3550_v34 = vadd.s32 1, %v7495_v22  ;;  %v3547_v32 = vmul.u32 %v3540_v59, %v3531_v54 }
 0x4be   : > { %vm4126_vm12 = vcmp.lt.s32.totalorder %v4125_v9, 0  ;;  %v3808_v45 = vshrl.u32 %v3807_v8, 23  ;;  %v3685_v61 = vsel %vm7509_vm11, 0, %v3683_v40  ;;  %vm3549_vm6 = vc.u32 %v7500_v0, %v7494_v20 }
 0x4bf   : > { %v3667_v26 = vsel %vm4126_vm12, 0, %v4125_v9  ;;  %v3551_v14 = vsel %vm3549_vm6, %v3550_v34, %v7495_v22  ;;  %v3804_v57 = vand.u32 2147483647, %v7486_v3  ;;  %vm3379_vm7 = vcmp.lt.s32.totalorder %v3378_v35, 2 }
 0x4c0   : > { %v4628_v12 = vpop.eup %4627  ;;  %v3668_v15 = vsub.s32 32, %v3667_v26  ;;  %v3672_v1 = vsub.s32 4294967266, %v3667_v26  ;;  %v3669_v21 = vshll.u32 %v7462_v53, %v3667_v26  ;;  %v4131_v23 = vadd.s32 4294967169, %v3808_v45 }
 0x4c1   : > { %v4630_v46 = vpop.eup %4629  ;;  %v3384_v44 = vxor.u32 2147483648, %v4628_v12  ;;  %v3552_v60 = vadd.s32 %v3551_v14, %v3547_v32  ;;  %vm3376_vm14 = vweird.f32 %v7228_v51  ;;  %v3689_v6 = vadd.s32 3, %v3685_v61 }
 0x4c2   : > { %v3381_v38 = vxor.u32 2147483648, %v4630_v46  ;;  %v3670_v56 = vshrl.u32 %v3652_v37, %v3668_v15  ;;  %v3673_v10 = vadd.s32 127, %v3672_v1  ;;  %v3814_v28 = vadd.s32 1, %v4131_v23 }
 0x4c3   : > { %v3385_v31 = vsel %vm3383_vm4, %v3384_v44, %v4630_v46  ;;  %v3553_v16 = vadd.s32 536870912, %v3552_v60  ;;  %v3811_v42 = vand.u32 8388607, %v3804_v57  ;;  %v7533_v13 = vand.u32 3, %v3689_v6 }
 0x4c4   : > { %v3382_v59 = vsel %vm3380_vm5, %v4628_v12, %v3381_v38  ;;  %v3671_v53 = vor.u32 %v3670_v56, %v3669_v21  ;;  %v3674_v41 = vshll.u32 %v3673_v10, 23  ;;  %vm3815_vm15 = vcmp.gt.s32.totalorder %v3814_v28, 0 }
 0x4c5   : > { %v3386_v11 = vsel %vm3379_vm7, %v3382_v59, %v3385_v31  ;;  %v3816_v49 = vsel %vm3815_vm15, %v3814_v28, 0  ;;  %v7527_v36 = vshrl.u32 %v3553_v16, 30  ;;  %v3812_v58 = vor.u32 8388608, %v3811_v42 }
 0x4c6   : > { %v3387_v50 = vsel %vm3376_vm14, nan, %v3386_v11  ;;  %v3675_v27 = vor.u32 4788187, %v3674_v41  ;;  %v3818_v48 = vand.u32 31, %v3816_v49  ;;  %v3678_v62 = vcvt.s32.f32 %v3671_v53 }
 0x4c7   : > { %v3918_v63 = vadd.f32 %v4661_v18, %v3387_v50  ;;  %v3555_v51 = vshll.u32 %v7527_v36, 30  ;;  %v7540_v9 = vadd.f32 %v7281_v25, %v7093_v2  ;;  %v3817_v2 = vshrl.u32 %v3816_v49, 5 }
 0x4c8   : > { %v3676_v5 = vand.u32 2147483647, %v3675_v27  ;;  %v3819_v35 = vsub.s32 32, %v3818_v48  ;;  %v3821_v40 = vshll.u32 %v7756_v4, %v3818_v48  ;;  %v3824_v26 = vshll.u32 %v7752_v52, %v3818_v48 }
 0x4c9   : > { %3934 = vst [vmem:[%s6638_s8 + $0x50] sm:$0xff] %v3918_v63  ;;  %v7535_v43 = vsub.s32 %v3552_v60, %v3555_v51  ;;  %v3827_v34 = vshll.u32 %v7753_v24, %v3818_v48  ;;  %v3830_v15 = vshll.u32 %v7755_v30, %v3818_v48  ;;  %v3833_v21 = vshll.u32 %v7743_v19, %v3818_v48 }
 0x4ca   : > { %v3679_v33 = vmul.f32 %v3678_v62, %v3676_v5  ;;  %v3822_v22 = vshrl.u32 %v7752_v52, %v3819_v35  ;;  %v3825_v54 = vshrl.u32 %v7753_v24, %v3819_v35  ;;  %v3828_v8 = vshrl.u32 %v7755_v30, %v3819_v35 }
 0x4cb   : > { %v3558_v37 = vsub.s32 0, %v7535_v43  ;;  %v3831_v45 = vshrl.u32 %v7743_v19, %v3819_v35  ;;  %v3834_v23 = vshrl.u32 %v7745_v17, %v3819_v35  ;;  %v3548_v38 = vadd.s32 %v7494_v20, %v7500_v0 }
 0x4cc   : > { %v3680_v29 = vxor.u32 2147483648, %v3679_v33  ;;  %v3823_v25 = vor.u32 %v3822_v22, %v3821_v40  ;;  %v3826_v32 = vor.u32 %v3825_v54, %v3824_v26  ;;  %v3829_v46 = vor.u32 %v3828_v8, %v3827_v34 }
 0x4cd   : > { %v4120_v61 = vmin.u32 %v3558_v37, %v7535_v43  ;;  %v3832_v44 = vor.u32 %v3831_v45, %v3830_v15  ;;  %v3852_v10 = vshll.u32 %v3812_v58, 8  ;;  %v3820_v14 = vshrl.u32 %v7756_v4, %v3819_v35 }
 0x4ce   : > { %v3681_v12 = vsel %vm3598_vm8, %v3680_v29, %v3679_v33  ;;  %v3835_v47 = vor.u32 %v3834_v23, %v3833_v21  ;;  %vm3836_vm0 = vcmp.lt.s32.totalorder %v3817_v2, 1  ;;  %v3703_v31 = vand.u32 2139095040, %v7540_v9 }
 0x4cf   : > { %v3684_v1 = vsel %vm7509_vm11, %v7285_v7, %v3681_v12  ;;  %v3560_v56 = vclz %v4120_v61  ;;  %vm3838_vm13 = vcmp.lt.s32.totalorder %v3817_v2, 3  ;;  %vm3839_vm10 = vcmp.lt.s32.totalorder %v3817_v2, 4 }
 0x4d0   : > { %4631 = vcosq.f32 %v3684_v1  ;;  %v3844_v28 = vsel %vm3836_vm0, %v3823_v25, %v3826_v32  ;;  %v3841_v59 = vsel %vm3839_vm10, %v3829_v46, 2102212464  ;;  %v3845_v53 = vsel %vm3839_vm10, %v3832_v44, 920167782 }
 0x4d1   : > { %4633 = vsinq.f32 %v3684_v1  ;;  %v4121_v60 = vadd.s32 4294967294, %v3560_v56  ;;  %v3848_v41 = vsel %vm3836_vm0, %v3826_v32, %v3829_v46  ;;  %v3849_v11 = vsel %vm3839_vm10, %v3835_v47, 1326507024  ;;  %v4662_v47 = vld [vmem:[%s4744_s11 + $0x68] sm:$0xff] }
 0x4d2   : > { %vm3494_vm1 = vcmp.lt.s32.totalorder %v7368_v39, 0  ;;  %vm3837_vm9 = vcmp.lt.s32.totalorder %v3817_v2, 2  ;;  %v3846_v20 = vsel %vm3838_vm13, %v3829_v46, %v3845_v53  ;;  %v3850_v0 = vsel %vm3838_vm13, %v3832_v44, %v3849_v11 }
 0x4d3   : > { %vm4122_vm2 = vcmp.lt.s32.totalorder %v4121_v60, 0  ;;  %vm3691_vm3 = vcmp.lt.s32.totalorder %v7533_v13, 2  ;;  %v3840_v50 = vsel %vm3836_vm0, %v3820_v14, %v3823_v25  ;;  %v3847_v27 = vsel %vm3837_vm9, %v3844_v28, %v3846_v20 }
 0x4d4   : > { %v3563_v16 = vsel %vm4122_vm2, 0, %v4121_v60  ;;  %v3851_v6 = vsel %vm3837_vm9, %v3848_v41, %v3850_v0  ;;  %vm3688_vm8 = vweird.f32 %v7285_v7  ;;  %v3842_v63 = vsel %vm3838_vm13, %v3826_v32, %v3841_v59 }
 0x4d5   : > { %v3564_v49 = vsub.s32 32, %v3563_v16  ;;  %v3568_v18 = vsub.s32 4294967266, %v3563_v16  ;;  %v3704_v42 = vshrl.u32 %v3703_v31, 23  ;;  %v3565_v35 = vshll.u32 %v7535_v43, %v3563_v16 }
 0x4d6   : > { %v7573_v48 = vmul.u32.u64.low %v3852_v10, %v3851_v6  ;;  %v7574_v5 = vmul.u32.u64.high %v3852_v10, %v3851_v6, %v7573_v48  ;;  %v7576_v62 = vmul.u32.u64.low %v3852_v10, %v3847_v27  ;;  %v7577_v51 = vmul.u32.u64.high %v3852_v10, %v3847_v27, %v7576_v62 }
 0x4d7   : > { %v3566_v33 = vshrl.u32 %v3548_v38, %v3564_v49  ;;  %v3569_v58 = vadd.s32 127, %v3568_v18  ;;  %v4127_v22 = vadd.s32 4294967169, %v3704_v42  ;;  %vm3692_vm5 = vcmp.eq.s32.totalorder %v7533_v13, 0 }
 0x4d8   : > { %vm3695_vm4 = vcmp.eq.s32.totalorder %v7533_v13, 2  ;;  %v3578_v40 = vsub.s32 4, %v7527_v36  ;;  %v3843_v54 = vsel %vm3837_vm9, %v3840_v50, %v3842_v63  ;;  %vm3861_vm11 = vc.u32 %v7574_v5, %v7576_v62 }
 0x4d9   : > { %v3567_v26 = vor.u32 %v3566_v33, %v3565_v35  ;;  %v3570_v34 = vshll.u32 %v3569_v58, 23  ;;  %v3710_v45 = vadd.s32 1, %v4127_v22  ;;  %v3862_v43 = vadd.s32 1, %v7577_v51 }
 0x4da   : > { %v4632_v29 = vpop.eup %4631  ;;  %v3700_v25 = vand.u32 2147483647, %v7540_v9  ;;  %v3859_v61 = vmul.u32 %v3852_v10, %v3843_v54  ;;  %v3579_v32 = vsel %vm3494_vm1, %v3578_v40, %v7527_v36  ;;  %vm7602_vm6 = vcmp.le.f32.partialorder %v3492_v55, 0.7853982 }
 0x4db   : > { %v4634_v8 = vpop.eup %4633  ;;  %v3696_v37 = vxor.u32 2147483648, %v4632_v29  ;;  %v3571_v1 = vor.u32 4788187, %v3570_v34  ;;  %vm3711_vm12 = vcmp.gt.s32.totalorder %v3710_v45, 0  ;;  %v3863_v46 = vsel %vm3861_vm11, %v3862_v43, %v7577_v51 }
 0x4dc   : > { %v3693_v12 = vxor.u32 2147483648, %v4634_v8  ;;  %v3712_v44 = vsel %vm3711_vm12, %v3710_v45, 0  ;;  %v3574_v38 = vcvt.s32.f32 %v3567_v26  ;;  %v3864_v56 = vadd.s32 %v3863_v46, %v3859_v61 }
 0x4dd   : > { %v3697_v15 = vsel %vm3695_vm4, %v3696_v37, %v4634_v8  ;;  %v3572_v23 = vand.u32 2147483647, %v3571_v1  ;;  %v3714_v14 = vand.u32 31, %v3712_v44  ;;  %v3581_v13 = vsel %vm7602_vm6, 0, %v3579_v32 }
 0x4de   : > { %v3694_v2 = vsel %vm3692_vm5, %v4632_v29, %v3693_v12  ;;  %v3865_v28 = vadd.s32 536870912, %v3864_v56  ;;  %v3707_v59 = vand.u32 8388607, %v3700_v25  ;;  %v3585_v22 = vadd.s32 3, %v3581_v13 }
 0x4df   : > { %v3698_v21 = vsel %vm3691_vm3, %v3694_v2, %v3697_v15  ;;  %v3575_v60 = vmul.f32 %v3574_v38, %v3572_v23  ;;  %v3715_v53 = vsub.s32 32, %v3714_v14  ;;  %v3717_v11 = vshll.u32 %v7756_v4, %v3714_v14 }
 0x4e0   : > { %v3699_v10 = vsel %vm3688_vm8, nan, %v3698_v21  ;;  %v7611_v41 = vshrl.u32 %v3865_v28, 30  ;;  %v3720_v55 = vshll.u32 %v7752_v52, %v3714_v14  ;;  %v3723_v16 = vshll.u32 %v7753_v24, %v3714_v14 }
 0x4e1   : > { %v3921_v31 = vadd.f32 %v4662_v47, %v3699_v10  ;;  %v3576_v7 = vxor.u32 2147483648, %v3575_v60  ;;  %v3718_v20 = vshrl.u32 %v7752_v52, %v3715_v53  ;;  %v3721_v0 = vshrl.u32 %v7753_v24, %v3715_v53 }
 0x4e2   : > { %v3724_v50 = vshrl.u32 %v7755_v30, %v3715_v53  ;;  %v3867_v6 = vshll.u32 %v7611_v41, 30  ;;  %v3726_v49 = vshll.u32 %v7755_v30, %v3714_v14  ;;  %v3727_v18 = vshrl.u32 %v7743_v19, %v3715_v53 }
 0x4e3   : > { %3937 = vst [vmem:[%s6638_s8 + $0x68] sm:$0xff] %v3921_v31  ;;  %v3577_v27 = vsel %vm3494_vm1, %v3576_v7, %v3575_v60  ;;  %v3713_v52 = vshrl.u32 %v3712_v44, 5  ;;  %v3719_v42 = vor.u32 %v3718_v20, %v3717_v11  ;;  %v3722_v48 = vor.u32 %v3721_v0, %v3720_v55 }
 0x4e4   : > { %v3580_v63 = vsel %vm7602_vm6, %v7368_v39, %v3577_v27  ;;  %v3868_v24 = vsub.s32 %v3864_v56, %v3867_v6  ;;  %v3725_v51 = vor.u32 %v3724_v50, %v3723_v16  ;;  %v3728_v35 = vor.u32 %v3727_v18, %v3726_v49  ;;  %v4663_v49 = vld [vmem:[%s4744_s11 + $0x60] sm:$0xff] }
 0x4e5   : > { %4635 = vcosq.f32 %v3580_v63  ;;  %v3729_v33 = vshll.u32 %v7743_v19, %v3714_v14  ;;  %v3730_v58 = vshrl.u32 %v7745_v17, %v3715_v53  ;;  %v3708_v29 = vor.u32 8388608, %v3707_v59 }
 0x4e6   : > { %4637 = vsinq.f32 %v3580_v63  ;;  %v3870_v30 = vsub.s32 0, %v3868_v24  ;;  %vm3732_vm7 = vcmp.lt.s32.totalorder %v3713_v52, 1  ;;  %vm3734_vm14 = vcmp.lt.s32.totalorder %v3713_v52, 3 }
 0x4e7   : > { %v3731_v40 = vor.u32 %v3730_v58, %v3729_v33  ;;  %vm3735_vm15 = vcmp.lt.s32.totalorder %v3713_v52, 4  ;;  %v3740_v37 = vsel %vm3732_vm7, %v3719_v42, %v3722_v48  ;;  %v3716_v34 = vshrl.u32 %v7756_v4, %v3715_v53 }
 0x4e8   : > { %v4132_v54 = vmin.u32 %v3870_v30, %v3868_v24  ;;  %v3737_v8 = vsel %vm3735_vm15, %v3725_v51, 2102212464  ;;  %v3741_v26 = vsel %vm3735_vm15, %v3728_v35, 920167782  ;;  %v3744_v12 = vsel %vm3732_vm7, %v3722_v48, %v3725_v51 }
 0x4e9   : > { %v3742_v45 = vsel %vm3734_vm14, %v3725_v51, %v3741_v26  ;;  %v3745_v43 = vsel %vm3735_vm15, %v3731_v40, 1326507024  ;;  %v3586_v19 = vand.u32 3, %v3585_v22  ;;  %vm3733_vm0 = vcmp.lt.s32.totalorder %v3713_v52, 2 }
 0x4ea   : > { %v3872_v15 = vclz %v4132_v54  ;;  %v3748_v17 = vshll.u32 %v3708_v29, 8  ;;  %v3736_v1 = vsel %vm3732_vm7, %v3716_v34, %v3719_v42  ;;  %v3738_v61 = vsel %vm3734_vm14, %v3722_v48, %v3737_v8 }
 0x4eb   : > { %v3743_v2 = vsel %vm3733_vm0, %v3740_v37, %v3742_v45  ;;  %v3746_v32 = vsel %vm3734_vm14, %v3728_v35, %v3745_v43  ;;  %vm3587_vm13 = vcmp.lt.s32.totalorder %v3586_v19, 2  ;;  %v3739_v10 = vsel %vm3733_vm0, %v3736_v1, %v3738_v61 }
 0x4ec   : > { %v4133_v46 = vadd.s32 4294967294, %v3872_v15  ;;  %v3747_v44 = vsel %vm3733_vm0, %v3744_v12, %v3746_v32  ;;  %v7633_v21 = vmul.u32.u64.low %v3748_v17, %v3743_v2  ;;  %v7634_v23 = vmul.u32.u64.high %v3748_v17, %v3743_v2, %v7633_v21 }
 0x4ed   : > { %v7636_v4 = vmul.u32.u64.low %v3748_v17, %v3747_v44  ;;  %v7637_v38 = vmul.u32.u64.high %v3748_v17, %v3747_v44, %v7636_v4  ;;  %vm3588_vm1 = vcmp.eq.s32.totalorder %v3586_v19, 0  ;;  %vm3591_vm2 = vcmp.eq.s32.totalorder %v3586_v19, 2 }
 0x4ee   : > { %vm4134_vm10 = vcmp.lt.s32.totalorder %v4133_v46, 0  ;;  %v3860_v60 = vadd.s32 %v7576_v62, %v7574_v5  ;;  %v3755_v53 = vmul.u32 %v3748_v17, %v3739_v10  ;;  %v3758_v7 = vadd.s32 1, %v7634_v23 }
 0x4ef   : > { %v4636_v56 = vpop.eup %4635  ;;  %v3875_v31 = vsel %vm4134_vm10, 0, %v4133_v46  ;;  %vm3757_vm9 = vc.u32 %v7637_v38, %v7633_v21  ;;  %vm3584_vm3 = vweird.f32 %v7368_v39  ;;  %v3890_v35 = vsub.s32 4, %v7611_v41 }
 0x4f0   : > { %v4638_v14 = vpop.eup %4637  ;;  %v3592_v47 = vxor.u32 2147483648, %v4636_v56  ;;  %v3876_v28 = vsub.s32 32, %v3875_v31  ;;  %v3880_v13 = vsub.s32 4294967266, %v3875_v31  ;;  %v3877_v55 = vshll.u32 %v3868_v24, %v3875_v31 }
 0x4f1   : > { %v3589_v36 = vxor.u32 2147483648, %v4638_v14  ;;  %v3759_v5 = vsel %vm3757_vm9, %v3758_v7, %v7634_v23  ;;  %vm3806_vm8 = vcmp.lt.s32.totalorder %v7486_v3, 0  ;;  %vm3805_vm5 = vcmp.le.f32.partialorder %v3804_v57, 0.7853982 }
 0x4f2   : > { %v3593_v59 = vsel %vm3591_vm2, %v3592_v47, %v4638_v14  ;;  %v3878_v20 = vshrl.u32 %v3860_v60, %v3876_v28  ;;  %v3881_v0 = vadd.s32 127, %v3880_v13  ;;  %v3760_v6 = vadd.s32 %v3759_v5, %v3755_v53  ;;  %v4664_v47 = vld [vmem:[%s4744_s11 + $0x78] sm:$0xff] }
 0x4f3   : > { %v3590_v11 = vsel %vm3588_vm1, %v4636_v56, %v3589_v36  ;;  %v3891_v30 = vsel %vm3806_vm8, %v3890_v35, %v7611_v41  ;;  %v3756_v43 = vadd.s32 %v7633_v21, %v7637_v38  ;;  %vm3896_vm7 = vweird.f32 %v7486_v3 }
 0x4f4   : > { %v3594_v16 = vsel %vm3587_vm13, %v3590_v11, %v3593_v59  ;;  %v3879_v50 = vor.u32 %v3878_v20, %v3877_v55  ;;  %v3882_v27 = vshll.u32 %v3881_v0, 23  ;;  %v3761_v52 = vadd.s32 536870912, %v3760_v6 }
 0x4f5   : > { %v3595_v62 = vsel %vm3584_vm3, nan, %v3594_v16  ;;  %v3893_v8 = vsel %vm3805_vm5, 0, %v3891_v30  ;;  %vm3702_vm14 = vcmp.lt.s32.totalorder %v7540_v9, 0  ;;  %vm3701_vm15 = vcmp.le.f32.partialorder %v3700_v25, 0.7853982 }
 0x4f6   : > { %v3920_v18 = vadd.f32 %v4663_v49, %v3595_v62  ;;  %v3883_v63 = vor.u32 4788187, %v3882_v27  ;;  %v3886_v48 = vcvt.s32.f32 %v3879_v50  ;;  %v3762_v24 = vshrl.u32 %v3761_v52, 30  ;;  %v4665_v27 = vld [vmem:[%s4744_s11 + $0x70] sm:$0xff] }
 0x4f7   : > { %v3897_v26 = vadd.s32 3, %v3893_v8  ;;  %vm3792_vm1 = vweird.f32 %v7540_v9 }
 0x4f8   : > { %3936 = vst [vmem:[%s6638_s8 + $0x60] sm:$0xff] %v3920_v18  ;;  %v3884_v42 = vand.u32 2147483647, %v3883_v63  ;;  %v3763_v39 = vshll.u32 %v3762_v24, 30  ;;  %v3786_v60 = vsub.s32 4, %v3762_v24 }
 0x4f9   : > { %v3898_v12 = vand.u32 3, %v3897_v26 }
 0x4fa   : > { %v3887_v51 = vmul.f32 %v3886_v48, %v3884_v42  ;;  %v3764_v58 = vsub.s32 %v3760_v6, %v3763_v39  ;;  %v3787_v59 = vsel %vm3702_vm14, %v3786_v60, %v3762_v24 }
 0x4fb   : > { %vm3903_vm11 = vcmp.eq.s32.totalorder %v3898_v12, 2  ;;  %vm3900_vm12 = vcmp.eq.s32.totalorder %v3898_v12, 0  ;;  %vm3899_vm6 = vcmp.lt.s32.totalorder %v3898_v12, 2 }
 0x4fc   : > { %v3888_v33 = vxor.u32 2147483648, %v3887_v51  ;;  %v3766_v29 = vsub.s32 0, %v3764_v58 }
 0x4fe   : > { %v3889_v22 = vsel %vm3806_vm8, %v3888_v33, %v3887_v51  ;;  %v4128_v54 = vmin.u32 %v3766_v29, %v3764_v58 }
 0x4ff   : > { %v3892_v40 = vsel %vm3805_vm5, %v7486_v3, %v3889_v22  ;;  %v3789_v3 = vsel %vm3701_vm15, 0, %v3787_v59 }
 0x500   : > { %4639 = vcosq.f32 %v3892_v40  ;;  %v3768_v37 = vclz %v4128_v54  ;;  %v3793_v7 = vadd.s32 3, %v3789_v3 }
 0x501   : > { %4641 = vsinq.f32 %v3892_v40 }
 0x502   : > { %v4129_v34 = vadd.s32 4294967294, %v3768_v37  ;;  %v3794_v11 = vand.u32 3, %v3793_v7 }
 0x504   : > { %vm4130_vm4 = vcmp.lt.s32.totalorder %v4129_v34, 0  ;;  %vm3799_vm0 = vcmp.eq.s32.totalorder %v3794_v11, 2  ;;  %vm3796_vm13 = vcmp.eq.s32.totalorder %v3794_v11, 0  ;;  %vm3795_vm10 = vcmp.lt.s32.totalorder %v3794_v11, 2 }
 0x505   : > { %v3771_v45 = vsel %vm4130_vm4, 0, %v4129_v34 }
 0x506   : > { %v3772_v19 = vsub.s32 32, %v3771_v45  ;;  %v3776_v57 = vsub.s32 4294967266, %v3771_v45  ;;  %v3773_v17 = vshll.u32 %v3764_v58, %v3771_v45 }
 0x508   : > { %v3774_v41 = vshrl.u32 %v3756_v43, %v3772_v19  ;;  %v3777_v1 = vadd.s32 127, %v3776_v57 }
 0x50a   : > { %v4640_v15 = vpop.eup %4639  ;;  %v3775_v46 = vor.u32 %v3774_v41, %v3773_v17  ;;  %v3778_v44 = vshll.u32 %v3777_v1, 23 }
 0x50b   : > { %v4642_v61 = vpop.eup %4641  ;;  %v3904_v2 = vxor.u32 2147483648, %v4640_v15 }
 0x50c   : > { %v3901_v32 = vxor.u32 2147483648, %v4642_v61  ;;  %v3779_v56 = vor.u32 4788187, %v3778_v44  ;;  %v3782_v14 = vcvt.s32.f32 %v3775_v46 }
 0x50d   : > { %v3905_v23 = vsel %vm3903_vm11, %v3904_v2, %v4642_v61 }
 0x50e   : > { %v3902_v4 = vsel %vm3900_vm12, %v4640_v15, %v3901_v32  ;;  %v3780_v10 = vand.u32 2147483647, %v3779_v56 }
 0x50f   : > { %v3906_v21 = vsel %vm3899_vm6, %v3902_v4, %v3905_v23 }
 0x510   : > { %v3907_v38 = vsel %vm3896_vm7, nan, %v3906_v21  ;;  %v3783_v36 = vmul.f32 %v3782_v14, %v3780_v10 }
 0x511   : > { %v3923_v31 = vadd.f32 %v4664_v47, %v3907_v38 }
 0x512   : > { %v3784_v28 = vxor.u32 2147483648, %v3783_v36 }
 0x513   : > { %3939 = vst [vmem:[%s6638_s8 + $0x78] sm:$0xff] %v3923_v31 }
 0x514   : > { %v3785_v13 = vsel %vm3702_vm14, %v3784_v28, %v3783_v36 }
 0x515   : > { %v3788_v53 = vsel %vm3701_vm15, %v7540_v9, %v3785_v13 }
 0x516   : > { %4643 = vcosq.f32 %v3788_v53 }
 0x517   : > { %4645 = vsinq.f32 %v3788_v53 }
 0x520   : > { %v4644_v55 = vpop.eup %4643 }
 0x521   : > { %v4646_v20 = vpop.eup %4645  ;;  %v3800_v0 = vxor.u32 2147483648, %v4644_v55 }
 0x522   : > { %v3797_v16 = vxor.u32 2147483648, %v4646_v20 }
 0x523   : > { %v3801_v5 = vsel %vm3799_vm0, %v3800_v0, %v4646_v20 }
 0x524   : > { %v3798_v25 = vsel %vm3796_vm13, %v4644_v55, %v3797_v16 }
 0x525   : > { %v3802_v62 = vsel %vm3795_vm10, %v3798_v25, %v3801_v5 }
 0x526   : > { %v3803_v50 = vsel %vm3792_vm1, nan, %v3802_v62 }
 0x527   : > { %v3922_v6 = vadd.f32 %v4665_v27, %v3803_v50 }
 0x529   : > { %3938 = vst [vmem:[%s6638_s8 + $0x70] sm:$0xff] %v3922_v6 }
 0x52a PF: > { %s15_s18 = sadd.s32 1, %s4672_s18  }
 0x52b   : > { %p12_p4 = scmp.ge.s32.totalorder %s15_s18, 4  }
 0x52d   :  { %14 = sbr.rel (!%p12_p4) target bundleno = 1 (0x1), region = 70 }

</bundles_post_ra>
